<compile_context>
chip_gen: v6e
topology: v6e:2x2x1
jax: 0.10.0
libtpu: 0.0.40
codegen_flags: <defaults>
</compile_context>

<pallas_src>
import functools

import jax
import jax.numpy as jnp
from jax.experimental import pallas as pl
from jax.experimental.pallas import tpu as pltpu


def _round_up(v, m):
    return (v + m - 1) // m * m


def _tpu_vmem_and_cores():
    """Best-effort generation query -> (physical VMEM bytes per core, multi-TC?)."""
    vmem_cap = 128 << 20          # v5e / v6e physical VMEM
    multi_tc = False
    try:
        kind = jax.devices()[0].device_kind.lower()
    except Exception:
        kind = ""
    if "v7" in kind:              # v7x: 64 MiB per TC, 2 TensorCores per chip
        vmem_cap = 64 << 20
        multi_tc = True
    try:
        info = pltpu.get_tpu_info()
        vmem_cap = int(getattr(info, "vmem_capacity_bytes", vmem_cap))
    except Exception:
        pass
    return vmem_cap, multi_tc


def _vmem_limit_bytes(vmem_cap):
    """Scoped-VMEM request: generous on 128 MiB parts, headroom on 64 MiB parts."""
    if vmem_cap <= (64 << 20):
        limit = 48 << 20          # v7x: leave room for compiler-internal scratch
    else:
        limit = 100 << 20         # v5e/v6e: well above the 16/32 MiB defaults
    return int(min(limit, max(vmem_cap - (12 << 20), 16 << 20)))


def _pick_b_block(batch, n_pad, d_pad, t_pad, c_pad, vmem_limit, multi_tc):
    """Batch elements per grid step, sized from an explicit VMEM estimate."""
    f32, bf16 = 4, 2
    # Constant operands (bf16 weights + f32 LN params), budgeted double-buffered.
    w_bytes = 2 * bf16 * (2 * t_pad * n_pad + 2 * d_pad * c_pad) + 2 * f32 * 4 * d_pad
    # Phase-1 (per single batch element) intermediates: x, y1, h(f32+bf16), tok.
    phase1 = n_pad * d_pad * (f32 + bf16 + f32 + f32) + t_pad * d_pad * (f32 + bf16)
    # Bytes that scale with bb: double-buffered in/out tiles + phase-2 slab values.
    per_item = (2 + 2) * n_pad * d_pad * f32                # x & out tiles, 2x buffered
    per_item += n_pad * d_pad * (f32 + bf16 + f32 + f32)    # xm, y2, ch, out
    per_item += n_pad * c_pad * (f32 + bf16)                # h2 f32 + bf16
    fixed = w_bytes + phase1 + (2 << 20)                    # +2 MiB internal scratch slack

    budget = max(vmem_limit - fixed, per_item)
    bb = max(1, min(batch, budget // per_item))
    if multi_tc and batch >= 2:
        bb = min(bb, batch // 2)       # keep >=2 grid steps so both TCs get work
    bb = max(int(bb), 1)
    while batch % bb:                  # bb must divide batch
        bb -= 1
    if multi_tc and bb > 1 and (batch // bb) % 2:
        cand = bb - 1                  # prefer an even number of grid steps on 2-TC chips
        while cand >= 1:
            if batch % cand == 0 and (batch // cand) % 2 == 0:
                bb = cand
                break
            cand -= 1
    return bb


def mixer_block_kernel(x_ref, g1_ref, b1_ref, wt1_ref, wt2_ref,
                       g2_ref, b2_ref, wc1t_ref, wc2t_ref, o_ref,
                       *, dim, approx_gelu):
    """One grid step: `bb` batch elements, all tiles padded / lane-dense.

    Shapes inside the kernel:
      x_ref, o_ref : (bb, N_pad, D_pad)  f32
      g1,b1,g2,b2  : (1, D_pad)          f32  (zero past `dim`)
      wt1_ref      : (T_pad, N_pad)      bf16 (token-mix fc1, torch layout)
      wt2_ref      : (N_pad, T_pad)      bf16 (token-mix fc2, torch layout)
      wc1t_ref     : (D_pad, C_pad)      bf16 (channel-mix fc1, pre-transposed)
      wc2t_ref     : (C_pad, D_pad)      bf16 (channel-mix fc2, pre-transposed)
    """
    bb, n_pad, d_pad = x_ref.shape
    inv_d = jnp.float32(1.0 / dim)
    eps = jnp.float32(1e-6)            # nn.LayerNorm(dim, eps=1e-06)
    masked = d_pad != dim
    if masked:
        lane_mask = jax.lax.broadcasted_iota(jnp.int32, (1, d_pad), 1) < dim

    def layernorm(v, gamma, beta):
        # Two-pass stats (avoids E[x^2]-mean^2 cancellation). Padded D lanes of
        # v are zero; masking (v-mean) keeps the variance exact, and the zero
        # padded gamma/beta keep the padded output lanes exactly zero.
        mean = jnp.sum(v, axis=-1, keepdims=True) * inv_d
        xc = v - mean
        if masked:
            xc = jnp.where(lane_mask, xc, 0.0)
        var = jnp.sum(xc * xc, axis=-1, keepdims=True) * inv_d
        return xc * jax.lax.rsqrt(var + eps) * gamma + beta

    def gelu(v):
        # approx=True (tanh) routes to the EUP slot and co-issues with the MXU;
        # approx=False matches PyTorch nn.GELU()'s exact-erf default.
        return jax.nn.gelu(v, approximate=approx_gelu)

    # Hoist parameter loads out of the per-batch-element token-mix loop.
    g1 = g1_ref[...]
    b1 = b1_ref[...]
    g2 = g2_ref[...]
    b2 = b2_ref[...]
    wt1 = wt1_ref[...]
    wt2 = wt2_ref[...]

    # ---- Phase 1: token mixing  x <- x + Wt2 @ gelu(Wt1 @ LN1(x)) ----------
    # Mixes across N inside each batch element, so it stays per-batch; the
    # post-token-mix f32 activation is staged in the output tile.
    def token_mix(i):
        x = x_ref[i]                                            # (N_pad, D_pad) f32
        y1 = layernorm(x, g1, b1).astype(jnp.bfloat16)
        h = jnp.dot(wt1, y1, preferred_element_type=jnp.float32)   # (T_pad, D_pad)
        h = gelu(h).astype(jnp.bfloat16)
        tok = jnp.dot(wt2, h, preferred_element_type=jnp.float32)  # (N_pad, D_pad)
        o_ref[i] = x + tok

    if bb <= 4:
        for i in range(bb):            # short static unroll: LLO sees everything
            token_mix(i)
    else:
        def body(i, carry):            # bounded live ranges at large bb
            token_mix(i)
            return carry
        jax.lax.fori_loop(0, bb, body, 0)

    # ---- Phase 2: channel mixing, batch-folded over the whole slab ---------
    #   x <- x + gelu(LN2(x) @ Wc1^T) @ Wc2^T
    xm = o_ref[...].reshape(bb * n_pad, d_pad)                  # layout-preserving merge
    y2 = layernorm(xm, g2, b2).astype(jnp.bfloat16)
    h2 = jnp.dot(y2, wc1t_ref[...], preferred_element_type=jnp.float32)   # (bb*N, C_pad)
    h2 = gelu(h2).astype(jnp.bfloat16)
    ch = jnp.dot(h2, wc2t_ref[...], preferred_element_type=jnp.float32)   # (bb*N, D_pad)
    o_ref[...] = (xm + ch).reshape(bb, n_pad, d_pad).astype(o_ref.dtype)


def _const_spec(shape):
    nd = len(shape)
    return pl.BlockSpec(shape, lambda i, _nd=nd: (0,) * _nd)


def mixer_block(x, params, *, approx_gelu=True):
    """x: (B, N, D) float32.  params: dict of torch-layout f32 weights."""
    B, N, D = x.shape
    t_dim = params["wt1"].shape[0]
    c_dim = params["wc1"].shape[0]

    # D / channel_dim are lane dims of the activations & channel weights;
    # N / token_dim are the lane dims of wt1/wt2 AND the MXU contraction dims
    # of the token-mix matmuls -> all padded to full 128-lane width.
    d_pad = _round_up(D, 128)
    n_pad = _round_up(N, 128)
    t_pad = _round_up(t_dim, 128)
    c_pad = _round_up(c_dim, 128)

    f32, bf16 = jnp.float32, jnp.bfloat16

    # Zero-pad activations / params.  gamma/beta are zero-padded so the padded
    # feature lanes stay exactly zero through both residual branches; padded
    # patch rows only ever produce garbage that the final slice discards.
    xp = jnp.zeros((B, n_pad, d_pad), f32).at[:, :N, :D].set(x.astype(f32))
    g1 = jnp.zeros((1, d_pad), f32).at[0, :D].set(params["g1"].astype(f32))
    b1 = jnp.zeros((1, d_pad), f32).at[0, :D].set(params["b1"].astype(f32))
    g2 = jnp.zeros((1, d_pad), f32).at[0, :D].set(params["g2"].astype(f32))
    b2 = jnp.zeros((1, d_pad), f32).at[0, :D].set(params["b2"].astype(f32))
    # Weights fed to the MXU in bf16 (f32 accumulation in-kernel).
    wt1 = jnp.zeros((t_pad, n_pad), bf16).at[:t_dim, :N].set(params["wt1"].astype(bf16))
    wt2 = jnp.zeros((n_pad, t_pad), bf16).at[:N, :t_dim].set(params["wt2"].astype(bf16))
    wc1t = jnp.zeros((d_pad, c_pad), bf16).at[:D, :c_dim].set(params["wc1"].T.astype(bf16))
    wc2t = jnp.zeros((c_pad, d_pad), bf16).at[:c_dim, :D].set(params["wc2"].T.astype(bf16))

    vmem_cap, multi_tc = _tpu_vmem_and_cores()
    vmem_limit = _vmem_limit_bytes(vmem_cap)
    bb = _pick_b_block(B, n_pad, d_pad, t_pad, c_pad, vmem_limit, multi_tc)
    grid = (B // bb,)

    out_pad = pl.pallas_call(
        functools.partial(mixer_block_kernel, dim=D, approx_gelu=approx_gelu),
        out_shape=jax.ShapeDtypeStruct((B, n_pad, d_pad), f32),
        grid=grid,
        in_specs=[
            pl.BlockSpec((bb, n_pad, d_pad), lambda i: (i, 0, 0)),   # x block
            _const_spec(g1.shape), _const_spec(b1.shape),
            _const_spec(wt1.shape), _const_spec(wt2.shape),
            _const_spec(g2.shape), _const_spec(b2.shape),
            _const_spec(wc1t.shape), _const_spec(wc2t.shape),
        ],
        out_specs=pl.BlockSpec((bb, n_pad, d_pad), lambda i: (i, 0, 0)),
        compiler_params=pltpu.CompilerParams(
            dimension_semantics=("parallel",),      # megacore-shardable on v7x
            vmem_limit_bytes=vmem_limit),
    )(xp, g1, b1, wt1, wt2, g2, b2, wc1t, wc2t)

    return out_pad[:, :N, :D].astype(x.dtype)


def mixer_block_reference(x, params):
    """Pure-JAX f32 reference mirroring the PyTorch forward literally."""
    def ln(v, g, b, eps=1e-6):
        mean = jnp.mean(v, axis=-1, keepdims=True)
        var = jnp.mean((v - mean) ** 2, axis=-1, keepdims=True)
        return (v - mean) * jax.lax.rsqrt(var + eps) * g + b

    gelu = lambda v: jax.nn.gelu(v, approximate=False)   # nn.GELU() exact erf
    g1, b1, g2, b2 = params["g1"], params["b1"], params["g2"], params["b2"]
    wt1, wt2, wc1, wc2 = params["wt1"], params["wt2"], params["wc1"], params["wc2"]

    # x + Rearrange('b d n -> b n d')(mlp_tokens(Rearrange('b n d -> b d n')(norm1(x))))
    y = ln(x, g1, b1)                                 # (B, N, D)
    yt = jnp.swapaxes(y, 1, 2)                        # (B, D, N)
    h = gelu(jnp.einsum("bdn,tn->bdt", yt, wt1))      # (B, D, token_dim)
    h = jnp.einsum("bdt,nt->bdn", h, wt2)             # (B, D, N)
    x = x + jnp.swapaxes(h, 1, 2)
    # x + mlp_channels(norm2(x))
    y2 = ln(x, g2, b2)
    h2 = gelu(jnp.einsum("bnd,cd->bnc", y2, wc1))     # (B, N, channel_dim)
    h2 = jnp.einsum("bnc,dc->bnd", h2, wc2)           # (B, N, D)
    return x + h2


def make_params(key, dim, num_patch, token_dim, channel_dim):
    ks = jax.random.split(key, 8)
    scale = 0.05
    return {
        "g1": 1.0 + 0.1 * jax.random.normal(ks[0], (dim,), jnp.float32),
        "b1": 0.1 * jax.random.normal(ks[1], (dim,), jnp.float32),
        "g2": 1.0 + 0.1 * jax.random.normal(ks[2], (dim,), jnp.float32),
        "b2": 0.1 * jax.random.normal(ks[3], (dim,), jnp.float32),
        # torch Linear weight layout: (out_features, in_features)
        "wt1": scale * jax.random.normal(ks[4], (token_dim, num_patch), jnp.float32),
        "wt2": scale * jax.random.normal(ks[5], (num_patch, token_dim), jnp.float32),
        "wc1": scale * jax.random.normal(ks[6], (channel_dim, dim), jnp.float32),
        "wc2": scale * jax.random.normal(ks[7], (dim, channel_dim), jnp.float32),
    }


if __name__ == "__main__":
    B, N, D = 2, 16, 32          # batch, num_patch, dim
    token_dim, channel_dim = 64, 128

    key = jax.random.PRNGKey(0)
    kx, kp = jax.random.split(key)
    x = jax.random.normal(kx, (B, N, D), jnp.float32)
    params = make_params(kp, D, N, token_dim, channel_dim)

    out = jax.block_until_ready(mixer_block(x, params))
    ref = mixer_block_reference(x, params)

    assert out.shape == (B, N, D)
    # Kernel uses bf16 MXU operands (f32 accumulation) and tanh-approx GELU;
    # compare against the all-f32 exact-erf reference at bf16-level tolerance.
    assert jnp.allclose(out, ref, rtol=2e-2, atol=2e-2), "mismatch vs reference"

    print("KERNEL_OK")
</pallas_src>

<mosaic_0001>
module attributes {stable_mosaic.version = 11 : i64} {
  func.func @mixer_block_kernel(%arg0: i32, %arg1: memref<2x128x128xf32, #tpu.memory_space<vmem>>, %arg2: memref<1x128xf32, #tpu.memory_space<vmem>>, %arg3: memref<1x128xf32, #tpu.memory_space<vmem>>, %arg4: memref<128x128xbf16, #tpu.memory_space<vmem>>, %arg5: memref<128x128xbf16, #tpu.memory_space<vmem>>, %arg6: memref<1x128xf32, #tpu.memory_space<vmem>>, %arg7: memref<1x128xf32, #tpu.memory_space<vmem>>, %arg8: memref<128x128xbf16, #tpu.memory_space<vmem>>, %arg9: memref<128x128xbf16, #tpu.memory_space<vmem>>, %arg10: memref<2x128x128xf32, #tpu.memory_space<vmem>>) attributes {dimension_semantics = [#tpu.dimension_semantics<parallel>], iteration_bounds = array<i64: 1>, scalar_prefetch = 0 : i64, scratch_operands = 0 : i64, tpu.core_type = #tpu.core_type<tc>, window_params = [{transform_indices = @transform_0, window_bounds = array<i64: 2, 128, 128>}, {pipeline_mode = #tpu.pipeline_mode<synchronous>, transform_indices = @transform_1, window_bounds = array<i64: 1, 128>}, {pipeline_mode = #tpu.pipeline_mode<synchronous>, transform_indices = @transform_2, window_bounds = array<i64: 1, 128>}, {pipeline_mode = #tpu.pipeline_mode<synchronous>, transform_indices = @transform_3, window_bounds = array<i64: 128, 128>}, {pipeline_mode = #tpu.pipeline_mode<synchronous>, transform_indices = @transform_4, window_bounds = array<i64: 128, 128>}, {pipeline_mode = #tpu.pipeline_mode<synchronous>, transform_indices = @transform_5, window_bounds = array<i64: 1, 128>}, {pipeline_mode = #tpu.pipeline_mode<synchronous>, transform_indices = @transform_6, window_bounds = array<i64: 1, 128>}, {pipeline_mode = #tpu.pipeline_mode<synchronous>, transform_indices = @transform_7, window_bounds = array<i64: 128, 128>}, {pipeline_mode = #tpu.pipeline_mode<synchronous>, transform_indices = @transform_8, window_bounds = array<i64: 128, 128>}, {transform_indices = @transform_9, window_bounds = array<i64: 2, 128, 128>}]} {
    %0 = tpu.iota {dimensions = array<i32: 1>} : vector<1x128xi32>
    %c32_i32 = arith.constant 32 : i32
    %1 = vector.broadcast %c32_i32 : i32 to vector<1x128xi32>
    %2 = arith.cmpi slt, %0, %1 : vector<1x128xi32>
    %c0 = arith.constant 0 : index
    %c0_0 = arith.constant 0 : index
    %3 = vector.load %arg2[%c0, %c0_0] : memref<1x128xf32, #tpu.memory_space<vmem>>, vector<1x128xf32>
    %c0_1 = arith.constant 0 : index
    %c0_2 = arith.constant 0 : index
    %4 = vector.load %arg3[%c0_1, %c0_2] : memref<1x128xf32, #tpu.memory_space<vmem>>, vector<1x128xf32>
    %c0_3 = arith.constant 0 : index
    %c0_4 = arith.constant 0 : index
    %5 = vector.load %arg6[%c0_3, %c0_4] : memref<1x128xf32, #tpu.memory_space<vmem>>, vector<1x128xf32>
    %c0_5 = arith.constant 0 : index
    %c0_6 = arith.constant 0 : index
    %6 = vector.load %arg7[%c0_5, %c0_6] : memref<1x128xf32, #tpu.memory_space<vmem>>, vector<1x128xf32>
    %c0_7 = arith.constant 0 : index
    %c0_8 = arith.constant 0 : index
    %7 = vector.load %arg4[%c0_7, %c0_8] : memref<128x128xbf16, #tpu.memory_space<vmem>>, vector<128x128xbf16>
    %c0_9 = arith.constant 0 : index
    %c0_10 = arith.constant 0 : index
    %8 = vector.load %arg5[%c0_9, %c0_10] : memref<128x128xbf16, #tpu.memory_space<vmem>>, vector<128x128xbf16>
    %c0_11 = arith.constant 0 : index
    %c0_12 = arith.constant 0 : index
    %c0_13 = arith.constant 0 : index
    %9 = vector.load %arg1[%c0_11, %c0_12, %c0_13] : memref<2x128x128xf32, #tpu.memory_space<vmem>>, vector<1x128x128xf32>
    %10 = vector.shape_cast %9 : vector<1x128x128xf32> to vector<128x128xf32>
    %cst = arith.constant dense<0.000000e+00> : vector<128xf32>
    %11 = vector.multi_reduction <add>, %10, %cst [1] : vector<128x128xf32> to vector<128xf32>
    %12 = vector.shape_cast %11 : vector<128xf32> to vector<128x1xf32>
    %cst_14 = arith.constant 3.125000e-02 : f32
    %13 = vector.broadcast %cst_14 : f32 to vector<128x1xf32>
    %14 = arith.mulf %12, %13 : vector<128x1xf32>
    %15 = vector.broadcast %14 : vector<128x1xf32> to vector<128x128xf32>
    %16 = arith.subf %10, %15 : vector<128x128xf32>
    %cst_15 = arith.constant 0.000000e+00 : f32
    %17 = vector.shape_cast %2 : vector<1x128xi1> to vector<1x128xi1>
    %18 = vector.broadcast %17 : vector<1x128xi1> to vector<128x128xi1>
    %19 = vector.broadcast %cst_15 : f32 to vector<128x128xf32>
    %20 = arith.select %18, %16, %19 : vector<128x128xi1>, vector<128x128xf32>
    %21 = arith.mulf %20, %20 : vector<128x128xf32>
    %cst_16 = arith.constant dense<0.000000e+00> : vector<128xf32>
    %22 = vector.multi_reduction <add>, %21, %cst_16 [1] : vector<128x128xf32> to vector<128xf32>
    %23 = vector.shape_cast %22 : vector<128xf32> to vector<128x1xf32>
    %cst_17 = arith.constant 3.125000e-02 : f32
    %24 = vector.broadcast %cst_17 : f32 to vector<128x1xf32>
    %25 = arith.mulf %23, %24 : vector<128x1xf32>
    %cst_18 = arith.constant 9.99999997E-7 : f32
    %26 = vector.broadcast %cst_18 : f32 to vector<128x1xf32>
    %27 = arith.addf %25, %26 : vector<128x1xf32>
    %28 = math.rsqrt %27 : vector<128x1xf32>
    %29 = vector.broadcast %28 : vector<128x1xf32> to vector<128x128xf32>
    %30 = arith.mulf %20, %29 : vector<128x128xf32>
    %31 = vector.broadcast %3 : vector<1x128xf32> to vector<128x128xf32>
    %32 = arith.mulf %30, %31 : vector<128x128xf32>
    %33 = vector.broadcast %4 : vector<1x128xf32> to vector<128x128xf32>
    %34 = arith.addf %32, %33 : vector<128x128xf32>
    %35 = arith.truncf %34 : vector<128x128xf32> to vector<128x128xbf16>
    %cst_19 = arith.constant dense<0.000000e+00> : vector<128x128xf32>
    %36 = tpu.matmul %7, %35, %cst_19 {dimension_numbers = #tpu.dot_dimension_numbers<[1], [0], [0], [1], [0, 0, 1, 1], [], []>} : vector<128x128xbf16>, vector<128x128xbf16>, vector<128x128xf32> -> vector<128x128xf32>
    %37 = arith.mulf %36, %36 : vector<128x128xf32>
    %38 = arith.mulf %36, %37 : vector<128x128xf32>
    %cst_20 = arith.constant 4.471500e-02 : f32
    %39 = vector.broadcast %cst_20 : f32 to vector<128x128xf32>
    %40 = arith.mulf %39, %38 : vector<128x128xf32>
    %41 = arith.addf %36, %40 : vector<128x128xf32>
    %cst_21 = arith.constant 0.797884583 : f32
    %42 = vector.broadcast %cst_21 : f32 to vector<128x128xf32>
    %43 = arith.mulf %42, %41 : vector<128x128xf32>
    %44 = math.tanh %43 : vector<128x128xf32>
    %cst_22 = arith.constant 1.000000e+00 : f32
    %45 = vector.broadcast %cst_22 : f32 to vector<128x128xf32>
    %46 = arith.addf %45, %44 : vector<128x128xf32>
    %cst_23 = arith.constant 5.000000e-01 : f32
    %47 = vector.broadcast %cst_23 : f32 to vector<128x128xf32>
    %48 = arith.mulf %47, %46 : vector<128x128xf32>
    %49 = arith.mulf %36, %48 : vector<128x128xf32>
    %50 = arith.truncf %49 : vector<128x128xf32> to vector<128x128xbf16>
    %cst_24 = arith.constant dense<0.000000e+00> : vector<128x128xf32>
    %51 = tpu.matmul %8, %50, %cst_24 {dimension_numbers = #tpu.dot_dimension_numbers<[1], [0], [0], [1], [0, 0, 1, 1], [], []>} : vector<128x128xbf16>, vector<128x128xbf16>, vector<128x128xf32> -> vector<128x128xf32>
    %52 = arith.addf %10, %51 : vector<128x128xf32>
    %c0_25 = arith.constant 0 : index
    %c0_26 = arith.constant 0 : index
    %c0_27 = arith.constant 0 : index
    %53 = vector.load %arg10[%c0_25, %c0_26, %c0_27] : memref<2x128x128xf32, #tpu.memory_space<vmem>>, vector<1x128x128xf32>
    %54 = vector.shape_cast %53 : vector<1x128x128xf32> to vector<128x128xf32>
    %55 = vector.shape_cast %52 : vector<128x128xf32> to vector<1x128x128xf32>
    tpu.vector_store %arg10[%c0_25, %c0_26, %c0_27], %55 {strides = array<i32>} : memref<2x128x128xf32, #tpu.memory_space<vmem>>, vector<1x128x128xf32>,
    %c1 = arith.constant 1 : index
    %c0_28 = arith.constant 0 : index
    %c0_29 = arith.constant 0 : index
    %56 = vector.load %arg1[%c1, %c0_28, %c0_29] : memref<2x128x128xf32, #tpu.memory_space<vmem>>, vector<1x128x128xf32>
    %57 = vector.shape_cast %56 : vector<1x128x128xf32> to vector<128x128xf32>
    %cst_30 = arith.constant dense<0.000000e+00> : vector<128xf32>
    %58 = vector.multi_reduction <add>, %57, %cst_30 [1] : vector<128x128xf32> to vector<128xf32>
    %59 = vector.shape_cast %58 : vector<128xf32> to vector<128x1xf32>
    %cst_31 = arith.constant 3.125000e-02 : f32
    %60 = vector.broadcast %cst_31 : f32 to vector<128x1xf32>
    %61 = arith.mulf %59, %60 : vector<128x1xf32>
    %62 = vector.broadcast %61 : vector<128x1xf32> to vector<128x128xf32>
    %63 = arith.subf %57, %62 : vector<128x128xf32>
    %cst_32 = arith.constant 0.000000e+00 : f32
    %64 = vector.shape_cast %2 : vector<1x128xi1> to vector<1x128xi1>
    %65 = vector.broadcast %64 : vector<1x128xi1> to vector<128x128xi1>
    %66 = vector.broadcast %cst_32 : f32 to vector<128x128xf32>
    %67 = arith.select %65, %63, %66 : vector<128x128xi1>, vector<128x128xf32>
    %68 = arith.mulf %67, %67 : vector<128x128xf32>
    %cst_33 = arith.constant dense<0.000000e+00> : vector<128xf32>
    %69 = vector.multi_reduction <add>, %68, %cst_33 [1] : vector<128x128xf32> to vector<128xf32>
    %70 = vector.shape_cast %69 : vector<128xf32> to vector<128x1xf32>
    %cst_34 = arith.constant 3.125000e-02 : f32
    %71 = vector.broadcast %cst_34 : f32 to vector<128x1xf32>
    %72 = arith.mulf %70, %71 : vector<128x1xf32>
    %cst_35 = arith.constant 9.99999997E-7 : f32
    %73 = vector.broadcast %cst_35 : f32 to vector<128x1xf32>
    %74 = arith.addf %72, %73 : vector<128x1xf32>
    %75 = math.rsqrt %74 : vector<128x1xf32>
    %76 = vector.broadcast %75 : vector<128x1xf32> to vector<128x128xf32>
    %77 = arith.mulf %67, %76 : vector<128x128xf32>
    %78 = vector.broadcast %3 : vector<1x128xf32> to vector<128x128xf32>
    %79 = arith.mulf %77, %78 : vector<128x128xf32>
    %80 = vector.broadcast %4 : vector<1x128xf32> to vector<128x128xf32>
    %81 = arith.addf %79, %80 : vector<128x128xf32>
    %82 = arith.truncf %81 : vector<128x128xf32> to vector<128x128xbf16>
    %cst_36 = arith.constant dense<0.000000e+00> : vector<128x128xf32>
    %83 = tpu.matmul %7, %82, %cst_36 {dimension_numbers = #tpu.dot_dimension_numbers<[1], [0], [0], [1], [0, 0, 1, 1], [], []>} : vector<128x128xbf16>, vector<128x128xbf16>, vector<128x128xf32> -> vector<128x128xf32>
    %84 = arith.mulf %83, %83 : vector<128x128xf32>
    %85 = arith.mulf %83, %84 : vector<128x128xf32>
    %cst_37 = arith.constant 4.471500e-02 : f32
    %86 = vector.broadcast %cst_37 : f32 to vector<128x128xf32>
    %87 = arith.mulf %86, %85 : vector<128x128xf32>
    %88 = arith.addf %83, %87 : vector<128x128xf32>
    %cst_38 = arith.constant 0.797884583 : f32
    %89 = vector.broadcast %cst_38 : f32 to vector<128x128xf32>
    %90 = arith.mulf %89, %88 : vector<128x128xf32>
    %91 = math.tanh %90 : vector<128x128xf32>
    %cst_39 = arith.constant 1.000000e+00 : f32
    %92 = vector.broadcast %cst_39 : f32 to vector<128x128xf32>
    %93 = arith.addf %92, %91 : vector<128x128xf32>
    %cst_40 = arith.constant 5.000000e-01 : f32
    %94 = vector.broadcast %cst_40 : f32 to vector<128x128xf32>
    %95 = arith.mulf %94, %93 : vector<128x128xf32>
    %96 = arith.mulf %83, %95 : vector<128x128xf32>
    %97 = arith.truncf %96 : vector<128x128xf32> to vector<128x128xbf16>
    %cst_41 = arith.constant dense<0.000000e+00> : vector<128x128xf32>
    %98 = tpu.matmul %8, %97, %cst_41 {dimension_numbers = #tpu.dot_dimension_numbers<[1], [0], [0], [1], [0, 0, 1, 1], [], []>} : vector<128x128xbf16>, vector<128x128xbf16>, vector<128x128xf32> -> vector<128x128xf32>
    %99 = arith.addf %57, %98 : vector<128x128xf32>
    %c1_42 = arith.constant 1 : index
    %c0_43 = arith.constant 0 : index
    %c0_44 = arith.constant 0 : index
    %100 = vector.load %arg10[%c1_42, %c0_43, %c0_44] : memref<2x128x128xf32, #tpu.memory_space<vmem>>, vector<1x128x128xf32>
    %101 = vector.shape_cast %100 : vector<1x128x128xf32> to vector<128x128xf32>
    %102 = vector.shape_cast %99 : vector<128x128xf32> to vector<1x128x128xf32>
    tpu.vector_store %arg10[%c1_42, %c0_43, %c0_44], %102 {strides = array<i32>} : memref<2x128x128xf32, #tpu.memory_space<vmem>>, vector<1x128x128xf32>,
    %c0_45 = arith.constant 0 : index
    %c0_46 = arith.constant 0 : index
    %c0_47 = arith.constant 0 : index
    %103 = vector.load %arg10[%c0_45, %c0_46, %c0_47] : memref<2x128x128xf32, #tpu.memory_space<vmem>>, vector<2x128x128xf32>
    %104 = vector.shape_cast %103 : vector<2x128x128xf32> to vector<256x128xf32>
    %cst_48 = arith.constant dense<0.000000e+00> : vector<256xf32>
    %105 = vector.multi_reduction <add>, %104, %cst_48 [1] : vector<256x128xf32> to vector<256xf32>
    %106 = vector.shape_cast %105 : vector<256xf32> to vector<256x1xf32>
    %cst_49 = arith.constant 3.125000e-02 : f32
    %107 = vector.broadcast %cst_49 : f32 to vector<256x1xf32>
    %108 = arith.mulf %106, %107 : vector<256x1xf32>
    %109 = vector.broadcast %108 : vector<256x1xf32> to vector<256x128xf32>
    %110 = arith.subf %104, %109 : vector<256x128xf32>
    %cst_50 = arith.constant 0.000000e+00 : f32
    %111 = vector.shape_cast %2 : vector<1x128xi1> to vector<1x128xi1>
    %112 = vector.broadcast %111 : vector<1x128xi1> to vector<256x128xi1>
    %113 = vector.broadcast %cst_50 : f32 to vector<256x128xf32>
    %114 = arith.select %112, %110, %113 : vector<256x128xi1>, vector<256x128xf32>
    %115 = arith.mulf %114, %114 : vector<256x128xf32>
    %cst_51 = arith.constant dense<0.000000e+00> : vector<256xf32>
    %116 = vector.multi_reduction <add>, %115, %cst_51 [1] : vector<256x128xf32> to vector<256xf32>
    %117 = vector.shape_cast %116 : vector<256xf32> to vector<256x1xf32>
    %cst_52 = arith.constant 3.125000e-02 : f32
    %118 = vector.broadcast %cst_52 : f32 to vector<256x1xf32>
    %119 = arith.mulf %117, %118 : vector<256x1xf32>
    %cst_53 = arith.constant 9.99999997E-7 : f32
    %120 = vector.broadcast %cst_53 : f32 to vector<256x1xf32>
    %121 = arith.addf %119, %120 : vector<256x1xf32>
    %122 = math.rsqrt %121 : vector<256x1xf32>
    %123 = vector.broadcast %122 : vector<256x1xf32> to vector<256x128xf32>
    %124 = arith.mulf %114, %123 : vector<256x128xf32>
    %125 = vector.broadcast %5 : vector<1x128xf32> to vector<256x128xf32>
    %126 = arith.mulf %124, %125 : vector<256x128xf32>
    %127 = vector.broadcast %6 : vector<1x128xf32> to vector<256x128xf32>
    %128 = arith.addf %126, %127 : vector<256x128xf32>
    %129 = arith.truncf %128 : vector<256x128xf32> to vector<256x128xbf16>
    %c0_54 = arith.constant 0 : index
    %c0_55 = arith.constant 0 : index
    %130 = vector.load %arg8[%c0_54, %c0_55] : memref<128x128xbf16, #tpu.memory_space<vmem>>, vector<128x128xbf16>
    %cst_56 = arith.constant dense<0.000000e+00> : vector<256x128xf32>
    %131 = tpu.matmul %129, %130, %cst_56 {dimension_numbers = #tpu.dot_dimension_numbers<[1], [0], [0], [1], [0, 0, 1, 1], [], []>} : vector<256x128xbf16>, vector<128x128xbf16>, vector<256x128xf32> -> vector<256x128xf32>
    %132 = arith.mulf %131, %131 : vector<256x128xf32>
    %133 = arith.mulf %131, %132 : vector<256x128xf32>
    %cst_57 = arith.constant 4.471500e-02 : f32
    %134 = vector.broadcast %cst_57 : f32 to vector<256x128xf32>
    %135 = arith.mulf %134, %133 : vector<256x128xf32>
    %136 = arith.addf %131, %135 : vector<256x128xf32>
    %cst_58 = arith.constant 0.797884583 : f32
    %137 = vector.broadcast %cst_58 : f32 to vector<256x128xf32>
    %138 = arith.mulf %137, %136 : vector<256x128xf32>
    %139 = math.tanh %138 : vector<256x128xf32>
    %cst_59 = arith.constant 1.000000e+00 : f32
    %140 = vector.broadcast %cst_59 : f32 to vector<256x128xf32>
    %141 = arith.addf %140, %139 : vector<256x128xf32>
    %cst_60 = arith.constant 5.000000e-01 : f32
    %142 = vector.broadcast %cst_60 : f32 to vector<256x128xf32>
    %143 = arith.mulf %142, %141 : vector<256x128xf32>
    %144 = arith.mulf %131, %143 : vector<256x128xf32>
    %145 = arith.truncf %144 : vector<256x128xf32> to vector<256x128xbf16>
    %c0_61 = arith.constant 0 : index
    %c0_62 = arith.constant 0 : index
    %146 = vector.load %arg9[%c0_61, %c0_62] : memref<128x128xbf16, #tpu.memory_space<vmem>>, vector<128x128xbf16>
    %cst_63 = arith.constant dense<0.000000e+00> : vector<256x128xf32>
    %147 = tpu.matmul %145, %146, %cst_63 {dimension_numbers = #tpu.dot_dimension_numbers<[1], [0], [0], [1], [0, 0, 1, 1], [], []>} : vector<256x128xbf16>, vector<128x128xbf16>, vector<256x128xf32> -> vector<256x128xf32>
    %148 = arith.addf %104, %147 : vector<256x128xf32>
    %149 = vector.shape_cast %148 : vector<256x128xf32> to vector<2x128x128xf32>
    %c0_64 = arith.constant 0 : index
    %c0_65 = arith.constant 0 : index
    %c0_66 = arith.constant 0 : index
    %150 = vector.load %arg10[%c0_64, %c0_65, %c0_66] : memref<2x128x128xf32, #tpu.memory_space<vmem>>, vector<2x128x128xf32>
    tpu.vector_store %arg10[%c0_64, %c0_65, %c0_66], %149 {strides = array<i32>} : memref<2x128x128xf32, #tpu.memory_space<vmem>>, vector<2x128x128xf32>,
    return
  }
  func.func @transform_0(%arg0: i32) -> (i32, i32, i32) {
    %c0_i32 = arith.constant 0 : i32
    %c0_i32_0 = arith.constant 0 : i32
    %c0_i32_1 = arith.constant 0 : i32
    return %arg0, %c0_i32, %c0_i32_0 : i32, i32, i32
  }
  func.func @transform_1(%arg0: i32) -> (i32, i32) {
    %c0_i32 = arith.constant 0 : i32
    %c0_i32_0 = arith.constant 0 : i32
    %c0_i32_1 = arith.constant 0 : i32
    return %c0_i32, %c0_i32_0 : i32, i32
  }
  func.func @transform_2(%arg0: i32) -> (i32, i32) {
    %c0_i32 = arith.constant 0 : i32
    %c0_i32_0 = arith.constant 0 : i32
    %c0_i32_1 = arith.constant 0 : i32
    return %c0_i32, %c0_i32_0 : i32, i32
  }
  func.func @transform_3(%arg0: i32) -> (i32, i32) {
    %c0_i32 = arith.constant 0 : i32
    %c0_i32_0 = arith.constant 0 : i32
    %c0_i32_1 = arith.constant 0 : i32
    return %c0_i32, %c0_i32_0 : i32, i32
  }
  func.func @transform_4(%arg0: i32) -> (i32, i32) {
    %c0_i32 = arith.constant 0 : i32
    %c0_i32_0 = arith.constant 0 : i32
    %c0_i32_1 = arith.constant 0 : i32
    return %c0_i32, %c0_i32_0 : i32, i32
  }
  func.func @transform_5(%arg0: i32) -> (i32, i32) {
    %c0_i32 = arith.constant 0 : i32
    %c0_i32_0 = arith.constant 0 : i32
    %c0_i32_1 = arith.constant 0 : i32
    return %c0_i32, %c0_i32_0 : i32, i32
  }
  func.func @transform_6(%arg0: i32) -> (i32, i32) {
    %c0_i32 = arith.constant 0 : i32
    %c0_i32_0 = arith.constant 0 : i32
    %c0_i32_1 = arith.constant 0 : i32
    return %c0_i32, %c0_i32_0 : i32, i32
  }
  func.func @transform_7(%arg0: i32) -> (i32, i32) {
    %c0_i32 = arith.constant 0 : i32
    %c0_i32_0 = arith.constant 0 : i32
    %c0_i32_1 = arith.constant 0 : i32
    return %c0_i32, %c0_i32_0 : i32, i32
  }
  func.func @transform_8(%arg0: i32) -> (i32, i32) {
    %c0_i32 = arith.constant 0 : i32
    %c0_i32_0 = arith.constant 0 : i32
    %c0_i32_1 = arith.constant 0 : i32
    return %c0_i32, %c0_i32_0 : i32, i32
  }
  func.func @transform_9(%arg0: i32) -> (i32, i32, i32) {
    %c0_i32 = arith.constant 0 : i32
    %c0_i32_0 = arith.constant 0 : i32
    %c0_i32_1 = arith.constant 0 : i32
    return %arg0, %c0_i32, %c0_i32_0 : i32, i32, i32
  }
}

</mosaic_0001>

<bundles_post_ra>
// kernel: tpu_custom_call.1
= control target key start
LH: loop header
LB: loop body
LE: loop exit
PB: predicated region body
PF: predicated region fallthrough
CT: control target
= control target key end

     0   :  { %14 = vsyncpa [#allocation3], 0  ;;  %s5192_s0 = inlined_call_operand.hbm [shape: f32[2,128,128], index: 0, kind: input, shape index: {}]   ;;  %s5193_s1 = inlined_call_operand.vmem [shape: f32[1,128], index: 1, kind: input, shape index: {}]   ;;  %s5194_s2 = inlined_call_operand.vmem [shape: f32[1,128], index: 2, kind: input, shape index: {}]   ;;  %s5195_s3 = inlined_call_operand.hbm [shape: bf16[128,128], index: 3, kind: input, shape index: {}]   ;;  %s5196_s4 = inlined_call_operand.hbm [shape: bf16[128,128], index: 4, kind: input, shape index: {}]   ;;  %s5197_s5 = inlined_call_operand.vmem [shape: f32[1,128], index: 5, kind: input, shape index: {}]   ;;  %s5198_s6 = inlined_call_operand.vmem [shape: f32[1,128], index: 6, kind: input, shape index: {}]   ;;  %s5199_s7 = inlined_call_operand.hbm [shape: bf16[128,128], index: 7, kind: input, shape index: {}]   ;;  %s5200_s8 = inlined_call_operand.hbm [shape: bf16[128,128], index: 8, kind: input, shape index: {}]   ;;  %s5201_s9 = inlined_call_operand.hbm [shape: f32[2,128,128], index: 9, kind: output, shape index: {}]  }
   0x1   :  { %15 = vsyncpa [#allocation6], 0 }
   0x2   :  { %16 = vsyncpa [#allocation9], 0 }
   0x3   :  { %17 = vsyncpa [#allocation4], 0  ;;  %s3680_s30 = smov [#allocation5]  }
   0x4   :  { %s39_s10 = sshll.u32 %s3680_s30, 4  ;;  %s40_s10 = int_to_ptr.vmem [resolvable:$true] %s39_s10 }
   0x5   :  { %s3560_s11 = scalar_lea.vmem %s40_s10, 1024  ;;  %p3565_p1 = scmp.lt.s32.totalorder %s40_s10, %s40_s10 }
   0x6   :  { %p3561_p0 = scmp.ne.s32.totalorder %s40_s10, %s3560_s11  ;;  %p3566_p2 = scmp.lt.s32.totalorder %s3560_s11, %s3560_s11 }
   0x8   :  { %p3567_p3 = por %p3566_p2, %p3565_p1 }
   0xa   :  { %p3568_p4 = pnand %p3567_p3, %p3561_p0 }
   0xc   :  { %3571 = shalt.err (!%p3568_p4)
}
   0xd   :  { %s3681_s12 = smov 64   ;;  %s3682_s13 = smov 4  }
   0xe   :  { %45 = dma.hbm_to_vmem [thread:$0]  %s5195_s3, 1024, %s40_s10, [#allocation6], %s3681_s12, %s3681_s12, %s3682_s13  }
   0xf   :  { %s3683_s16 = smov [#allocation8]   ;;  %s3684_s18 = smov [#allocation2]  }
  0x10   :  { %s67_s17 = sshll.u32 %s3683_s16, 4  ;;  %s23_s19 = sshll.u32 %s3684_s18, 4  ;;  %s68_s17 = int_to_ptr.vmem [resolvable:$true] %s67_s17  ;;  %s24_s19 = int_to_ptr.vmem [resolvable:$true] %s23_s19 }
  0x11   :  { %s3580_s20 = scalar_lea.vmem %s68_s17, 1024  ;;  %p3585_p6 = scmp.lt.s32.totalorder %s68_s17, %s68_s17 }
  0x12   :  { %p3581_p5 = scmp.ne.s32.totalorder %s68_s17, %s3580_s20  ;;  %p3586_p7 = scmp.lt.s32.totalorder %s3580_s20, %s3580_s20 }
  0x14   :  { %p3587_p8 = por %p3586_p7, %p3585_p6 }
  0x16   :  { %p3588_p9 = pnand %p3587_p8, %p3581_p5 }
  0x18   :  { %3591 = shalt.err (!%p3588_p9)
}
  0x19   :  { %73 = dma.hbm_to_vmem [thread:$0]  %s5199_s7, 1024, %s68_s17, [#allocation9], %s3681_s12, %s3681_s12, %s3682_s13  }
  0x1a   :  { %s3600_s3 = scalar_lea.vmem %s24_s19, 4096  ;;  %p3605_p11 = scmp.lt.s32.totalorder %s24_s19, %s24_s19 }
  0x1b   :  { %p3601_p10 = scmp.ne.s32.totalorder %s24_s19, %s3600_s3  ;;  %p3606_p12 = scmp.lt.s32.totalorder %s3600_s3, %s3600_s3 }
  0x1d   :  { %p3607_p13 = por %p3606_p12, %p3605_p11 }
  0x1f   :  { %p3608_p0 = pnand %p3607_p13, %p3601_p10 }
  0x21   :  { %3611 = shalt.err (!%p3608_p0)
}
  0x22   :  { %s3685_s23 = smov 128   ;;  %s3686_s24 = smov 8  }
  0x23   :  { %29 = dma.hbm_to_vmem [thread:$0]  %s5192_s0, 4096, %s24_s19, [#allocation3], %s3685_s23, %s3685_s23, %s3686_s24  }
  0x24   :  { %s3687_s27 = smov [#allocation7]   ;;  %s3688_s7 = smov [#allocation10]  }
  0x25   :  { %s51_s28 = sshll.u32 %s3687_s27, 4  ;;  %s79_s29 = sshll.u32 %s3688_s7, 4  ;;  %s52_s28 = int_to_ptr.vmem [resolvable:$true] %s51_s28  ;;  %s80_s29 = int_to_ptr.vmem [resolvable:$true] %s79_s29 }
  0x26   :  { %s3620_s30 = scalar_lea.vmem %s52_s28, 1024  ;;  %p3625_p2 = scmp.lt.s32.totalorder %s52_s28, %s52_s28 }
  0x27   :  { %p3621_p1 = scmp.ne.s32.totalorder %s52_s28, %s3620_s30  ;;  %p3626_p3 = scmp.lt.s32.totalorder %s3620_s30, %s3620_s30 }
  0x29   :  { %p3627_p4 = por %p3626_p3, %p3625_p2 }
  0x2b   :  { %p3628_p5 = pnand %p3627_p4, %p3621_p1 }
  0x2d   :  { %3631 = shalt.err (!%p3628_p5)
}
  0x2e   :  { %57 = dma.hbm_to_vmem [thread:$0]  %s5196_s4, 1024, %s52_s28, [#allocation6], %s3681_s12, %s3681_s12, %s3682_s13  }
  0x2f   :  { %s3640_s0 = scalar_lea.vmem %s80_s29, 1024  ;;  %p3645_p7 = scmp.lt.s32.totalorder %s80_s29, %s80_s29 }
  0x30   :  { %p3641_p6 = scmp.ne.s32.totalorder %s80_s29, %s3640_s0  ;;  %p3646_p8 = scmp.lt.s32.totalorder %s3640_s0, %s3640_s0 }
  0x32   :  { %p3647_p9 = por %p3646_p8, %p3645_p7 }
  0x34   :  { %p3648_p10 = pnand %p3647_p9, %p3641_p6 }
  0x36   :  { %3651 = shalt.err (!%p3648_p10)
}
  0x37   :  { %85 = dma.hbm_to_vmem [thread:$0]  %s5200_s8, 1024, %s80_s29, [#allocation9], %s3681_s12, %s3681_s12, %s3682_s13  }
  0x38   :  { %3672 = dma.done.wait [#allocation3], 4096  }
  0x39   :  { %3673 = vsyncadd [#allocation3], 4294963200 }
  0x3a   :  { %3674 = dma.done.wait [#allocation6], 2048  }
  0x3b   :  { %3675 = vsyncadd [#allocation6], 4294965248 }
  0x3c   :  { %3676 = dma.done.wait [#allocation9], 2048  }
  0x3d   :  { %3677 = vsyncadd [#allocation9], 4294965248  ;;  %v3770_v0 = vld [vmem:[#allocation2 + $0x70] sm:$0xff]  ;;  %v3772_v1 = vld [vmem:[#allocation2 + $0x60] sm:$0xff]  ;;  %v102_v32 = vlaneseq }
  0x3e   :  { %185 = vadd.xlane.f32.xlu0 %v3770_v0  ;;  %181 = vadd.xlane.f32.xlu1 %v3772_v1  ;;  %v3776_v2 = vld [vmem:[#allocation2 + $0x78] sm:$0xff]  ;;  %v3778_v3 = vld [vmem:[#allocation2 + $0x68] sm:$0xff]  ;;  %v3782_v4 = vld [vmem:[#allocation2 + $0x50] sm:$0xff] }
  0x3f   :  { %v3784_v5 = vld [vmem:[#allocation2 + $0x58] sm:$0xff]  ;;  %v3788_v6 = vld [vmem:[#allocation2 + $0x40] sm:$0xff]  ;;  %v3790_v7 = vld [vmem:[#allocation2 + $0x48] sm:$0xff]  ;;  %v3866_v33 = vand.u32 127, %v102_v32 }
  0x40   :  { %v3792_v8 = vld [vmem:[#allocation2 + $0x30] sm:$0xff]  ;;  %v3796_v9 = vld [vmem:[#allocation2 + $0x38] sm:$0xff]  ;;  %v3798_v10 = vld [vmem:[#allocation2 + $0x20] sm:$0xff] }
  0x41   :  { %v3800_v11 = vld [vmem:[#allocation2 + $0x28] sm:$0xff]  ;;  %v3804_v12 = vld [vmem:[#allocation2 + $0x10] sm:$0xff]  ;;  %v3806_v13 = vld [vmem:[#allocation2 + $0x18] sm:$0xff]  ;;  %5231 = vst [vmem:[#allocation16_spill] sm:$0xff] %v3866_v33  ;;  %vm104_vm0 = vcmp.lt.s32.totalorder %v3866_v33, 32 }
  0x42   :  { %187 = vadd.xlane.f32.xlu0 %v3776_v2  ;;  %183 = vadd.xlane.f32.xlu1 %v3778_v3  ;;  %v3810_v14 = vld [vmem:[#allocation2] sm:$0xff]  ;;  %v3812_v15 = vld [vmem:[#allocation2 + $0x8] sm:$0xff]  ;;  %v3816_v16 = vld [vmem:[#allocation2 + $0xf0] sm:$0xff] }
  0x43   :  { %v3818_v17 = vld [vmem:[#allocation2 + $0xf8] sm:$0xff]  ;;  %v3824_v18 = vld [vmem:[#allocation2 + $0xe0] sm:$0xff]  ;;  %v3826_v19 = vld [vmem:[#allocation2 + $0xe8] sm:$0xff] }
  0x44   :  { %v3830_v20 = vld [vmem:[#allocation2 + $0xd0] sm:$0xff]  ;;  %v3832_v21 = vld [vmem:[#allocation2 + $0xd8] sm:$0xff]  ;;  %v3836_v22 = vld [vmem:[#allocation2 + $0xc0] sm:$0xff] }
  0x45   :  { %v3838_v23 = vld [vmem:[#allocation2 + $0xc8] sm:$0xff]  ;;  %v3842_v24 = vld [vmem:[#allocation2 + $0xb0] sm:$0xff]  ;;  %v3844_v25 = vld [vmem:[#allocation2 + $0xb8] sm:$0xff] }
  0x46   :  { %177 = vadd.xlane.f32.xlu0 %v3782_v4  ;;  %179 = vadd.xlane.f32.xlu1 %v3784_v5  ;;  %v3848_v26 = vld [vmem:[#allocation2 + $0xa0] sm:$0xff]  ;;  %v3850_v27 = vld [vmem:[#allocation2 + $0xa8] sm:$0xff]  ;;  %v3854_v28 = vld [vmem:[#allocation2 + $0x90] sm:$0xff] }
  0x47   :  { %v3856_v29 = vld [vmem:[#allocation2 + $0x98] sm:$0xff]  ;;  %v3860_v30 = vld [vmem:[#allocation2 + $0x80] sm:$0xff]  ;;  %v3862_v31 = vld [vmem:[#allocation2 + $0x88] sm:$0xff] }
  0x4a   :  { %173 = vadd.xlane.f32.xlu0 %v3788_v6  ;;  %175 = vadd.xlane.f32.xlu1 %v3790_v7 }
  0x4e   :  { %169 = vadd.xlane.f32.xlu0 %v3792_v8  ;;  %171 = vadd.xlane.f32.xlu1 %v3796_v9 }
  0x52   :  { %165 = vadd.xlane.f32.xlu0 %v3798_v10  ;;  %167 = vadd.xlane.f32.xlu1 %v3800_v11 }
  0x56   :  { %161 = vadd.xlane.f32.xlu0 %v3804_v12  ;;  %163 = vadd.xlane.f32.xlu1 %v3806_v13 }
  0x5a   :  { %157 = vadd.xlane.f32.xlu0 %v3810_v14  ;;  %159 = vadd.xlane.f32.xlu1 %v3812_v15 }
  0x5e   :  { %922 = vadd.xlane.f32.xlu0 %v3816_v16  ;;  %924 = vadd.xlane.f32.xlu1 %v3818_v17 }
  0x62   :  { %918 = vadd.xlane.f32.xlu0 %v3824_v18  ;;  %920 = vadd.xlane.f32.xlu1 %v3826_v19 }
  0x66   :  { %914 = vadd.xlane.f32.xlu0 %v3830_v20  ;;  %916 = vadd.xlane.f32.xlu1 %v3832_v21 }
  0x6a   :  { %910 = vadd.xlane.f32.xlu0 %v3836_v22  ;;  %912 = vadd.xlane.f32.xlu1 %v3838_v23 }
  0x6e   :  { %906 = vadd.xlane.f32.xlu0 %v3842_v24  ;;  %908 = vadd.xlane.f32.xlu1 %v3844_v25 }
  0x72   :  { %902 = vadd.xlane.f32.xlu0 %v3848_v26  ;;  %904 = vadd.xlane.f32.xlu1 %v3850_v27 }
  0x76   :  { %898 = vadd.xlane.f32.xlu0 %v3854_v28  ;;  %900 = vadd.xlane.f32.xlu1 %v3856_v29 }
  0x7a   :  { %894 = vadd.xlane.f32.xlu0 %v3860_v30  ;;  %896 = vadd.xlane.f32.xlu1 %v3862_v31 }
  0xc7   :  { %v186_v34 = vpop.xlane.xlu0 %185  ;;  %v182_v35 = vpop.xlane.xlu1 %181 }
  0xc8   :  { %v203_v36 = vmul.f32 0.03125, %v186_v34  ;;  %v201_v37 = vmul.f32 0.03125, %v182_v35 }
  0xca   :  { %v219_v38 = vsub.f32 %v3770_v0, %v203_v36  ;;  %v217_v39 = vsub.f32 %v3772_v1, %v201_v37 }
  0xcb   :  { %v188_v40 = vpop.xlane.xlu0 %187  ;;  %v184_v41 = vpop.xlane.xlu1 %183 }
  0xcc   :  { %v204_v42 = vmul.f32 0.03125, %v188_v40  ;;  %v202_v43 = vmul.f32 0.03125, %v184_v41  ;;  %v3873_v44 = vsel %vm104_vm0, %v219_v38, 0.0  ;;  %v3877_v45 = vsel %vm104_vm0, %v217_v39, 0.0 }
  0xcd   :  { %v253_v46 = vmul.f32 %v3873_v44, %v3873_v44  ;;  %v251_v51 = vmul.f32 %v3877_v45, %v3877_v45 }
  0xce   :  { %v220_v47 = vsub.f32 %v3776_v2, %v204_v42  ;;  %v218_v48 = vsub.f32 %v3778_v3, %v202_v43 }
  0xcf   :  { %v178_v49 = vpop.xlane.xlu0 %177  ;;  %283 = vadd.xlane.f32.xlu0 %v253_v46  ;;  %v180_v50 = vpop.xlane.xlu1 %179 }
  0xd0   :  { %v199_v52 = vmul.f32 0.03125, %v178_v49  ;;  %v200_v53 = vmul.f32 0.03125, %v180_v50  ;;  %v3887_v54 = vsel %vm104_vm0, %v220_v47, 0.0  ;;  %v3891_v55 = vsel %vm104_vm0, %v218_v48, 0.0 }
  0xd1   :  { %v254_v56 = vmul.f32 %v3887_v54, %v3887_v54  ;;  %v252_v61 = vmul.f32 %v3891_v55, %v3891_v55 }
  0xd2   :  { %v215_v57 = vsub.f32 %v3782_v4, %v199_v52  ;;  %v216_v58 = vsub.f32 %v3784_v5, %v200_v53 }
  0xd3   :  { %v174_v59 = vpop.xlane.xlu0 %173  ;;  %285 = vadd.xlane.f32.xlu1 %v254_v56  ;;  %279 = vadd.xlane.f32.xlu0 %v251_v51  ;;  %v176_v60 = vpop.xlane.xlu1 %175 }
  0xd4   :  { %v197_v62 = vmul.f32 0.03125, %v174_v59  ;;  %v198_v63 = vmul.f32 0.03125, %v176_v60  ;;  %v3901_v0 = vsel %vm104_vm0, %v215_v57, 0.0  ;;  %v3905_v1 = vsel %vm104_vm0, %v216_v58, 0.0 }
  0xd5   :  { %v249_v2 = vmul.f32 %v3901_v0, %v3901_v0  ;;  %v250_v34 = vmul.f32 %v3905_v1, %v3905_v1 }
  0xd6   :  { %v213_v3 = vsub.f32 %v3788_v6, %v197_v62  ;;  %v214_v4 = vsub.f32 %v3790_v7, %v198_v63 }
  0xd7   :  { %v170_v5 = vpop.xlane.xlu0 %169  ;;  %281 = vadd.xlane.f32.xlu1 %v252_v61  ;;  %275 = vadd.xlane.f32.xlu0 %v249_v2  ;;  %v172_v32 = vpop.xlane.xlu1 %171 }
  0xd8   :  { %v195_v35 = vmul.f32 0.03125, %v170_v5  ;;  %v196_v36 = vmul.f32 0.03125, %v172_v32  ;;  %v3915_v37 = vsel %vm104_vm0, %v213_v3, 0.0  ;;  %v3919_v38 = vsel %vm104_vm0, %v214_v4, 0.0 }
  0xd9   :  { %v247_v6 = vmul.f32 %v3915_v37, %v3915_v37  ;;  %v248_v42 = vmul.f32 %v3919_v38, %v3919_v38 }
  0xda   :  { %v211_v7 = vsub.f32 %v3792_v8, %v195_v35  ;;  %v212_v39 = vsub.f32 %v3796_v9, %v196_v36 }
  0xdb   :  { %v166_v40 = vpop.xlane.xlu0 %165  ;;  %277 = vadd.xlane.f32.xlu1 %v250_v34  ;;  %271 = vadd.xlane.f32.xlu0 %v247_v6  ;;  %v168_v41 = vpop.xlane.xlu1 %167 }
  0xdc   :  { %v193_v43 = vmul.f32 0.03125, %v166_v40  ;;  %v194_v46 = vmul.f32 0.03125, %v168_v41  ;;  %v3929_v47 = vsel %vm104_vm0, %v211_v7, 0.0  ;;  %v3933_v48 = vsel %vm104_vm0, %v212_v39, 0.0 }
  0xdd   :  { %v245_v8 = vmul.f32 %v3929_v47, %v3929_v47  ;;  %v246_v52 = vmul.f32 %v3933_v48, %v3933_v48 }
  0xde   :  { %v209_v9 = vsub.f32 %v3798_v10, %v193_v43  ;;  %v210_v49 = vsub.f32 %v3800_v11, %v194_v46 }
  0xdf   :  { %v162_v50 = vpop.xlane.xlu0 %161  ;;  %273 = vadd.xlane.f32.xlu1 %v248_v42  ;;  %267 = vadd.xlane.f32.xlu0 %v245_v8  ;;  %v164_v51 = vpop.xlane.xlu1 %163 }
  0xe0   :  { %v191_v53 = vmul.f32 0.03125, %v162_v50  ;;  %v192_v56 = vmul.f32 0.03125, %v164_v51  ;;  %v3943_v57 = vsel %vm104_vm0, %v209_v9, 0.0  ;;  %v3947_v58 = vsel %vm104_vm0, %v210_v49, 0.0 }
  0xe1   :  { %v243_v10 = vmul.f32 %v3943_v57, %v3943_v57  ;;  %v244_v61 = vmul.f32 %v3947_v58, %v3947_v58 }
  0xe2   :  { %v207_v11 = vsub.f32 %v3804_v12, %v191_v53  ;;  %v208_v59 = vsub.f32 %v3806_v13, %v192_v56 }
  0xe3   :  { %269 = vadd.xlane.f32.xlu1 %v246_v52  ;;  %263 = vadd.xlane.f32.xlu0 %v243_v10  ;;  %v158_v60 = vpop.xlane.xlu0 %157  ;;  %v160_v62 = vpop.xlane.xlu1 %159 }
  0xe4   :  { %v189_v63 = vmul.f32 0.03125, %v158_v60  ;;  %v190_v2 = vmul.f32 0.03125, %v160_v62  ;;  %v3957_v3 = vsel %vm104_vm0, %v207_v11, 0.0  ;;  %v3961_v4 = vsel %vm104_vm0, %v208_v59, 0.0 }
  0xe5   :  { %v241_v12 = vmul.f32 %v3957_v3, %v3957_v3  ;;  %v242_v34 = vmul.f32 %v3961_v4, %v3961_v4 }
  0xe6   :  { %v205_v13 = vsub.f32 %v3810_v14, %v189_v63  ;;  %v206_v5 = vsub.f32 %v3812_v15, %v190_v2 }
  0xe7   :  { %265 = vadd.xlane.f32.xlu1 %v244_v61  ;;  %259 = vadd.xlane.f32.xlu0 %v241_v12  ;;  %v923_v32 = vpop.xlane.xlu0 %922  ;;  %v925_v35 = vpop.xlane.xlu1 %924 }
  0xe8   :  { %v940_v36 = vmul.f32 0.03125, %v923_v32  ;;  %v941_v6 = vmul.f32 0.03125, %v925_v35  ;;  %v3971_v7 = vsel %vm104_vm0, %v205_v13, 0.0  ;;  %v3975_v39 = vsel %vm104_vm0, %v206_v5, 0.0 }
  0xe9   :  { %v239_v14 = vmul.f32 %v3971_v7, %v3971_v7  ;;  %v240_v42 = vmul.f32 %v3975_v39, %v3975_v39 }
  0xea   :  { %v956_v15 = vsub.f32 %v3816_v16, %v940_v36  ;;  %v957_v40 = vsub.f32 %v3818_v17, %v941_v6 }
  0xeb   :  { %261 = vadd.xlane.f32.xlu1 %v242_v34  ;;  %255 = vadd.xlane.f32.xlu0 %v239_v14  ;;  %v919_v41 = vpop.xlane.xlu0 %918  ;;  %v921_v43 = vpop.xlane.xlu1 %920 }
  0xec   :  { %v938_v46 = vmul.f32 0.03125, %v919_v41  ;;  %v939_v8 = vmul.f32 0.03125, %v921_v43  ;;  %v3985_v9 = vsel %vm104_vm0, %v956_v15, 0.0  ;;  %v3989_v49 = vsel %vm104_vm0, %v957_v40, 0.0 }
  0xed   :  { %v988_v16 = vmul.f32 %v3985_v9, %v3985_v9  ;;  %v989_v52 = vmul.f32 %v3989_v49, %v3989_v49 }
  0xee   :  { %v954_v17 = vsub.f32 %v3824_v18, %v938_v46  ;;  %v955_v50 = vsub.f32 %v3826_v19, %v939_v8 }
  0xef   :  { %257 = vadd.xlane.f32.xlu1 %v240_v42  ;;  %1018 = vadd.xlane.f32.xlu0 %v988_v16  ;;  %v915_v51 = vpop.xlane.xlu0 %914  ;;  %v917_v53 = vpop.xlane.xlu1 %916 }
  0xf0   :  { %v936_v56 = vmul.f32 0.03125, %v915_v51  ;;  %v937_v10 = vmul.f32 0.03125, %v917_v53  ;;  %v3999_v11 = vsel %vm104_vm0, %v954_v17, 0.0  ;;  %v4003_v59 = vsel %vm104_vm0, %v955_v50, 0.0 }
  0xf1   :  { %v986_v18 = vmul.f32 %v3999_v11, %v3999_v11  ;;  %v987_v62 = vmul.f32 %v4003_v59, %v4003_v59 }
  0xf2   :  { %v952_v19 = vsub.f32 %v3830_v20, %v936_v56  ;;  %v953_v60 = vsub.f32 %v3832_v21, %v937_v10 }
  0xf3   :  { %1020 = vadd.xlane.f32.xlu1 %v989_v52  ;;  %1014 = vadd.xlane.f32.xlu0 %v986_v18  ;;  %v911_v61 = vpop.xlane.xlu0 %910  ;;  %v913_v63 = vpop.xlane.xlu1 %912 }
  0xf4   :  { %v934_v2 = vmul.f32 0.03125, %v911_v61  ;;  %v935_v12 = vmul.f32 0.03125, %v913_v63  ;;  %v4013_v13 = vsel %vm104_vm0, %v952_v19, 0.0  ;;  %v4017_v5 = vsel %vm104_vm0, %v953_v60, 0.0 }
  0xf5   :  { %v984_v20 = vmul.f32 %v4013_v13, %v4013_v13  ;;  %v985_v35 = vmul.f32 %v4017_v5, %v4017_v5 }
  0xf6   :  { %v950_v21 = vsub.f32 %v3836_v22, %v934_v2  ;;  %v951_v32 = vsub.f32 %v3838_v23, %v935_v12 }
  0xf7   :  { %1016 = vadd.xlane.f32.xlu1 %v987_v62  ;;  %1010 = vadd.xlane.f32.xlu0 %v984_v20  ;;  %v907_v34 = vpop.xlane.xlu0 %906  ;;  %v909_v36 = vpop.xlane.xlu1 %908 }
  0xf8   :  { %v932_v6 = vmul.f32 0.03125, %v907_v34  ;;  %v933_v14 = vmul.f32 0.03125, %v909_v36  ;;  %v4027_v15 = vsel %vm104_vm0, %v950_v21, 0.0  ;;  %v4031_v40 = vsel %vm104_vm0, %v951_v32, 0.0 }
  0xf9   :  { %v982_v22 = vmul.f32 %v4027_v15, %v4027_v15  ;;  %v983_v43 = vmul.f32 %v4031_v40, %v4031_v40 }
  0xfa   :  { %v948_v23 = vsub.f32 %v3842_v24, %v932_v6  ;;  %v949_v41 = vsub.f32 %v3844_v25, %v933_v14 }
  0xfb   :  { %1012 = vadd.xlane.f32.xlu1 %v985_v35  ;;  %1006 = vadd.xlane.f32.xlu0 %v982_v22  ;;  %v903_v42 = vpop.xlane.xlu0 %902  ;;  %v905_v46 = vpop.xlane.xlu1 %904 }
  0xfc   :  { %v930_v8 = vmul.f32 0.03125, %v903_v42  ;;  %v931_v16 = vmul.f32 0.03125, %v905_v46  ;;  %v4041_v17 = vsel %vm104_vm0, %v948_v23, 0.0  ;;  %v4045_v50 = vsel %vm104_vm0, %v949_v41, 0.0 }
  0xfd   :  { %v980_v24 = vmul.f32 %v4041_v17, %v4041_v17  ;;  %v981_v53 = vmul.f32 %v4045_v50, %v4045_v50 }
  0xfe   :  { %v946_v25 = vsub.f32 %v3848_v26, %v930_v8  ;;  %v947_v51 = vsub.f32 %v3850_v27, %v931_v16 }
  0xff   :  { %1008 = vadd.xlane.f32.xlu1 %v983_v43  ;;  %1002 = vadd.xlane.f32.xlu0 %v980_v24  ;;  %v899_v52 = vpop.xlane.xlu0 %898  ;;  %v901_v56 = vpop.xlane.xlu1 %900 }
 0x100   :  { %v928_v10 = vmul.f32 0.03125, %v899_v52  ;;  %v929_v18 = vmul.f32 0.03125, %v901_v56  ;;  %v4055_v19 = vsel %vm104_vm0, %v946_v25, 0.0  ;;  %v4059_v60 = vsel %vm104_vm0, %v947_v51, 0.0 }
 0x101   :  { %v978_v26 = vmul.f32 %v4055_v19, %v4055_v19  ;;  %v979_v63 = vmul.f32 %v4059_v60, %v4059_v60 }
 0x102   :  { %v944_v27 = vsub.f32 %v3854_v28, %v928_v10  ;;  %v945_v61 = vsub.f32 %v3856_v29, %v929_v18 }
 0x103   :  { %1004 = vadd.xlane.f32.xlu1 %v981_v53  ;;  %998 = vadd.xlane.f32.xlu0 %v978_v26  ;;  %v895_v62 = vpop.xlane.xlu0 %894  ;;  %v897_v2 = vpop.xlane.xlu1 %896 }
 0x104   :  { %v926_v12 = vmul.f32 0.03125, %v895_v62  ;;  %v927_v20 = vmul.f32 0.03125, %v897_v2  ;;  %v4069_v21 = vsel %vm104_vm0, %v944_v27, 0.0  ;;  %v4073_v32 = vsel %vm104_vm0, %v945_v61, 0.0 }
 0x105   :  { %v976_v28 = vmul.f32 %v4069_v21, %v4069_v21  ;;  %v977_v35 = vmul.f32 %v4073_v32, %v4073_v32 }
 0x106   :  { %v942_v29 = vsub.f32 %v3860_v30, %v926_v12  ;;  %v943_v34 = vsub.f32 %v3862_v31, %v927_v20  ;;  %v4093_v31 = vld [vmem:[#allocation5] sm:$0xff]  }
 0x107   :  { %1000 = vadd.xlane.f32.xlu1 %v979_v63  ;;  %994 = vadd.xlane.f32.xlu0 %v976_v28 }
 0x108   :  { %v4083_v36 = vsel %vm104_vm0, %v942_v29, 0.0  ;;  %v4087_v6 = vsel %vm104_vm0, %v943_v34, 0.0  ;;  %3014 = vmatprep.mubr.bf16.mxu0 %v4093_v31 }
 0x109   :  { %v974_v14 = vmul.f32 %v4083_v36, %v4083_v36  ;;  %v975_v30 = vmul.f32 %v4087_v6, %v4087_v6 }
 0x10b   :  { %996 = vadd.xlane.f32.xlu1 %v977_v35  ;;  %990 = vadd.xlane.f32.xlu0 %v974_v14  ;;  %v4099_v14 = vld [vmem:[%s5193_s1] ss:$0 sm:$0xff] }
 0x10f   :  { %992 = vadd.xlane.f32.xlu1 %v975_v30 }
 0x158   :  { %v284_v22 = vpop.xlane.xlu0 %283 }
 0x159   :  { %v301_v23 = vmul.f32 0.03125, %v284_v22 }
 0x15b   :  { %v317_v41 = vadd.f32 1e-06, %v301_v23 }
 0x15c   :  { %v286_v42 = vpop.xlane.xlu1 %285  ;;  %v280_v43 = vpop.xlane.xlu0 %279 }
 0x15d   :  { %3264 = vrsqrt.f32 %v317_v41  ;;  %v302_v46 = vmul.f32 0.03125, %v286_v42  ;;  %v299_v8 = vmul.f32 0.03125, %v280_v43 }
 0x15f   :  { %v318_v16 = vadd.f32 1e-06, %v302_v46  ;;  %v315_v24 = vadd.f32 1e-06, %v299_v8 }
 0x160   :  { %v282_v25 = vpop.xlane.xlu1 %281  ;;  %v276_v51 = vpop.xlane.xlu0 %275 }
 0x161   :  { %3266 = vrsqrt.f32 %v318_v16  ;;  %v300_v52 = vmul.f32 0.03125, %v282_v25  ;;  %v297_v53 = vmul.f32 0.03125, %v276_v51  ;;  %v4106_v25 = vld [vmem:[%s5194_s2] ss:$0 sm:$0xff] }
 0x162   :  { %3268 = vrsqrt.f32 %v315_v24 }
 0x163   :  { %v316_v56 = vadd.f32 1e-06, %v300_v52  ;;  %v313_v10 = vadd.f32 1e-06, %v297_v53 }
 0x164   :  { %v278_v18 = vpop.xlane.xlu1 %277  ;;  %v272_v26 = vpop.xlane.xlu0 %271 }
 0x165   :  { %3270 = vrsqrt.f32 %v316_v56  ;;  %v298_v27 = vmul.f32 0.03125, %v278_v18  ;;  %v295_v61 = vmul.f32 0.03125, %v272_v26 }
 0x166   :  { %3272 = vrsqrt.f32 %v313_v10 }
 0x167   :  { %v314_v62 = vadd.f32 1e-06, %v298_v27  ;;  %v311_v63 = vadd.f32 1e-06, %v295_v61 }
 0x168   :  { %v274_v2 = vpop.xlane.xlu1 %273  ;;  %v268_v12 = vpop.xlane.xlu0 %267 }
 0x169   :  { %3274 = vrsqrt.f32 %v314_v62  ;;  %v296_v20 = vmul.f32 0.03125, %v274_v2  ;;  %v293_v28 = vmul.f32 0.03125, %v268_v12 }
 0x16a   :  { %v3265_v29 = vpop.eup %3264  ;;  %3276 = vrsqrt.f32 %v311_v63 }
 0x16b   :  { %v312_v34 = vadd.f32 1e-06, %v296_v20  ;;  %v309_v35 = vadd.f32 1e-06, %v293_v28  ;;  %v349_v30 = vmul.f32 %v3265_v29, %v3873_v44 }
 0x16c   :  { %v270_v22 = vpop.xlane.xlu1 %269  ;;  %v264_v23 = vpop.xlane.xlu0 %263 }
 0x16d   :  { %3278 = vrsqrt.f32 %v312_v34  ;;  %v294_v41 = vmul.f32 0.03125, %v270_v22  ;;  %v291_v42 = vmul.f32 0.03125, %v264_v23  ;;  %v371_v46 = vmul.f32 %v4099_v14, %v349_v30 }
 0x16e   :  { %v3267_v43 = vpop.eup %3266  ;;  %3280 = vrsqrt.f32 %v309_v35 }
 0x16f   :  { %v3269_v8 = vpop.eup %3268  ;;  %v310_v16 = vadd.f32 1e-06, %v294_v41  ;;  %v307_v24 = vadd.f32 1e-06, %v291_v42  ;;  %v350_v51 = vmul.f32 %v3267_v43, %v3887_v54  ;;  %v393_v27 = vadd.f32 %v4106_v25, %v371_v46 }
 0x170   :  { %v266_v44 = vpop.xlane.xlu1 %265  ;;  %v260_v52 = vpop.xlane.xlu0 %259  ;;  %v347_v53 = vmul.f32 %v3269_v8, %v3877_v45 }
 0x171   :  { %3282 = vrsqrt.f32 %v310_v16  ;;  %v292_v56 = vmul.f32 0.03125, %v266_v44  ;;  %v289_v10 = vmul.f32 0.03125, %v260_v52  ;;  %v372_v18 = vmul.f32 %v4099_v14, %v350_v51 }
 0x172   :  { %v3271_v26 = vpop.eup %3270  ;;  %3284 = vrsqrt.f32 %v307_v24  ;;  %v369_v45 = vmul.f32 %v4099_v14, %v347_v53 }
 0x173   :  { %v3273_v61 = vpop.eup %3272  ;;  %v308_v62 = vadd.f32 1e-06, %v292_v56  ;;  %v305_v63 = vadd.f32 1e-06, %v289_v10  ;;  %v394_v2 = vadd.f32 %v4106_v25, %v372_v18  ;;  %v348_v54 = vmul.f32 %v3271_v26, %v3891_v55 }
 0x174   :  { %v262_v12 = vpop.xlane.xlu1 %261  ;;  %v256_v20 = vpop.xlane.xlu0 %255  ;;  %v345_v28 = vmul.f32 %v3273_v61, %v3901_v0  ;;  %v391_v0 = vadd.f32 %v4106_v25, %v369_v45 }
 0x175   :  { %3286 = vrsqrt.f32 %v308_v62  ;;  %v290_v29 = vmul.f32 0.03125, %v262_v12  ;;  %v287_v34 = vmul.f32 0.03125, %v256_v20  ;;  %v402_v35 = vpack.c.bf16 %v394_v2, %v393_v27 }
 0x176   :  { %v3275_v30 = vpop.eup %3274  ;;  %3288 = vrsqrt.f32 %v305_v63  ;;  %v370_v22 = vmul.f32 %v4099_v14, %v348_v54  ;;  %v367_v23 = vmul.f32 %v4099_v14, %v345_v28 }
 0x177   :  { %v3277_v41 = vpop.eup %3276  ;;  %v306_v42 = vadd.f32 1e-06, %v290_v29  ;;  %v303_v43 = vadd.f32 1e-06, %v287_v34  ;;  %2998 = vmatprep.subr.bf16.mxu0 %v402_v35  ;;  %v346_v55 = vmul.f32 %v3275_v30, %v3905_v1 }
 0x178   :  { %v258_v46 = vpop.xlane.xlu1 %257  ;;  %v1019_v8 = vpop.xlane.xlu0 %1018  ;;  %2999 = vmatpush3.bf16.msra.mxu0 %v402_v35  ;;  %v392_v16 = vadd.f32 %v4106_v25, %v370_v22  ;;  %v343_v24 = vmul.f32 %v3277_v41, %v3915_v37  ;;  %v389_v10 = vadd.f32 %v4106_v25, %v367_v23 }
 0x179   :  { %3290 = vrsqrt.f32 %v306_v42  ;;  %v288_v51 = vmul.f32 0.03125, %v258_v46  ;;  %v1036_v44 = vmul.f32 0.03125, %v1019_v8  ;;  %v368_v52 = vmul.f32 %v4099_v14, %v346_v55 }
 0x17a   :  { %v3279_v53 = vpop.eup %3278  ;;  %3292 = vrsqrt.f32 %v303_v43  ;;  %v401_v56 = vpack.c.bf16 %v392_v16, %v391_v0  ;;  %v365_v63 = vmul.f32 %v4099_v14, %v343_v24 }
 0x17b   :  { %v3281_v1 = vpop.eup %3280  ;;  %v304_v18 = vadd.f32 1e-06, %v288_v51  ;;  %v1052_v26 = vadd.f32 1e-06, %v1036_v44  ;;  %v390_v27 = vadd.f32 %v4106_v25, %v368_v52  ;;  %v344_v61 = vmul.f32 %v3279_v53, %v3919_v38 }
 0x17c   :  { %3000 = vmatprep.subr.bf16.mxu0 %v401_v56  ;;  %v1021_v62 = vpop.xlane.xlu1 %1020  ;;  %v1015_v37 = vpop.xlane.xlu0 %1014  ;;  %v341_v2 = vmul.f32 %v3281_v1, %v3929_v47  ;;  %v387_v47 = vadd.f32 %v4106_v25, %v365_v63 }
 0x17d   :  { %3294 = vrsqrt.f32 %v304_v18  ;;  %v1037_v54 = vmul.f32 0.03125, %v1021_v62  ;;  %v1034_v12 = vmul.f32 0.03125, %v1015_v37  ;;  %3001 = vmatpush3.bf16.msra.mxu0 %v401_v56  ;;  %v400_v20 = vpack.c.bf16 %v390_v27, %v389_v10 }
 0x17e   :  { %v3283_v45 = vpop.eup %3282  ;;  %3296 = vrsqrt.f32 %v1052_v26  ;;  %v366_v28 = vmul.f32 %v4099_v14, %v344_v61  ;;  %v363_v29 = vmul.f32 %v4099_v14, %v341_v2 }
 0x17f   :  { %v3285_v34 = vpop.eup %3284  ;;  %v1053_v38 = vadd.f32 1e-06, %v1037_v54  ;;  %v1050_v35 = vadd.f32 1e-06, %v1034_v12  ;;  %3002 = vmatprep.subr.bf16.mxu0 %v400_v20  ;;  %v342_v30 = vmul.f32 %v3283_v45, %v3933_v48 }
 0x180   :  { %v1017_v22 = vpop.xlane.xlu1 %1016  ;;  %v1011_v23 = vpop.xlane.xlu0 %1010  ;;  %v388_v41 = vadd.f32 %v4106_v25, %v366_v28  ;;  %v339_v42 = vmul.f32 %v3285_v34, %v3943_v57  ;;  %v385_v16 = vadd.f32 %v4106_v25, %v363_v29 }
 0x181   :  { %3298 = vrsqrt.f32 %v1053_v38  ;;  %v1035_v43 = vmul.f32 0.03125, %v1017_v22  ;;  %v1032_v55 = vmul.f32 0.03125, %v1011_v23  ;;  %3003 = vmatpush3.bf16.msra.mxu0 %v400_v20  ;;  %v364_v46 = vmul.f32 %v4099_v14, %v342_v30 }
 0x182   :  { %v3287_v8 = vpop.eup %3286  ;;  %3300 = vrsqrt.f32 %v1050_v35  ;;  %v399_v0 = vpack.c.bf16 %v388_v41, %v387_v47  ;;  %v361_v56 = vmul.f32 %v4099_v14, %v339_v42 }
 0x183   :  { %v3289_v48 = vpop.eup %3288  ;;  %v1051_v24 = vadd.f32 1e-06, %v1035_v43  ;;  %v1048_v51 = vadd.f32 1e-06, %v1032_v55  ;;  %v386_v44 = vadd.f32 %v4106_v25, %v364_v46  ;;  %v340_v52 = vmul.f32 %v3287_v8, %v3947_v58 }
 0x184   :  { %3004 = vmatprep.subr.bf16.mxu0 %v399_v0  ;;  %v1013_v57 = vpop.xlane.xlu1 %1012  ;;  %v1007_v53 = vpop.xlane.xlu0 %1006  ;;  %v337_v10 = vmul.f32 %v3289_v48, %v3957_v3  ;;  %v383_v3 = vadd.f32 %v4106_v25, %v361_v56 }
 0x185   :  { %3302 = vrsqrt.f32 %v1051_v24  ;;  %v1033_v1 = vmul.f32 0.03125, %v1013_v57  ;;  %v1030_v18 = vmul.f32 0.03125, %v1007_v53  ;;  %3005 = vmatpush3.bf16.msra.mxu0 %v399_v0  ;;  %v398_v26 = vpack.c.bf16 %v386_v44, %v385_v16 }
 0x186   :  { %v3291_v27 = vpop.eup %3290  ;;  %3304 = vrsqrt.f32 %v1048_v51  ;;  %v362_v61 = vmul.f32 %v4099_v14, %v340_v52  ;;  %v359_v62 = vmul.f32 %v4099_v14, %v337_v10 }
 0x187   :  { %v3293_v37 = vpop.eup %3292  ;;  %v1049_v58 = vadd.f32 1e-06, %v1033_v1  ;;  %v1046_v63 = vadd.f32 1e-06, %v1030_v18  ;;  %3006 = vmatprep.subr.bf16.mxu0 %v398_v26  ;;  %v338_v2 = vmul.f32 %v3291_v27, %v3961_v4 }
 0x188   :  { %v1009_v54 = vpop.xlane.xlu1 %1008  ;;  %v1003_v12 = vpop.xlane.xlu0 %1002  ;;  %v384_v20 = vadd.f32 %v4106_v25, %v362_v61  ;;  %v335_v45 = vmul.f32 %v3293_v37, %v3971_v7  ;;  %v381_v30 = vadd.f32 %v4106_v25, %v359_v62 }
 0x189   :  { %3306 = vrsqrt.f32 %v1049_v58  ;;  %v1031_v28 = vmul.f32 0.03125, %v1009_v54  ;;  %v1028_v29 = vmul.f32 0.03125, %v1003_v12  ;;  %3007 = vmatpush3.bf16.msra.mxu0 %v398_v26  ;;  %v360_v34 = vmul.f32 %v4099_v14, %v338_v2  ;;  %v4162_v12 = vld [vmem:[#allocation5 + $0x8] sm:$0xff]  }
 0x18a   :  { %v3295_v38 = vpop.eup %3294  ;;  %3308 = vrsqrt.f32 %v1046_v63  ;;  %v397_v35 = vpack.c.bf16 %v384_v20, %v383_v3  ;;  %v357_v43 = vmul.f32 %v4099_v14, %v335_v45 }
 0x18b   :  { %v3297_v4 = vpop.eup %3296  ;;  %v1047_v22 = vadd.f32 1e-06, %v1031_v28  ;;  %v1044_v23 = vadd.f32 1e-06, %v1028_v29  ;;  %v382_v47 = vadd.f32 %v4106_v25, %v360_v34  ;;  %v336_v41 = vmul.f32 %v3295_v38, %v3975_v39  ;;  %v4166_v34 = vld [vmem:[#allocation5 + $0x10] sm:$0xff]  }
 0x18c   :  { %3008 = vmatprep.subr.bf16.mxu0 %v397_v35  ;;  %v1005_v7 = vpop.xlane.xlu1 %1004  ;;  %v999_v42 = vpop.xlane.xlu0 %998  ;;  %v1084_v55 = vmul.f32 %v3297_v4, %v3985_v9  ;;  %v379_v9 = vadd.f32 %v4106_v25, %v357_v43 }
 0x18d   :  { %3310 = vrsqrt.f32 %v1047_v22  ;;  %v1029_v46 = vmul.f32 0.03125, %v1005_v7  ;;  %v1026_v8 = vmul.f32 0.03125, %v999_v42  ;;  %3009 = vmatpush3.bf16.msra.mxu0 %v397_v35  ;;  %v396_v0 = vpack.c.bf16 %v382_v47, %v381_v30 }
 0x18e   :  { %v3299_v16 = vpop.eup %3298  ;;  %3312 = vrsqrt.f32 %v1044_v23  ;;  %v358_v48 = vmul.f32 %v4099_v14, %v336_v41  ;;  %v1100_v24 = vmul.f32 %v4099_v14, %v1084_v55 }
 0x18f   :  { %v3301_v51 = vpop.eup %3300  ;;  %v1045_v39 = vadd.f32 1e-06, %v1029_v46  ;;  %v1042_v44 = vadd.f32 1e-06, %v1026_v8  ;;  %3010 = vmatprep.subr.bf16.mxu0 %v396_v0  ;;  %v1085_v52 = vmul.f32 %v3299_v16, %v3989_v49 }
 0x190   :  { %v1001_v57 = vpop.xlane.xlu1 %1000  ;;  %v995_v53 = vpop.xlane.xlu0 %994  ;;  %v380_v56 = vadd.f32 %v4106_v25, %v358_v48  ;;  %v1082_v10 = vmul.f32 %v3301_v51, %v3999_v11  ;;  %v1116_v62 = vadd.f32 %v4106_v25, %v1100_v24  ;;  %v4181_v24 = vld [vmem:[#allocation5 + $0x18] sm:$0xff]  }
 0x191   :  { %3314 = vrsqrt.f32 %v1045_v39  ;;  %v1027_v1 = vmul.f32 0.03125, %v1001_v57  ;;  %v1024_v18 = vmul.f32 0.03125, %v995_v53  ;;  %3011 = vmatpush3.bf16.msra.mxu0 %v396_v0  ;;  %v1101_v26 = vmul.f32 %v4099_v14, %v1085_v52  ;;  %v3236_v52 = vld [vmem:[#allocation5 + $0x20] sm:$0xff]  }
 0x192   :  { %v3303_v27 = vpop.eup %3302  ;;  %3316 = vrsqrt.f32 %v1042_v44  ;;  %v395_v61 = vpack.c.bf16 %v380_v56, %v379_v9  ;;  %v1098_v3 = vmul.f32 %v4099_v14, %v1082_v10 }
 0x193   :  { %v3305_v49 = vpop.eup %3304  ;;  %v1043_v37 = vadd.f32 1e-06, %v1027_v1  ;;  %v1040_v58 = vadd.f32 1e-06, %v1024_v18  ;;  %v1117_v63 = vadd.f32 %v4106_v25, %v1101_v26  ;;  %v1083_v2 = vmul.f32 %v3303_v27, %v4003_v59 }
 0x194   :  { %3012 = vmatprep.subr.bf16.mxu0 %v395_v61  ;;  %v997_v11 = vpop.xlane.xlu1 %996  ;;  %v991_v54 = vpop.xlane.xlu0 %990  ;;  %v1080_v20 = vmul.f32 %v3305_v49, %v4013_v13  ;;  %v1114_v47 = vadd.f32 %v4106_v25, %v1098_v3 }
 0x195   :  { %3318 = vrsqrt.f32 %v1043_v37  ;;  %v1025_v45 = vmul.f32 0.03125, %v997_v11  ;;  %v1022_v28 = vmul.f32 0.03125, %v991_v54  ;;  %3013 = vmatpush3.bf16.msra.mxu0 %v395_v61  ;;  %v1125_v29 = vpack.c.bf16 %v1117_v63, %v1116_v62  ;;  %v3237_v37 = vld [vmem:[#allocation5 + $0x28] sm:$0xff]  }
 0x196   :  { %v3307_v38 = vpop.eup %3306  ;;  %3320 = vrsqrt.f32 %v1040_v58  ;;  %v1099_v59 = vmul.f32 %v4099_v14, %v1083_v2  ;;  %v1096_v35 = vmul.f32 %v4099_v14, %v1080_v20  ;;  %v3238_v2 = vld [vmem:[#allocation5 + $0x30] sm:$0xff]  }
 0x197   :  { %v3309_v30 = vpop.eup %3308  ;;  %v1041_v4 = vadd.f32 1e-06, %v1025_v45  ;;  %v1038_v22 = vadd.f32 1e-06, %v1022_v28  ;;  %3062 = vmatprep.subr.bf16.mxu0 %v1125_v29  ;;  %v1081_v23 = vmul.f32 %v3307_v38, %v4017_v5 }
 0x198   :  { %3015 = vmatmul.mubr.bf16.vlgmr.msra.gmra.mxu0 %v4162_v12  ;;  %v993_v13 = vpop.xlane.xlu1 %992  ;;  %v1115_v41 = vadd.f32 %v4106_v25, %v1099_v59  ;;  %v1078_v7 = vmul.f32 %v3309_v30, %v4027_v15  ;;  %v1112_v5 = vadd.f32 %v4106_v25, %v1096_v35 }
 0x199   :  { %3322 = vrsqrt.f32 %v1041_v4  ;;  %v1023_v42 = vmul.f32 0.03125, %v993_v13  ;;  %3063 = vmatpush3.bf16.msra.mxu0 %v1125_v29  ;;  %3018 = vmatprep.mubr.bf16.mxu0 %v4166_v34  ;;  %v1097_v43 = vmul.f32 %v4099_v14, %v1081_v23  ;;  %v3239_v4 = vld [vmem:[#allocation5 + $0x38] sm:$0xff]  }
 0x19a   :  { %v3311_v55 = vpop.eup %3310  ;;  %3324 = vrsqrt.f32 %v1038_v22  ;;  %v1124_v46 = vpack.c.bf16 %v1115_v41, %v1114_v47  ;;  %v1094_v15 = vmul.f32 %v4099_v14, %v1078_v7 }
 0x19b   :  { %v3313_v8 = vpop.eup %3312  ;;  %v1039_v0 = vadd.f32 1e-06, %v1023_v42  ;;  %v1113_v16 = vadd.f32 %v4106_v25, %v1097_v43  ;;  %v1079_v48 = vmul.f32 %v3311_v55, %v4031_v40 }
 0x19c   :  { %3064 = vmatprep.subr.bf16.mxu0 %v1124_v46  ;;  %v1076_v51 = vmul.f32 %v3313_v8, %v4041_v17  ;;  %v1110_v9 = vadd.f32 %v4106_v25, %v1094_v15 }
 0x19d   :  { %3326 = vrsqrt.f32 %v1039_v0  ;;  %3065 = vmatpush3.bf16.msra.mxu0 %v1124_v46  ;;  %v1123_v39 = vpack.c.bf16 %v1113_v16, %v1112_v5  ;;  %v1095_v44 = vmul.f32 %v4099_v14, %v1079_v48 }
 0x19e   :  { %v3315_v57 = vpop.eup %3314  ;;  %v1092_v10 = vmul.f32 %v4099_v14, %v1076_v51 }
 0x19f   :  { %v3317_v53 = vpop.eup %3316  ;;  %3066 = vmatprep.subr.bf16.mxu0 %v1123_v39  ;;  %v1111_v40 = vadd.f32 %v4106_v25, %v1095_v44  ;;  %v1077_v56 = vmul.f32 %v3315_v57, %v4045_v50 }
 0x1a0   :  { %3019 = vmatmul.mubr.bf16.gmra.mxu0 %v4181_v24  ;;  %v1074_v17 = vmul.f32 %v3317_v53, %v4055_v19  ;;  %v1108_v61 = vadd.f32 %v4106_v25, %v1092_v10 }
 0x1a1   :  { %3067 = vmatpush3.bf16.msra.mxu0 %v1123_v39  ;;  %v1122_v1 = vpack.c.bf16 %v1111_v40, %v1110_v9  ;;  %3022 = vmatprep.mubr.bf16.mxu0 %v3236_v52  ;;  %v1093_v18 = vmul.f32 %v4099_v14, %v1077_v56 }
 0x1a2   :  { %v3319_v26 = vpop.eup %3318  ;;  %v1090_v49 = vmul.f32 %v4099_v14, %v1074_v17 }
 0x1a3   :  { %v3321_v27 = vpop.eup %3320  ;;  %3068 = vmatprep.subr.bf16.mxu0 %v1122_v1  ;;  %v1109_v62 = vadd.f32 %v4106_v25, %v1093_v18  ;;  %v1075_v50 = vmul.f32 %v3319_v26, %v4059_v60 }
 0x1a4   :  { %v1072_v58 = vmul.f32 %v3321_v27, %v4069_v21  ;;  %v1106_v3 = vadd.f32 %v4106_v25, %v1090_v49 }
 0x1a5   :  { %3069 = vmatpush3.bf16.msra.mxu0 %v1122_v1  ;;  %v1121_v19 = vpack.c.bf16 %v1109_v62, %v1108_v61  ;;  %v1091_v63 = vmul.f32 %v4099_v14, %v1075_v50 }
 0x1a6   :  { %v3323_v11 = vpop.eup %3322  ;;  %v1088_v60 = vmul.f32 %v4099_v14, %v1072_v58 }
 0x1a7   :  { %v3325_v54 = vpop.eup %3324  ;;  %3070 = vmatprep.subr.bf16.mxu0 %v1121_v19  ;;  %v1107_v20 = vadd.f32 %v4106_v25, %v1091_v63  ;;  %v1073_v45 = vmul.f32 %v3323_v11, %v4073_v32 }
 0x1a8   :  { %3023 = vmatmul.mubr.bf16.gmra.mxu0 %v3237_v37  ;;  %v1070_v28 = vmul.f32 %v3325_v54, %v4083_v36  ;;  %v1104_v59 = vadd.f32 %v4106_v25, %v1088_v60 }
 0x1a9   :  { %3071 = vmatpush3.bf16.msra.mxu0 %v1121_v19  ;;  %v1120_v21 = vpack.c.bf16 %v1107_v20, %v1106_v3  ;;  %3026 = vmatprep.mubr.bf16.mxu0 %v3238_v2  ;;  %v1089_v29 = vmul.f32 %v4099_v14, %v1073_v45 }
 0x1aa   :  { %v3327_v38 = vpop.eup %3326  ;;  %v1086_v32 = vmul.f32 %v4099_v14, %v1070_v28 }
 0x1ab   :  { %3072 = vmatprep.subr.bf16.mxu0 %v1120_v21  ;;  %v1105_v35 = vadd.f32 %v4106_v25, %v1089_v29  ;;  %v1071_v30 = vmul.f32 %v3327_v38, %v4087_v6  ;;  %v4215_v6 = vld [vmem:[#allocation7] sm:$0xff]  }
 0x1ac   :  { %v1102_v23 = vadd.f32 %v4106_v25, %v1086_v32  ;;  %5232 = vst [vmem:[#allocation17_spill] sm:$0xff] %v4215_v6  ;;  %3046 = vmatprep.mubr.bf16.mxu1 %v4215_v6 }
 0x1ad   :  { %3073 = vmatpush3.bf16.msra.mxu0 %v1120_v21  ;;  %v1119_v22 = vpack.c.bf16 %v1105_v35, %v1104_v59  ;;  %v1087_v36 = vmul.f32 %v4099_v14, %v1071_v30 }
 0x1af   :  { %3074 = vmatprep.subr.bf16.mxu0 %v1119_v22  ;;  %v1103_v13 = vadd.f32 %v4106_v25, %v1087_v36 }
 0x1b0   :  { %3027 = vmatmul.mubr.bf16.gmra.mxu0 %v3239_v4 }
 0x1b1   :  { %3075 = vmatpush3.bf16.msra.mxu0 %v1119_v22  ;;  %v1118_v47 = vpack.c.bf16 %v1103_v13, %v1102_v23  ;;  %3078 = vmatprep.mubr.bf16.mxu0 %v4093_v31 }
 0x1b3   :  { %3076 = vmatprep.subr.bf16.mxu0 %v1118_v47 }
 0x1b5   :  { %3077 = vmatpush3.bf16.msra.mxu0 %v1118_v47 }
 0x1b8   :  { %3079 = vmatmul.mubr.bf16.vlgmr.msra.gmra.mxu0 %v4162_v12 }
 0x1b9   :  { %3082 = vmatprep.mubr.bf16.mxu0 %v4166_v34 }
 0x1c0   :  { %3083 = vmatmul.mubr.bf16.gmra.mxu0 %v4181_v24 }
 0x1c1   :  { %3086 = vmatprep.mubr.bf16.mxu0 %v3236_v52 }
 0x1c8   :  { %3087 = vmatmul.mubr.bf16.gmra.mxu0 %v3237_v37 }
 0x1c9   :  { %3090 = vmatprep.mubr.bf16.mxu0 %v3238_v2 }
 0x1d0   :  { %3091 = vmatmul.mubr.bf16.gmra.mxu0 %v3239_v4 }
 0x258   :  { %v4218_v14 = vpop.f32.mrf.mxu0 }
 0x259   :  { %v550_v34 = vmul.f32 %v4218_v14, %v4218_v14 }
 0x25a   :  { %v4220_v25 = vpop.f32.mrf.mxu0 }
 0x25b   :  { %v548_v42 = vmul.f32 %v4220_v25, %v4220_v25  ;;  %v566_v46 = vmul.f32 %v4218_v14, %v550_v34 }
 0x25c   :  { %v4222_v31 = vpop.f32.mrf.mxu0 }
 0x25d   :  { %v551_v55 = vmul.f32 %v4222_v31, %v4222_v31  ;;  %v564_v8 = vmul.f32 %v548_v42, %v4220_v25  ;;  %v582_v24 = vmul.f32 0.044715, %v566_v46 }
 0x25e   :  { %v4224_v41 = vpop.f32.mrf.mxu0 }
 0x25f   :  { %v549_v0 = vmul.f32 %v4224_v41, %v4224_v41  ;;  %v567_v15 = vmul.f32 %v4222_v31, %v551_v55  ;;  %v580_v44 = vmul.f32 0.044715, %v564_v8  ;;  %v598_v56 = vadd.f32 %v4218_v14, %v582_v24 }
 0x260   :  { %v4226_v12 = vpop.f32.mrf.mxu0 }
 0x261   :  { %5233 = vst [vmem:[#allocation18_spill] sm:$0xff] %v4226_v12  ;;  %v565_v52 = vmul.f32 %v549_v0, %v4224_v41  ;;  %v583_v40 = vmul.f32 0.044715, %v567_v15  ;;  %v554_v10 = vmul.f32 %v4226_v12, %v4226_v12  ;;  %v596_v26 = vadd.f32 %v580_v44, %v4220_v25 }
 0x262   :  { %v4230_v7 = vpop.f32.mrf.mxu0  ;;  %v614_v63 = vmul.f32 0.7978846, %v598_v56 }
 0x263   :  { %5234 = vst [vmem:[#allocation19_spill] sm:$0xff] %v4230_v7  ;;  %v581_v27 = vmul.f32 0.044715, %v565_v52  ;;  %v599_v19 = vadd.f32 %v4222_v31, %v583_v40  ;;  %v570_v2 = vmul.f32 %v4226_v12, %v554_v10  ;;  %v612_v20 = vmul.f32 0.7978846, %v596_v26 }
 0x264   :  { %v4234_v43 = vpop.f32.mrf.mxu0  ;;  %3328 = vtanh.f32 %v614_v63 }
 0x265   :  { %v555_v16 = vmul.f32 %v4234_v43, %v4234_v43  ;;  %v597_v45 = vadd.f32 %v581_v27, %v4224_v41  ;;  %v615_v35 = vmul.f32 0.7978846, %v599_v19  ;;  %v586_v4 = vmul.f32 0.044715, %v570_v2 }
 0x266   :  { %v4239_v5 = vpop.f32.mrf.mxu0  ;;  %3330 = vtanh.f32 %v612_v20 }
 0x267   :  { %5235 = vst [vmem:[#allocation20_spill] sm:$0xff] %v4239_v5  ;;  %v571_v53 = vmul.f32 %v4234_v43, %v555_v16  ;;  %v553_v50 = vmul.f32 %v4239_v5, %v4239_v5  ;;  %v613_v13 = vmul.f32 0.7978846, %v597_v45  ;;  %3332 = vtanh.f32 %v615_v35 }
 0x268   :  { %v4246_v48 = vpop.f32.mrf.mxu0 }
 0x269   :  { %v558_v51 = vmul.f32 %v4246_v48, %v4246_v48  ;;  %v587_v62 = vmul.f32 0.044715, %v571_v53  ;;  %v569_v21 = vmul.f32 %v553_v50, %v4239_v5  ;;  %3334 = vtanh.f32 %v613_v13 }
 0x26a   :  { %v4251_v39 = vpop.f32.mrf.mxu0 }
 0x26b   :  { %v556_v57 = vmul.f32 %v4251_v39, %v4251_v39  ;;  %v574_v17 = vmul.f32 %v4246_v48, %v558_v51  ;;  %v603_v28 = vadd.f32 %v4234_v43, %v587_v62  ;;  %v585_v55 = vmul.f32 0.044715, %v569_v21 }
 0x26c   :  { %v4257_v9 = vpop.f32.mrf.mxu0  ;;  %v602_v51 = vadd.f32 %v4226_v12, %v586_v4 }
 0x26d   :  { %v559_v1 = vmul.f32 %v4257_v9, %v4257_v9  ;;  %v572_v61 = vmul.f32 %v556_v57, %v4251_v39  ;;  %v590_v11 = vmul.f32 0.044715, %v574_v17  ;;  %v619_v42 = vmul.f32 0.7978846, %v603_v28 }
 0x26e   :  { %v4265_v18 = vpop.f32.mrf.mxu0  ;;  %v552_v17 = vmul.f32 %v4230_v7, %v4230_v7 }
 0x26f   :  { %v575_v49 = vmul.f32 %v4257_v9, %v559_v1  ;;  %v557_v37 = vmul.f32 %v4265_v18, %v4265_v18  ;;  %v588_v60 = vmul.f32 0.044715, %v572_v61  ;;  %v606_v22 = vadd.f32 %v4246_v48, %v590_v11 }
 0x270   :  { %v4274_v58 = vpop.f32.mrf.mxu0  ;;  %3336 = vtanh.f32 %v619_v42  ;;  %v601_v1 = vadd.f32 %v585_v55, %v4239_v5  ;;  %v618_v11 = vmul.f32 0.7978846, %v602_v51  ;;  %v568_v21 = vmul.f32 %v552_v17, %v4230_v7 }
 0x271   :  { %v573_v54 = vmul.f32 %v557_v37, %v4265_v18  ;;  %v591_v29 = vmul.f32 0.044715, %v575_v49  ;;  %v562_v32 = vmul.f32 %v4274_v58, %v4274_v58  ;;  %v604_v47 = vadd.f32 %v588_v60, %v4251_v39 }
 0x272   :  { %v4279_v3 = vpop.f32.mrf.mxu0  ;;  %v622_v44 = vmul.f32 0.7978846, %v606_v22  ;;  %v3329_v22 = vpop.eup %3328 }
 0x273   :  { %v560_v38 = vmul.f32 %v4279_v3, %v4279_v3  ;;  %v589_v30 = vmul.f32 0.044715, %v573_v54  ;;  %v607_v46 = vadd.f32 %v4257_v9, %v591_v29  ;;  %v578_v15 = vmul.f32 %v4274_v58, %v562_v32 }
 0x274   :  { %v4286_v59 = vpop.f32.mrf.mxu0  ;;  %v620_v40 = vmul.f32 0.7978846, %v604_v47  ;;  %3338 = vtanh.f32 %v622_v44  ;;  %v617_v29 = vmul.f32 0.7978846, %v601_v1  ;;  %v3331_v47 = vpop.eup %3330 }
 0x275   :  { %v576_v36 = vmul.f32 %v560_v38, %v4279_v3  ;;  %v563_v34 = vmul.f32 %v4286_v59, %v4286_v59  ;;  %v605_v16 = vadd.f32 %v589_v30, %v4265_v18  ;;  %v623_v26 = vmul.f32 0.7978846, %v607_v46 }
 0x276   :  { %v4292_v23 = vpop.f32.mrf.mxu0  ;;  %v594_v62 = vmul.f32 0.044715, %v578_v15  ;;  %3340 = vtanh.f32 %v620_v40  ;;  %v584_v46 = vmul.f32 0.044715, %v568_v21  ;;  %v3333_v15 = vpop.eup %3332 }
 0x277   :  { %v592_v8 = vmul.f32 0.044715, %v576_v36  ;;  %v561_v24 = vmul.f32 %v4292_v23, %v4292_v23  ;;  %v579_v57 = vmul.f32 %v4286_v59, %v563_v34  ;;  %v621_v61 = vmul.f32 0.7978846, %v605_v16  ;;  %v3335_v40 = vpop.eup %3334 }
 0x278   :  { %v4298_v0 = vpop.f32.mrf.mxu0  ;;  %3342 = vtanh.f32 %v623_v26  ;;  %v610_v38 = vadd.f32 %v4274_v58, %v594_v62  ;;  %v646_v26 = vadd.f32 1.0, %v3329_v22 }
 0x279   :  { %v608_v52 = vadd.f32 %v592_v8, %v4279_v3  ;;  %v577_v56 = vmul.f32 %v561_v24, %v4292_v23  ;;  %v1225_v10 = vmul.f32 %v4298_v0, %v4298_v0  ;;  %v595_v19 = vmul.f32 0.044715, %v579_v57 }
 0x27a   :  { %v4307_v53 = vpop.f32.mrf.mxu0  ;;  %3344 = vtanh.f32 %v621_v61  ;;  %v626_v8 = vmul.f32 0.7978846, %v610_v38  ;;  %v600_v61 = vadd.f32 %v584_v46, %v4230_v7  ;;  %v662_v21 = vmul.f32 0.5, %v646_v26 }
 0x27b   :  { %v593_v50 = vmul.f32 0.044715, %v577_v56  ;;  %v1241_v49 = vmul.f32 %v4298_v0, %v1225_v10  ;;  %v624_v37 = vmul.f32 0.7978846, %v608_v52  ;;  %v1223_v63 = vmul.f32 %v4307_v53, %v4307_v53 }
 0x27c   :  { %v4315_v27 = vpop.f32.mrf.mxu0  ;;  %v611_v35 = vadd.f32 %v4286_v59, %v595_v19 }
 0x27d   :  { %v609_v54 = vadd.f32 %v593_v50, %v4292_v23  ;;  %v1257_v20 = vmul.f32 0.044715, %v1241_v49  ;;  %v1239_v45 = vmul.f32 %v1223_v63, %v4307_v53  ;;  %v1226_v60 = vmul.f32 %v4315_v27, %v4315_v27  ;;  %v3337_v1 = vpop.eup %3336 }
 0x27e   :  { %v4320_v2 = vpop.f32.mrf.mxu0  ;;  %3346 = vtanh.f32 %v624_v37  ;;  %v627_v24 = vmul.f32 0.7978846, %v611_v35  ;;  %v644_v50 = vadd.f32 1.0, %v3331_v47  ;;  %v647_v63 = vadd.f32 1.0, %v3333_v15 }
 0x27f   :  { %v1255_v30 = vmul.f32 0.044715, %v1239_v45  ;;  %v1242_v32 = vmul.f32 %v4315_v27, %v1226_v60  ;;  %v625_v36 = vmul.f32 0.7978846, %v609_v54  ;;  %v1224_v13 = vmul.f32 %v4320_v2, %v4320_v2 }
 0x280   :  { %v4326_v28 = vpop.f32.mrf.mxu0  ;;  %3348 = vtanh.f32 %v618_v11  ;;  %v1273_v34 = vadd.f32 %v4298_v0, %v1257_v20  ;;  %v645_v20 = vadd.f32 1.0, %v3335_v40  ;;  %v660_v35 = vmul.f32 0.5, %v644_v50 }
 0x281   :  { %5236 = vst [vmem:[#allocation21_spill] sm:$0xff] %v4326_v28  ;;  %v1258_v42 = vmul.f32 0.044715, %v1242_v32  ;;  %3350 = vtanh.f32 %v617_v29  ;;  %v1240_v16 = vmul.f32 %v1224_v13, %v4320_v2  ;;  %v1271_v51 = vadd.f32 %v1255_v30, %v4307_v53  ;;  %v3339_v19 = vpop.eup %3338 }
 0x282   :  { %v4332_v4 = vpop.f32.mrf.mxu0  ;;  %3352 = vtanh.f32 %v625_v36  ;;  %v1289_v56 = vmul.f32 0.7978846, %v1273_v34  ;;  %v616_v29 = vmul.f32 0.7978846, %v600_v61  ;;  %v654_v30 = vadd.f32 1.0, %v3339_v19 }
 0x283   :  { %v1274_v44 = vadd.f32 %v4315_v27, %v1258_v42  ;;  %v1256_v57 = vmul.f32 0.044715, %v1240_v16  ;;  %3354 = vtanh.f32 %v626_v8  ;;  %v1287_v49 = vmul.f32 0.7978846, %v1271_v51  ;;  %v3341_v54 = vpop.eup %3340 }
 0x284   :  { %v4337_v55 = vpop.f32.mrf.mxu0  ;;  %3356 = vtanh.f32 %v627_v24  ;;  %v663_v36 = vmul.f32 0.5, %v647_v63  ;;  %v661_v13 = vmul.f32 0.5, %v645_v20  ;;  %v651_v47 = vadd.f32 1.0, %v3337_v1 }
 0x285   :  { %v1290_v10 = vmul.f32 0.7978846, %v1274_v44  ;;  %v1272_v62 = vadd.f32 %v1256_v57, %v4320_v2  ;;  %v3343_v60 = vpop.eup %3342  ;;  %v4357_v8 = vmul.f32 %v4218_v14, %v662_v21  ;;  %v4360_v24 = vmul.f32 %v660_v35, %v4220_v25 }
 0x286   :  { %v4342_v52 = vpop.f32.mrf.mxu0  ;;  %v655_v34 = vadd.f32 1.0, %v3343_v60  ;;  %v670_v51 = vmul.f32 0.5, %v654_v30  ;;  %v652_v44 = vadd.f32 1.0, %v3341_v54  ;;  %v4374_v25 = vmul.f32 %v661_v13, %v4224_v41 }
 0x287   :  { %3358 = vtanh.f32 %v1290_v10  ;;  %v1288_v11 = vmul.f32 0.7978846, %v1272_v62  ;;  %v3345_v38 = vpop.eup %3344  ;;  %v1229_v10 = vmul.f32 %v4326_v28, %v4326_v28  ;;  %v4378_v62 = vmul.f32 0.5, %v651_v47 }
 0x288   :  { %v4344_v17 = vpop.f32.mrf.mxu0  ;;  %3360 = vtanh.f32 %v1289_v56  ;;  %v653_v16 = vadd.f32 1.0, %v3345_v38  ;;  %v4365_v56 = vmul.f32 %v4222_v31, %v663_v36  ;;  %v671_v50 = vmul.f32 0.5, %v655_v34 }
 0x289   :  { %3362 = vtanh.f32 %v1288_v11  ;;  %v1230_v19 = vmul.f32 %v4337_v55, %v4337_v55  ;;  %v4386_v54 = vmul.f32 %v4246_v48, %v670_v51  ;;  %v4388_v20 = vmul.f32 0.5, %v652_v44 }
 0x28a   :  { %v4348_v37 = vpop.f32.mrf.mxu0  ;;  %3364 = vtanh.f32 %v1287_v49  ;;  %v669_v49 = vmul.f32 0.5, %v653_v16  ;;  %v1233_v60 = vmul.f32 %v4344_v17, %v4344_v17  ;;  %v4395_v35 = vmul.f32 %v4326_v28, %v1229_v10 }
 0x28b   :  { %v3347_v22 = vpop.eup %3346  ;;  %3366 = vtanh.f32 %v616_v29  ;;  %v4399_v30 = vmul.f32 %v4332_v4, %v4332_v4  ;;  %v4403_v36 = vmul.f32 %v4257_v9, %v671_v50  ;;  %v1228_v13 = vmul.f32 %v4342_v52, %v4342_v52 }
 0x28c   :  { %v4350_v45 = vpop.f32.mrf.mxu0  ;;  %v656_v57 = vadd.f32 1.0, %v3347_v22  ;;  %v4410_v16 = vmul.f32 %v669_v49, %v4265_v18  ;;  %v1249_v10 = vmul.f32 %v4344_v17, %v1233_v60 }
 0x28d   :  { %v3349_v46 = vpop.eup %3348  ;;  %v1234_v14 = vmul.f32 %v4350_v45, %v4350_v45 }
 0x28e   :  { %v4352_v32 = vpop.f32.mrf.mxu0  ;;  %v3351_v15 = vpop.eup %3350  ;;  %v4376_v61 = vadd.f32 1.0, %v3349_v46  ;;  %v672_v41 = vmul.f32 0.5, %v656_v57  ;;  %5238 = vst [vmem:[#allocation23_spill] sm:$0xff] %v4410_v16 }
 0x28f   :  { %v3353_v26 = vpop.eup %3352  ;;  %v4380_v31 = vadd.f32 1.0, %v3351_v15  ;;  %v1250_v48 = vmul.f32 %v4350_v45, %v1234_v14  ;;  %v1246_v15 = vmul.f32 %v4337_v55, %v1230_v19  ;;  %v1232_v51 = vmul.f32 %v4352_v32, %v4352_v32 }
 0x290   :  { %v4354_v42 = vpop.f32.mrf.mxu0  ;;  %v3355_v11 = vpop.eup %3354  ;;  %v657_v38 = vadd.f32 1.0, %v3353_v26  ;;  %v688_v57 = vmul.f32 %v672_v41, %v4279_v3  ;;  %v1231_v14 = vmul.f32 %v4348_v37, %v4348_v37 }
 0x291   :  { %5237 = vst [vmem:[#allocation22_spill] sm:$0xff] %v4354_v42  ;;  %v1237_v1 = vmul.f32 %v4354_v42, %v4354_v42  ;;  %v3357_v29 = vpop.eup %3356  ;;  %v1266_v49 = vmul.f32 0.044715, %v1250_v48  ;;  %v658_v7 = vadd.f32 1.0, %v3355_v11  ;;  %v1248_v5 = vmul.f32 %v1232_v51, %v4352_v32 }
 0x292   :  { %v4362_v40 = vpop.f32.mrf.mxu0  ;;  %v673_v26 = vmul.f32 0.5, %v657_v38  ;;  %v659_v3 = vadd.f32 1.0, %v3357_v29 }
 0x293   :  { %v1253_v63 = vmul.f32 %v4354_v42, %v1237_v1  ;;  %v1235_v34 = vmul.f32 %v4362_v40, %v4362_v40  ;;  %v674_v16 = vmul.f32 0.5, %v658_v7 }
 0x294   :  { %v4392_v21 = vpop.f32.mrf.mxu0  ;;  %v3359_v22 = vpop.eup %3358  ;;  %v675_v38 = vmul.f32 0.5, %v659_v3 }
 0x295   :  { %v1269_v47 = vmul.f32 0.044715, %v1253_v63  ;;  %v3361_v46 = vpop.eup %3360  ;;  %v1238_v9 = vmul.f32 %v4392_v21, %v4392_v21  ;;  %v1251_v1 = vmul.f32 %v1235_v34, %v4362_v40  ;;  %v1322_v50 = vadd.f32 1.0, %v3359_v22 }
 0x296   :  { %v3363_v44 = vpop.eup %3362  ;;  %v4423_v63 = vpop.f32.mrf.mxu0  ;;  %v1321_v41 = vadd.f32 1.0, %v3361_v46  ;;  %v689_v22 = vmul.f32 %v673_v26, %v4292_v23  ;;  %v690_v46 = vmul.f32 %v4274_v58, %v674_v16  ;;  %v691_v51 = vmul.f32 %v4286_v59, %v675_v38 }
 0x297   :  { %v3365_v18 = vpop.eup %3364  ;;  %v1254_v19 = vmul.f32 %v4392_v21, %v1238_v9  ;;  %v1285_v33 = vadd.f32 %v4354_v42, %v1269_v47  ;;  %v1267_v6 = vmul.f32 0.044715, %v1251_v1  ;;  %v1320_v60 = vadd.f32 1.0, %v3363_v44 }
 0x298   :  { %v3367_v12 = vpop.eup %3366  ;;  %v1319_v34 = vadd.f32 1.0, %v3365_v18  ;;  %v1236_v48 = vmul.f32 %v4423_v63, %v4423_v63  ;;  %v1338_v9 = vmul.f32 0.5, %v1322_v50  ;;  %v1337_v1 = vmul.f32 0.5, %v1321_v41 }
 0x299   :  { %v1270_v28 = vmul.f32 0.044715, %v1254_v19  ;;  %v1283_v47 = vadd.f32 %v1267_v6, %v4362_v40  ;;  %v1301_v29 = vmul.f32 0.7978846, %v1285_v33  ;;  %v1336_v7 = vmul.f32 0.5, %v1320_v60 }
 0x29a   :  { %v1252_v44 = vmul.f32 %v1236_v48, %v4423_v63  ;;  %v1265_v18 = vmul.f32 0.044715, %v1249_v10  ;;  %v1335_v3 = vmul.f32 0.5, %v1319_v34  ;;  %v1247_v42 = vmul.f32 %v1231_v14, %v4348_v37 }
 0x29b   :  { %v1286_v11 = vadd.f32 %v4392_v21, %v1270_v28  ;;  %v699_v23 = vpack.c.bf16 %v691_v51, %v690_v46  ;;  %v1354_v6 = vmul.f32 %v4315_v27, %v1338_v9  ;;  %v1299_v50 = vmul.f32 0.7978846, %v1283_v47 }
 0x29c   :  { %v1268_v26 = vmul.f32 0.044715, %v1252_v44  ;;  %v698_v33 = vpack.c.bf16 %v689_v22, %v688_v57  ;;  %v1282_v58 = vadd.f32 %v4350_v45, %v1266_v49  ;;  %v1264_v28 = vmul.f32 0.044715, %v1248_v5 }
 0x29d   :  { %v1302_v19 = vmul.f32 0.7978846, %v1286_v11  ;;  %3030 = vmatprep.subr.bf16.mxu1 %v699_v23  ;;  %v1353_v16 = vmul.f32 %v4298_v0, %v1337_v1  ;;  %v1352_v10 = vmul.f32 %v1336_v7, %v4320_v2  ;;  %v1262_v41 = vmul.f32 0.044715, %v1246_v15 }
 0x29e   :  { %v1284_v59 = vadd.f32 %v1268_v26, %v4423_v63  ;;  %v1244_v14 = vmul.f32 %v1228_v13, %v4342_v52  ;;  %3031 = vmatpush3.bf16.msra.mxu1 %v699_v23  ;;  %v1281_v27 = vadd.f32 %v4344_v17, %v1265_v18  ;;  %v1263_v60 = vmul.f32 0.044715, %v1247_v42  ;;  %v5243_v18 = vld [vmem:[#allocation19_spill] sm:$0xff] }
 0x29f   :  { %3368 = vtanh.f32 %v1302_v19  ;;  %3032 = vmatprep.subr.bf16.mxu1 %v698_v33  ;;  %v4445_v5 = vpack.c.bf16 %v4365_v56, %v4357_v8  ;;  %v1351_v57 = vmul.f32 %v1335_v3, %v4307_v53  ;;  %v4450_v0 = vpack.c.bf16 %v4374_v25, %v4360_v24 }
 0x2a0   :  { %3370 = vtanh.f32 %v1301_v29  ;;  %v1300_v34 = vmul.f32 0.7978846, %v1284_v59  ;;  %v4452_v2 = vpack.c.bf16 %v1354_v6, %v1353_v16  ;;  %v1298_v13 = vmul.f32 0.7978846, %v1282_v58 }
 0x2a1   :  { %3372 = vtanh.f32 %v1299_v50  ;;  %v1280_v15 = vadd.f32 %v1264_v28, %v4352_v32  ;;  %v697_v42 = vpack.c.bf16 %v4403_v36, %v4386_v54  ;;  %v666_v49 = vmul.f32 0.5, %v4376_v61  ;;  %v5239_v36 = vld [vmem:[#allocation23_spill] sm:$0xff] }
 0x2a2   :  { %3374 = vtanh.f32 %v1300_v34  ;;  %v648_v8 = vadd.f32 1.0, %v3367_v12  ;;  %v684_v53 = vmul.f32 %v4388_v20, %v4251_v39  ;;  %3033 = vmatpush3.bf16.msra.mxu1 %v698_v33  ;;  %v4460_v56 = vpack.c.bf16 %v1352_v10, %v1351_v57 }
 0x2a3   :  { %v1261_v24 = vmul.f32 0.044715, %v4395_v35  ;;  %v1243_v25 = vmul.f32 %v4399_v30, %v4332_v4  ;;  %v1297_v38 = vmul.f32 0.7978846, %v1281_v27  ;;  %v1279_v48 = vadd.f32 %v1263_v60, %v4348_v37  ;;  %3034 = vmatprep.subr.bf16.mxu1 %v697_v42  ;;  %v5240_v35 = vld [vmem:[#allocation18_spill] sm:$0xff]  ;;  %v5241_v30 = vld [vmem:[#allocation21_spill] sm:$0xff] }
 0x2a4   :  { %v683_v54 = vmul.f32 %v4234_v43, %v4378_v62  ;;  %v665_v12 = vmul.f32 0.5, %v4380_v31  ;;  %v1260_v61 = vmul.f32 0.044715, %v1244_v14  ;;  %v1278_v39 = vadd.f32 %v4337_v55, %v1262_v41  ;;  %v5242_v43 = vld [vmem:[#allocation20_spill] sm:$0xff] }
 0x2a5   :  { %3376 = vtanh.f32 %v1298_v13  ;;  %v1296_v20 = vmul.f32 0.7978846, %v1280_v15  ;;  %v696_v22 = vpack.c.bf16 %v5239_v36, %v684_v53  ;;  %v682_v9 = vmul.f32 %v5240_v35, %v666_v49  ;;  %v5244_v15 = vld [vmem:[#allocation22_spill] sm:$0xff] }
 0x2a6   :  { %v664_v47 = vmul.f32 0.5, %v648_v8  ;;  %3035 = vmatpush3.bf16.msra.mxu1 %v697_v42  ;;  %v1277_v11 = vadd.f32 %v5241_v30, %v1261_v24  ;;  %v1259_v29 = vmul.f32 0.044715, %v1243_v25  ;;  %3378 = vtanh.f32 %v1297_v38 }
 0x2a7   :  { %v1295_v46 = vmul.f32 0.7978846, %v1279_v48  ;;  %3036 = vmatprep.subr.bf16.mxu1 %v696_v22  ;;  %v681_v62 = vmul.f32 %v665_v12, %v5242_v43  ;;  %v1294_v51 = vmul.f32 0.7978846, %v1278_v39  ;;  %v1276_v44 = vadd.f32 %v1260_v61, %v4342_v52  ;;  %v3241_v12 = vld [vmem:[#allocation7 + $0x8] sm:$0xff]   ;;  %v3242_v39 = vld [vmem:[#allocation7 + $0x10] sm:$0xff]  }
 0x2a8   :  { %3380 = vtanh.f32 %v1296_v20  ;;  %v695_v1 = vpack.c.bf16 %v683_v54, %v682_v9  ;;  %v680_v19 = vmul.f32 %v664_v47, %v5243_v18  ;;  %v1293_v3 = vmul.f32 0.7978846, %v1277_v11 }
 0x2a9   :  { %v1275_v23 = vadd.f32 %v1259_v29, %v4332_v4  ;;  %3382 = vtanh.f32 %v1295_v46  ;;  %v1292_v50 = vmul.f32 0.7978846, %v1276_v44  ;;  %v3244_v44 = vld [vmem:[#allocation7 + $0x20] sm:$0xff]  }
 0x2aa   :  { %3037 = vmatpush3.bf16.msra.mxu1 %v696_v22  ;;  %3384 = vtanh.f32 %v1294_v51  ;;  %v694_v58 = vpack.c.bf16 %v681_v62, %v680_v19  ;;  %v3243_v51 = vld [vmem:[#allocation7 + $0x18] sm:$0xff]  }
 0x2ab   :  { %3038 = vmatprep.subr.bf16.mxu1 %v695_v1  ;;  %3386 = vtanh.f32 %v1293_v3  ;;  %v1291_v59 = vmul.f32 0.7978846, %v1275_v23 }
 0x2ac   :  { %v3369_v31 = vpop.eup %3368  ;;  %3388 = vtanh.f32 %v1292_v50  ;;  %v3246_v50 = vld [vmem:[#allocation7 + $0x30] sm:$0xff]  }
 0x2ad   :  { %v3371_v7 = vpop.eup %3370  ;;  %v1334_v26 = vadd.f32 1.0, %v3369_v31  ;;  %3390 = vtanh.f32 %v1291_v59 }
 0x2ae   :  { %v3373_v6 = vpop.eup %3372  ;;  %v1333_v33 = vadd.f32 1.0, %v3371_v7  ;;  %3039 = vmatpush3.bf16.msra.mxu1 %v695_v1 }
 0x2af   :  { %v3375_v28 = vpop.eup %3374  ;;  %v1350_v16 = vmul.f32 0.5, %v1334_v26  ;;  %3040 = vmatprep.subr.bf16.mxu1 %v694_v58  ;;  %v1331_v14 = vadd.f32 1.0, %v3373_v6  ;;  %v3245_v6 = vld [vmem:[#allocation7 + $0x28] sm:$0xff]  }
 0x2b0   :  { %v1332_v10 = vadd.f32 1.0, %v3375_v28  ;;  %v1349_v41 = vmul.f32 0.5, %v1333_v33  ;;  %v3247_v33 = vld [vmem:[#allocation7 + $0x38] sm:$0xff]  }
 0x2b1   :  { %v1366_v60 = vmul.f32 %v4392_v21, %v1350_v16  ;;  %v1347_v49 = vmul.f32 0.5, %v1331_v14  ;;  %v3521_v16 = vld [vmem:[#allocation2 + $0x10] sm:$0xff] }
 0x2b2   :  { %v3377_v27 = vpop.eup %3376  ;;  %3041 = vmatpush3.bf16.msra.mxu1 %v694_v58  ;;  %v1348_v34 = vmul.f32 0.5, %v1332_v10  ;;  %v1365_v42 = vmul.f32 %v5244_v15, %v1349_v41  ;;  %v3520_v58 = vld [vmem:[#allocation2] sm:$0xff] }
 0x2b3   :  { %3042 = vmatprep.subr.bf16.mxu1 %v4445_v5  ;;  %v3379_v57 = vpop.eup %3378  ;;  %v1330_v13 = vadd.f32 1.0, %v3377_v27  ;;  %v1363_v54 = vmul.f32 %v1347_v49, %v4362_v40  ;;  %v3525_v49 = vld [vmem:[#allocation2 + $0x30] sm:$0xff] }
 0x2b4   :  { %v1329_v53 = vadd.f32 1.0, %v3379_v57  ;;  %v1364_v24 = vmul.f32 %v1348_v34, %v4423_v63  ;;  %v1374_v25 = vpack.c.bf16 %v1366_v60, %v1365_v42  ;;  %v3523_v60 = vld [vmem:[#allocation2 + $0x18] sm:$0xff]  ;;  %v3524_v57 = vld [vmem:[#allocation2 + $0x20] sm:$0xff] }
 0x2b5   :  { %v3381_v8 = vpop.eup %3380  ;;  %v1346_v48 = vmul.f32 0.5, %v1330_v13 }
 0x2b6   :  { %3043 = vmatpush3.bf16.msra.mxu1 %v4445_v5  ;;  %v3383_v38 = vpop.eup %3382  ;;  %v1328_v21 = vadd.f32 1.0, %v3381_v8  ;;  %v1345_v20 = vmul.f32 0.5, %v1329_v53  ;;  %v1373_v5 = vpack.c.bf16 %v1364_v24, %v1363_v54  ;;  %v3526_v53 = vld [vmem:[#allocation2 + $0x28] sm:$0xff]  ;;  %v3528_v54 = vld [vmem:[#allocation2 + $0x40] sm:$0xff] }
 0x2b7   :  { %3044 = vmatprep.subr.bf16.mxu1 %v4450_v0  ;;  %v3385_v61 = vpop.eup %3384  ;;  %v1327_v36 = vadd.f32 1.0, %v3383_v38  ;;  %v1362_v63 = vmul.f32 %v4350_v45, %v1346_v48  ;;  %v3527_v48 = vld [vmem:[#allocation2 + $0x38] sm:$0xff] }
 0x2b8   :  { %v3387_v22 = vpop.eup %3386  ;;  %v1326_v35 = vadd.f32 1.0, %v3385_v61  ;;  %v1344_v9 = vmul.f32 0.5, %v1328_v21  ;;  %v1361_v40 = vmul.f32 %v4344_v17, %v1345_v20  ;;  %v3529_v20 = vld [vmem:[#allocation2 + $0x50] sm:$0xff] }
 0x2b9   :  { %v3389_v47 = vpop.eup %3388  ;;  %v1325_v11 = vadd.f32 1.0, %v3387_v22  ;;  %v1343_v29 = vmul.f32 0.5, %v1327_v36 }
 0x2ba   :  { %3045 = vmatpush3.bf16.msra.mxu1 %v4450_v0  ;;  %v3391_v0 = vpop.eup %3390  ;;  %v1342_v46 = vmul.f32 0.5, %v1326_v35  ;;  %v1324_v43 = vadd.f32 1.0, %v3389_v47  ;;  %v1360_v62 = vmul.f32 %v1344_v9, %v4352_v32  ;;  %v1372_v31 = vpack.c.bf16 %v1362_v63, %v1361_v40  ;;  %v3531_v9 = vld [vmem:[#allocation2 + $0x58] sm:$0xff] }
 0x2bb   :  { %3094 = vmatprep.subr.bf16.mxu1 %v1374_v25  ;;  %v1341_v45 = vmul.f32 0.5, %v1325_v11  ;;  %v1323_v1 = vadd.f32 1.0, %v3391_v0  ;;  %v1359_v7 = vmul.f32 %v1343_v29, %v4348_v37  ;;  %v3532_v11 = vld [vmem:[#allocation2 + $0x60] sm:$0xff] }
 0x2bc   :  { %v1358_v18 = vmul.f32 %v4337_v55, %v1342_v46  ;;  %v1340_v19 = vmul.f32 0.5, %v1324_v43  ;;  %v3533_v46 = vld [vmem:[#allocation2 + $0x70] sm:$0xff] }
 0x2bd   :  { %3047 = vmatmul.mubr.bf16.vlgmr.msra.gmra.mxu1 %v3241_v12  ;;  %v1371_v17 = vpack.c.bf16 %v1360_v62, %v1359_v7  ;;  %v1357_v3 = vmul.f32 %v5241_v30, %v1341_v45  ;;  %v1339_v23 = vmul.f32 0.5, %v1323_v1  ;;  %v3534_v62 = vld [vmem:[#allocation2 + $0x68] sm:$0xff]  ;;  %v3535_v45 = vld [vmem:[#allocation2 + $0x78] sm:$0xff]  ;;  %v3536_v7 = vld [vmem:[#allocation2 + $0x80] sm:$0xff] }
 0x2be   :  { %3095 = vmatpush3.bf16.msra.mxu1 %v1374_v25  ;;  %3050 = vmatprep.mubr.bf16.mxu1 %v3242_v39  ;;  %v1356_v32 = vmul.f32 %v1340_v19, %v4342_v52  ;;  %v5245_v52 = vld [vmem:[#allocation17_spill] sm:$0xff] }
 0x2bf   :  { %3096 = vmatprep.subr.bf16.mxu1 %v1373_v5  ;;  %v1370_v26 = vpack.c.bf16 %v1358_v18, %v1357_v3  ;;  %v1355_v37 = vmul.f32 %v1339_v23, %v4332_v4  ;;  %v3537_v3 = vld [vmem:[#allocation2 + $0x90] sm:$0xff] }
 0x2c1   :  { %v1369_v55 = vpack.c.bf16 %v1356_v32, %v1355_v37  ;;  %v3538_v32 = vld [vmem:[#allocation2 + $0x88] sm:$0xff]  ;;  %v3539_v37 = vld [vmem:[#allocation2 + $0x98] sm:$0xff] }
 0x2c2   :  { %3097 = vmatpush3.bf16.msra.mxu1 %v1373_v5  ;;  %v3530_v5 = vld [vmem:[#allocation2 + $0x48] sm:$0xff] }
 0x2c3   :  { %3098 = vmatprep.subr.bf16.mxu1 %v1372_v31 }
 0x2c5   :  { %3051 = vmatmul.mubr.bf16.gmra.mxu1 %v3243_v51 }
 0x2c6   :  { %3099 = vmatpush3.bf16.msra.mxu1 %v1372_v31  ;;  %3054 = vmatprep.mubr.bf16.mxu1 %v3244_v44 }
 0x2c7   :  { %3100 = vmatprep.subr.bf16.mxu1 %v1371_v17 }
 0x2ca   :  { %3101 = vmatpush3.bf16.msra.mxu1 %v1371_v17 }
 0x2cb   :  { %3102 = vmatprep.subr.bf16.mxu1 %v1370_v26 }
 0x2cd   :  { %3055 = vmatmul.mubr.bf16.gmra.mxu1 %v3245_v6 }
 0x2ce   :  { %3103 = vmatpush3.bf16.msra.mxu1 %v1370_v26  ;;  %3058 = vmatprep.mubr.bf16.mxu1 %v3246_v50 }
 0x2cf   :  { %3104 = vmatprep.subr.bf16.mxu1 %v1369_v55 }
 0x2d2   :  { %3105 = vmatpush3.bf16.msra.mxu1 %v1369_v55 }
 0x2d3   :  { %3106 = vmatprep.subr.bf16.mxu1 %v4452_v2 }
 0x2d5   :  { %3059 = vmatmul.mubr.bf16.gmra.mxu1 %v3247_v33 }
 0x2d6   :  { %3107 = vmatpush3.bf16.msra.mxu1 %v4452_v2  ;;  %3110 = vmatprep.mubr.bf16.mxu1 %v5245_v52 }
 0x2d7   :  { %3108 = vmatprep.subr.bf16.mxu1 %v4460_v56 }
 0x2da   :  { %3109 = vmatpush3.bf16.msra.mxu1 %v4460_v56  ;;  %v3522_v56 = vld [vmem:[#allocation2 + $0x8] sm:$0xff] }
 0x2dd   :  { %3111 = vmatmul.mubr.bf16.vlgmr.msra.gmra.mxu1 %v3241_v12 }
 0x2de   :  { %3114 = vmatprep.mubr.bf16.mxu1 %v3242_v39 }
 0x2e5   :  { %3115 = vmatmul.mubr.bf16.gmra.mxu1 %v3243_v51 }
 0x2e6   :  { %3118 = vmatprep.mubr.bf16.mxu1 %v3244_v44 }
 0x2ed   :  { %3119 = vmatmul.mubr.bf16.gmra.mxu1 %v3245_v6 }
 0x2ee   :  { %3122 = vmatprep.mubr.bf16.mxu1 %v3246_v50 }
 0x2f5   :  { %3123 = vmatmul.mubr.bf16.gmra.mxu1 %v3247_v33  ;;  %v3540_v33 = vld [vmem:[#allocation2 + $0xa0] sm:$0xff] }
 0x37d   :  { %v3048_v4 = vpop.f32.mrf.mxu1 }
 0x37e   :  { %v4501_v10 = vadd.f32 %v3521_v16, %v3048_v4 }
 0x37f   :  { %v782_v30 = vpop.f32.mrf.mxu1 }
 0x380   :  { %v4498_v28 = vadd.f32 %v3520_v58, %v782_v30  ;;  %v3541_v58 = vld [vmem:[#allocation2 + $0xb0] sm:$0xff] }
 0x381   :  { %v3049_v59 = vpop.f32.mrf.mxu1 }
 0x382   :  { %1537 = vadd.xlane.f32.xlu0 %v4498_v28  ;;  %v4507_v34 = vadd.f32 %v3523_v60, %v3049_v59 }
 0x383   :  { %v785_v2 = vpop.f32.mrf.mxu1 }
 0x384   :  { %v4503_v41 = vadd.f32 %v3522_v56, %v785_v2  ;;  %v3542_v2 = vld [vmem:[#allocation2 + $0xa8] sm:$0xff] }
 0x385   :  { %v3052_v14 = vpop.f32.mrf.mxu1 }
 0x386   :  { %1541 = vadd.xlane.f32.xlu0 %v4501_v10  ;;  %1539 = vadd.xlane.f32.xlu1 %v4503_v41  ;;  %v4513_v8 = vadd.f32 %v3525_v49, %v3052_v14 }
 0x387   :  { %v798_v27 = vpop.f32.mrf.mxu1 }
 0x388   :  { %v4509_v13 = vadd.f32 %v3524_v57, %v798_v27  ;;  %v3543_v27 = vld [vmem:[#allocation2 + $0xb8] sm:$0xff]  ;;  %v3544_v57 = vld [vmem:[#allocation2 + $0xc0] sm:$0xff] }
 0x389   :  { %v3053_v15 = vpop.f32.mrf.mxu1 }
 0x38a   :  { %1543 = vadd.xlane.f32.xlu1 %v4507_v34  ;;  %1545 = vadd.xlane.f32.xlu0 %v4509_v13  ;;  %v4519_v21 = vadd.f32 %v3527_v48, %v3053_v15 }
 0x38b   :  { %v801_v42 = vpop.f32.mrf.mxu1 }
 0x38c   :  { %v4515_v24 = vadd.f32 %v3526_v53, %v801_v42  ;;  %v3545_v53 = vld [vmem:[#allocation2 + $0xd0] sm:$0xff] }
 0x38d   :  { %v3056_v25 = vpop.f32.mrf.mxu1 }
 0x38e   :  { %1549 = vadd.xlane.f32.xlu0 %v4513_v8  ;;  %1547 = vadd.xlane.f32.xlu1 %v4515_v24  ;;  %v4525_v36 = vadd.f32 %v3529_v20, %v3056_v25 }
 0x38f   :  { %v814_v38 = vpop.f32.mrf.mxu1 }
 0x390   :  { %v4521_v12 = vadd.f32 %v3528_v54, %v814_v38  ;;  %v3546_v38 = vld [vmem:[#allocation2 + $0xc8] sm:$0xff] }
 0x391   :  { %v3057_v61 = vpop.f32.mrf.mxu1 }
 0x392   :  { %1551 = vadd.xlane.f32.xlu1 %v4519_v21  ;;  %1553 = vadd.xlane.f32.xlu0 %v4521_v12  ;;  %v4531_v47 = vadd.f32 %v3531_v9, %v3057_v61 }
 0x393   :  { %v817_v39 = vpop.f32.mrf.mxu1 }
 0x394   :  { %v4527_v22 = vadd.f32 %v3530_v5, %v817_v39  ;;  %v3547_v39 = vld [vmem:[#allocation2 + $0xd8] sm:$0xff]  ;;  %v3548_v5 = vld [vmem:[#allocation2 + $0xe0] sm:$0xff] }
 0x395   :  { %v3060_v35 = vpop.f32.mrf.mxu1 }
 0x396   :  { %1557 = vadd.xlane.f32.xlu0 %v4525_v36  ;;  %1555 = vadd.xlane.f32.xlu1 %v4527_v22  ;;  %v4537_v43 = vadd.f32 %v3533_v46, %v3060_v35 }
 0x397   :  { %v830_v63 = vpop.f32.mrf.mxu1 }
 0x398   :  { %v4533_v40 = vadd.f32 %v3532_v11, %v830_v63  ;;  %5247 = vst [vmem:[#allocation18_spill] sm:$0xff] %v4537_v43  ;;  %v3549_v11 = vld [vmem:[#allocation2 + $0xf0] sm:$0xff] }
 0x399   :  { %v3061_v29 = vpop.f32.mrf.mxu1 }
 0x39a   :  { %5246 = vst [vmem:[#allocation23_spill] sm:$0xff] %v4533_v40  ;;  %1559 = vadd.xlane.f32.xlu1 %v4531_v47  ;;  %1561 = vadd.xlane.f32.xlu0 %v4533_v40  ;;  %v4543_v1 = vadd.f32 %v3535_v45, %v3061_v29 }
 0x39b   :  { %v833_v0 = vpop.f32.mrf.mxu1 }
 0x39c   :  { %v4539_v31 = vadd.f32 %v3534_v62, %v833_v0  ;;  %5249 = vst [vmem:[#allocation20_spill] sm:$0xff] %v4543_v1  ;;  %v3550_v0 = vld [vmem:[#allocation2 + $0xe8] sm:$0xff]  ;;  %v3551_v62 = vld [vmem:[#allocation2 + $0xf8] sm:$0xff] }
 0x39d   :  { %v3112_v51 = vpop.f32.mrf.mxu1 }
 0x39e   :  { %5248 = vst [vmem:[#allocation21_spill] sm:$0xff] %v4539_v31  ;;  %1565 = vadd.xlane.f32.xlu0 %v4537_v43  ;;  %1563 = vadd.xlane.f32.xlu1 %v4539_v31  ;;  %v4549_v23 = vadd.f32 %v3537_v3, %v3112_v51 }
 0x39f   :  { %v1409_v44 = vpop.f32.mrf.mxu1 }
 0x3a0   :  { %v4545_v18 = vadd.f32 %v3536_v7, %v1409_v44  ;;  %5251 = vst [vmem:[#allocation22_spill] sm:$0xff] %v4549_v23 }
 0x3a1   :  { %v3113_v19 = vpop.f32.mrf.mxu1 }
 0x3a2   :  { %5250 = vst [vmem:[#allocation19_spill] sm:$0xff] %v4545_v18  ;;  %1569 = vadd.xlane.f32.xlu0 %v4545_v18  ;;  %1567 = vadd.xlane.f32.xlu1 %v4543_v1  ;;  %v4555_v55 = vadd.f32 %v3539_v37, %v3113_v19 }
 0x3a3   :  { %v1412_v17 = vpop.f32.mrf.mxu1 }
 0x3a4   :  { %v4551_v26 = vadd.f32 %v3538_v32, %v1412_v17  ;;  %5253 = vst [vmem:[#allocation24_spill] sm:$0xff] %v4555_v55 }
 0x3a5   :  { %v3116_v6 = vpop.f32.mrf.mxu1 }
 0x3a6   :  { %5252 = vst [vmem:[#allocation17_spill] sm:$0xff] %v4551_v26  ;;  %1573 = vadd.xlane.f32.xlu0 %v4549_v23  ;;  %1571 = vadd.xlane.f32.xlu1 %v4551_v26  ;;  %v4561_v59 = vadd.f32 %v3541_v58, %v3116_v6 }
 0x3a7   :  { %v1425_v50 = vpop.f32.mrf.mxu1 }
 0x3a8   :  { %v4557_v52 = vadd.f32 %v3540_v33, %v1425_v50  ;;  %5255 = vst [vmem:[#allocation26_spill] sm:$0xff] %v4561_v59 }
 0x3a9   :  { %v3117_v4 = vpop.f32.mrf.mxu1 }
 0x3aa   :  { %5254 = vst [vmem:[#allocation25_spill] sm:$0xff] %v4557_v52  ;;  %1577 = vadd.xlane.f32.xlu0 %v4557_v52  ;;  %1575 = vadd.xlane.f32.xlu1 %v4555_v55  ;;  %v4567_v60 = vadd.f32 %v3543_v27, %v3117_v4 }
 0x3ab   :  { %v1428_v30 = vpop.f32.mrf.mxu1 }
 0x3ac   :  { %v4563_v16 = vadd.f32 %v3542_v2, %v1428_v30  ;;  %5257 = vst [vmem:[#allocation28_spill] sm:$0xff] %v4567_v60 }
 0x3ad   :  { %v3120_v56 = vpop.f32.mrf.mxu1 }
 0x3ae   :  { %5256 = vst [vmem:[#allocation27_spill] sm:$0xff] %v4563_v16  ;;  %1581 = vadd.xlane.f32.xlu0 %v4561_v59  ;;  %1579 = vadd.xlane.f32.xlu1 %v4563_v16  ;;  %v4573_v25 = vadd.f32 %v3545_v53, %v3120_v56 }
 0x3af   :  { %v1441_v14 = vpop.f32.mrf.mxu1 }
 0x3b0   :  { %v4569_v15 = vadd.f32 %v3544_v57, %v1441_v14  ;;  %5259 = vst [vmem:[#allocation30_spill] sm:$0xff] %v4573_v25 }
 0x3b1   :  { %v3121_v42 = vpop.f32.mrf.mxu1 }
 0x3b2   :  { %5258 = vst [vmem:[#allocation29_spill] sm:$0xff] %v4569_v15  ;;  %1585 = vadd.xlane.f32.xlu0 %v4569_v15  ;;  %1583 = vadd.xlane.f32.xlu1 %v4567_v60  ;;  %v4579_v20 = vadd.f32 %v3547_v39, %v3121_v42 }
 0x3b3   :  { %v1444_v49 = vpop.f32.mrf.mxu1 }
 0x3b4   :  { %v4575_v48 = vadd.f32 %v3546_v38, %v1444_v49  ;;  %5261 = vst [vmem:[#allocation32_spill] sm:$0xff] %v4579_v20 }
 0x3b5   :  { %v3124_v54 = vpop.f32.mrf.mxu1 }
 0x3b6   :  { %5260 = vst [vmem:[#allocation31_spill] sm:$0xff] %v4575_v48  ;;  %1589 = vadd.xlane.f32.xlu0 %v4573_v25  ;;  %1587 = vadd.xlane.f32.xlu1 %v4575_v48  ;;  %v4585_v29 = vadd.f32 %v3549_v11, %v3124_v54 }
 0x3b7   :  { %v1457_v61 = vpop.f32.mrf.mxu1 }
 0x3b8   :  { %v4581_v35 = vadd.f32 %v3548_v5, %v1457_v61  ;;  %5263 = vst [vmem:[#allocation34_spill] sm:$0xff] %v4585_v29 }
 0x3b9   :  { %v3125_v63 = vpop.f32.mrf.mxu1 }
 0x3ba   :  { %5262 = vst [vmem:[#allocation33_spill] sm:$0xff] %v4581_v35  ;;  %1593 = vadd.xlane.f32.xlu0 %v4581_v35  ;;  %1591 = vadd.xlane.f32.xlu1 %v4579_v20  ;;  %v4591_v51 = vadd.f32 %v3551_v62, %v3125_v63 }
 0x3bb   :  { %v1460_v9 = vpop.f32.mrf.mxu1 }
 0x3bc   :  { %v4587_v46 = vadd.f32 %v3550_v0, %v1460_v9  ;;  %5265 = vst [vmem:[#allocation36_spill] sm:$0xff] %v4591_v51 }
 0x3be   :  { %5264 = vst [vmem:[#allocation35_spill] sm:$0xff] %v4587_v46  ;;  %1597 = vadd.xlane.f32.xlu0 %v4585_v29  ;;  %1595 = vadd.xlane.f32.xlu1 %v4587_v46 }
 0x3c2   :  { %1599 = vadd.xlane.f32.xlu1 %v4591_v51 }
 0x40b   :  { %v1538_v44 = vpop.xlane.xlu0 %1537 }
 0x40c   :  { %v1601_v45 = vmul.f32 0.03125, %v1538_v44 }
 0x40e   :  { %v1633_v7 = vsub.f32 %v4498_v28, %v1601_v45 }
 0x40f   :  { %v1542_v19 = vpop.xlane.xlu0 %1541  ;;  %v1540_v17 = vpop.xlane.xlu1 %1539 }
 0x410   :  { %v1603_v3 = vmul.f32 0.03125, %v1542_v19  ;;  %v1602_v32 = vmul.f32 0.03125, %v1540_v17  ;;  %v4597_v50 = vsel %vm104_vm0, %v1633_v7, 0.0 }
 0x411   :  { %v1697_v37 = vmul.f32 %v4597_v50, %v4597_v50 }
 0x412   :  { %v1635_v33 = vsub.f32 %v4501_v10, %v1603_v3  ;;  %v1634_v4 = vsub.f32 %v4503_v41, %v1602_v32 }
 0x413   :  { %v1544_v30 = vpop.xlane.xlu1 %1543  ;;  %v1546_v58 = vpop.xlane.xlu0 %1545  ;;  %1729 = vadd.xlane.f32.xlu0 %v1697_v37 }
 0x414   :  { %v4605_v2 = vsel %vm104_vm0, %v1635_v33, 0.0  ;;  %v1604_v56 = vmul.f32 0.03125, %v1544_v30  ;;  %v1605_v14 = vmul.f32 0.03125, %v1546_v58  ;;  %v4609_v27 = vsel %vm104_vm0, %v1634_v4, 0.0 }
 0x415   :  { %v1699_v57 = vmul.f32 %v4605_v2, %v4605_v2  ;;  %v1698_v42 = vmul.f32 %v4609_v27, %v4609_v27 }
 0x416   :  { %v1636_v49 = vsub.f32 %v4507_v34, %v1604_v56  ;;  %v1637_v53 = vsub.f32 %v4509_v13, %v1605_v14 }
 0x417   :  { %v1550_v38 = vpop.xlane.xlu0 %1549  ;;  %v1548_v54 = vpop.xlane.xlu1 %1547  ;;  %1733 = vadd.xlane.f32.xlu0 %v1699_v57  ;;  %1731 = vadd.xlane.f32.xlu1 %v1698_v42 }
 0x418   :  { %v4619_v61 = vsel %vm104_vm0, %v1636_v49, 0.0  ;;  %v4623_v39 = vsel %vm104_vm0, %v1637_v53, 0.0  ;;  %v1607_v5 = vmul.f32 0.03125, %v1550_v38  ;;  %v1606_v63 = vmul.f32 0.03125, %v1548_v54  ;;  %v3248_v38 = vld [vmem:[#allocation8 + $0x38] sm:$0xff]  }
 0x419   :  { %v1701_v9 = vmul.f32 %v4623_v39, %v4623_v39  ;;  %v1700_v11 = vmul.f32 %v4619_v61, %v4619_v61  ;;  %3126 = vmatprep.subr.bf16.mxu0 %v3248_v38 }
 0x41a   :  { %v1639_v0 = vsub.f32 %v4513_v8, %v1607_v5  ;;  %v1638_v62 = vsub.f32 %v4515_v24, %v1606_v63  ;;  %3127 = vmatpush3.bf16.msra.mxu0 %v3248_v38 }
 0x41b   :  { %v1552_v44 = vpop.xlane.xlu1 %1551  ;;  %v1554_v45 = vpop.xlane.xlu0 %1553  ;;  %1737 = vadd.xlane.f32.xlu0 %v1701_v9  ;;  %1735 = vadd.xlane.f32.xlu1 %v1700_v11 }
 0x41c   :  { %v4633_v7 = vsel %vm104_vm0, %v1639_v0, 0.0  ;;  %v4637_v19 = vsel %vm104_vm0, %v1638_v62, 0.0  ;;  %v1608_v17 = vmul.f32 0.03125, %v1552_v44  ;;  %v1609_v3 = vmul.f32 0.03125, %v1554_v45 }
 0x41d   :  { %v1703_v32 = vmul.f32 %v4633_v7, %v4633_v7  ;;  %v1702_v37 = vmul.f32 %v4637_v19, %v4637_v19 }
 0x41e   :  { %v1640_v33 = vsub.f32 %v4519_v21, %v1608_v17  ;;  %v1641_v4 = vsub.f32 %v4521_v12, %v1609_v3 }
 0x41f   :  { %v1558_v30 = vpop.xlane.xlu0 %1557  ;;  %v1556_v58 = vpop.xlane.xlu1 %1555  ;;  %1741 = vadd.xlane.f32.xlu0 %v1703_v32  ;;  %1739 = vadd.xlane.f32.xlu1 %v1702_v37 }
 0x420   :  { %v4647_v56 = vsel %vm104_vm0, %v1640_v33, 0.0  ;;  %v4651_v14 = vsel %vm104_vm0, %v1641_v4, 0.0  ;;  %v1611_v57 = vmul.f32 0.03125, %v1558_v30  ;;  %v1610_v42 = vmul.f32 0.03125, %v1556_v58 }
 0x421   :  { %v1705_v49 = vmul.f32 %v4651_v14, %v4651_v14  ;;  %v1704_v53 = vmul.f32 %v4647_v56, %v4647_v56 }
 0x422   :  { %v1643_v54 = vsub.f32 %v4525_v36, %v1611_v57  ;;  %v1642_v5 = vsub.f32 %v4527_v22, %v1610_v42 }
 0x423   :  { %v1560_v63 = vpop.xlane.xlu1 %1559  ;;  %v1562_v9 = vpop.xlane.xlu0 %1561  ;;  %1745 = vadd.xlane.f32.xlu0 %v1705_v49  ;;  %1743 = vadd.xlane.f32.xlu1 %v1704_v53 }
 0x424   :  { %v4661_v11 = vsel %vm104_vm0, %v1643_v54, 0.0  ;;  %v4665_v0 = vsel %vm104_vm0, %v1642_v5, 0.0  ;;  %v1612_v62 = vmul.f32 0.03125, %v1560_v63  ;;  %v1613_v44 = vmul.f32 0.03125, %v1562_v9 }
 0x425   :  { %v1707_v45 = vmul.f32 %v4661_v11, %v4661_v11  ;;  %v1706_v17 = vmul.f32 %v4665_v0, %v4665_v0 }
 0x426   :  { %v1644_v3 = vsub.f32 %v4531_v47, %v1612_v62  ;;  %v1645_v32 = vsub.f32 %v4533_v40, %v1613_v44 }
 0x427   :  { %v1566_v37 = vpop.xlane.xlu0 %1565  ;;  %1749 = vadd.xlane.f32.xlu0 %v1707_v45  ;;  %1747 = vadd.xlane.f32.xlu1 %v1706_v17  ;;  %v1564_v33 = vpop.xlane.xlu1 %1563 }
 0x428   :  { %v4675_v4 = vsel %vm104_vm0, %v1644_v3, 0.0  ;;  %v4679_v30 = vsel %vm104_vm0, %v1645_v32, 0.0  ;;  %v1615_v58 = vmul.f32 0.03125, %v1566_v37  ;;  %v1614_v57 = vmul.f32 0.03125, %v1564_v33 }
 0x429   :  { %v1709_v42 = vmul.f32 %v4679_v30, %v4679_v30  ;;  %v1708_v49 = vmul.f32 %v4675_v4, %v4675_v4 }
 0x42a   :  { %v1647_v53 = vsub.f32 %v4537_v43, %v1615_v58  ;;  %v1646_v38 = vsub.f32 %v4539_v31, %v1614_v57 }
 0x42b   :  { %v1570_v54 = vpop.xlane.xlu0 %1569  ;;  %1753 = vadd.xlane.f32.xlu0 %v1709_v42  ;;  %1751 = vadd.xlane.f32.xlu1 %v1708_v49  ;;  %v1568_v5 = vpop.xlane.xlu1 %1567 }
 0x42c   :  { %v4689_v63 = vsel %vm104_vm0, %v1647_v53, 0.0  ;;  %v4693_v9 = vsel %vm104_vm0, %v1646_v38, 0.0  ;;  %v1617_v62 = vmul.f32 0.03125, %v1570_v54  ;;  %v1616_v44 = vmul.f32 0.03125, %v1568_v5 }
 0x42d   :  { %v1711_v45 = vmul.f32 %v4689_v63, %v4689_v63  ;;  %v1710_v17 = vmul.f32 %v4693_v9, %v4693_v9 }
 0x42e   :  { %v1649_v3 = vsub.f32 %v4545_v18, %v1617_v62  ;;  %v1648_v32 = vsub.f32 %v4543_v1, %v1616_v44  ;;  %v3250_v18 = vld [vmem:[#allocation8 + $0x28] sm:$0xff]  }
 0x42f   :  { %v1574_v37 = vpop.xlane.xlu0 %1573  ;;  %1757 = vadd.xlane.f32.xlu0 %v1711_v45  ;;  %1755 = vadd.xlane.f32.xlu1 %v1710_v17  ;;  %v1572_v33 = vpop.xlane.xlu1 %1571  ;;  %v3249_v45 = vld [vmem:[#allocation8 + $0x30] sm:$0xff]  }
 0x430   :  { %v4703_v58 = vsel %vm104_vm0, %v1649_v3, 0.0  ;;  %v4707_v57 = vsel %vm104_vm0, %v1648_v32, 0.0  ;;  %v1619_v42 = vmul.f32 0.03125, %v1574_v37  ;;  %v1618_v49 = vmul.f32 0.03125, %v1572_v33  ;;  %3128 = vmatprep.subr.bf16.mxu0 %v3249_v45 }
 0x431   :  { %v1713_v53 = vmul.f32 %v4703_v58, %v4703_v58  ;;  %v1712_v38 = vmul.f32 %v4707_v57, %v4707_v57  ;;  %3129 = vmatpush3.bf16.msra.mxu0 %v3249_v45 }
 0x432   :  { %v1651_v54 = vsub.f32 %v4549_v23, %v1619_v42  ;;  %v1650_v5 = vsub.f32 %v4551_v26, %v1618_v49  ;;  %3130 = vmatprep.subr.bf16.mxu0 %v3250_v18 }
 0x433   :  { %v1578_v62 = vpop.xlane.xlu0 %1577  ;;  %1761 = vadd.xlane.f32.xlu0 %v1713_v53  ;;  %1759 = vadd.xlane.f32.xlu1 %v1712_v38  ;;  %v1576_v44 = vpop.xlane.xlu1 %1575 }
 0x434   :  { %v4717_v17 = vsel %vm104_vm0, %v1651_v54, 0.0  ;;  %v4721_v3 = vsel %vm104_vm0, %v1650_v5, 0.0  ;;  %v1621_v32 = vmul.f32 0.03125, %v1578_v62  ;;  %v1620_v37 = vmul.f32 0.03125, %v1576_v44 }
 0x435   :  { %v1715_v33 = vmul.f32 %v4717_v17, %v4717_v17  ;;  %v1714_v42 = vmul.f32 %v4721_v3, %v4721_v3  ;;  %3131 = vmatpush3.bf16.msra.mxu0 %v3250_v18 }
 0x436   :  { %v1653_v49 = vsub.f32 %v4557_v52, %v1621_v32  ;;  %v1652_v53 = vsub.f32 %v4555_v55, %v1620_v37  ;;  %v3251_v37 = vld [vmem:[#allocation8 + $0x20] sm:$0xff]  }
 0x437   :  { %v1582_v38 = vpop.xlane.xlu0 %1581  ;;  %1765 = vadd.xlane.f32.xlu0 %v1715_v33  ;;  %1763 = vadd.xlane.f32.xlu1 %v1714_v42  ;;  %v1580_v54 = vpop.xlane.xlu1 %1579 }
 0x438   :  { %v4731_v5 = vsel %vm104_vm0, %v1653_v49, 0.0  ;;  %v4735_v62 = vsel %vm104_vm0, %v1652_v53, 0.0  ;;  %v1623_v44 = vmul.f32 0.03125, %v1582_v38  ;;  %v1622_v26 = vmul.f32 0.03125, %v1580_v54  ;;  %3132 = vmatprep.subr.bf16.mxu0 %v3251_v37 }
 0x439   :  { %v1717_v32 = vmul.f32 %v4731_v5, %v4731_v5  ;;  %v1716_v45 = vmul.f32 %v4735_v62, %v4735_v62  ;;  %3133 = vmatpush3.bf16.msra.mxu0 %v3251_v37 }
 0x43a   :  { %v1655_v33 = vsub.f32 %v4561_v59, %v1623_v44  ;;  %v1654_v42 = vsub.f32 %v4563_v16, %v1622_v26 }
 0x43b   :  { %v1586_v49 = vpop.xlane.xlu0 %1585  ;;  %1769 = vadd.xlane.f32.xlu0 %v1717_v32  ;;  %1767 = vadd.xlane.f32.xlu1 %v1716_v45  ;;  %v1584_v53 = vpop.xlane.xlu1 %1583  ;;  %v3252_v32 = vld [vmem:[#allocation8 + $0x18] sm:$0xff]  }
 0x43c   :  { %v4745_v38 = vsel %vm104_vm0, %v1655_v33, 0.0  ;;  %v4749_v54 = vsel %vm104_vm0, %v1654_v42, 0.0  ;;  %v1625_v52 = vmul.f32 0.03125, %v1586_v49  ;;  %v1624_v55 = vmul.f32 0.03125, %v1584_v53  ;;  %3134 = vmatprep.subr.bf16.mxu0 %v3252_v32 }
 0x43d   :  { %v1719_v44 = vmul.f32 %v4745_v38, %v4745_v38  ;;  %v1718_v26 = vmul.f32 %v4749_v54, %v4749_v54  ;;  %3135 = vmatpush3.bf16.msra.mxu0 %v3252_v32 }
 0x43e   :  { %v1657_v45 = vsub.f32 %v4569_v15, %v1625_v52  ;;  %v1656_v33 = vsub.f32 %v4567_v60, %v1624_v55 }
 0x43f   :  { %v1590_v16 = vpop.xlane.xlu0 %1589  ;;  %1773 = vadd.xlane.f32.xlu0 %v1719_v44  ;;  %1771 = vadd.xlane.f32.xlu1 %v1718_v26  ;;  %v1588_v42 = vpop.xlane.xlu1 %1587  ;;  %v3253_v44 = vld [vmem:[#allocation8 + $0x10] sm:$0xff]  }
 0x440   :  { %v4759_v49 = vsel %vm104_vm0, %v1657_v45, 0.0  ;;  %v4763_v18 = vsel %vm104_vm0, %v1656_v33, 0.0  ;;  %v1627_v53 = vmul.f32 0.03125, %v1590_v16  ;;  %v1626_v59 = vmul.f32 0.03125, %v1588_v42  ;;  %3136 = vmatprep.subr.bf16.mxu0 %v3253_v44 }
 0x441   :  { %v1721_v52 = vmul.f32 %v4759_v49, %v4759_v49  ;;  %v1720_v55 = vmul.f32 %v4763_v18, %v4763_v18  ;;  %3137 = vmatpush3.bf16.msra.mxu0 %v3253_v44 }
 0x442   :  { %v1659_v26 = vsub.f32 %v4573_v25, %v1627_v53  ;;  %v1658_v45 = vsub.f32 %v4575_v48, %v1626_v59 }
 0x443   :  { %1777 = vadd.xlane.f32.xlu0 %v1721_v52  ;;  %v1594_v15 = vpop.xlane.xlu0 %1593  ;;  %1775 = vadd.xlane.f32.xlu1 %v1720_v55  ;;  %v1592_v33 = vpop.xlane.xlu1 %1591  ;;  %v3254_v52 = vld [vmem:[#allocation8 + $0x8] sm:$0xff]  }
 0x444   :  { %v4773_v16 = vsel %vm104_vm0, %v1659_v26, 0.0  ;;  %v4777_v37 = vsel %vm104_vm0, %v1658_v45, 0.0  ;;  %v1629_v42 = vmul.f32 0.03125, %v1594_v15  ;;  %v1628_v60 = vmul.f32 0.03125, %v1592_v33  ;;  %3138 = vmatprep.subr.bf16.mxu0 %v3254_v52 }
 0x445   :  { %v1723_v53 = vmul.f32 %v4773_v16, %v4773_v16  ;;  %v1722_v59 = vmul.f32 %v4777_v37, %v4777_v37  ;;  %3139 = vmatpush3.bf16.msra.mxu0 %v3254_v52 }
 0x446   :  { %v1661_v55 = vsub.f32 %v4581_v35, %v1629_v42  ;;  %v1660_v26 = vsub.f32 %v4579_v20, %v1628_v60 }
 0x447   :  { %1781 = vadd.xlane.f32.xlu0 %v1723_v53  ;;  %v1598_v48 = vpop.xlane.xlu0 %1597  ;;  %1779 = vadd.xlane.f32.xlu1 %v1722_v59  ;;  %v1596_v45 = vpop.xlane.xlu1 %1595  ;;  %v3255_v53 = vld [vmem:[#allocation8] sm:$0xff]  }
 0x448   :  { %v4787_v15 = vsel %vm104_vm0, %v1661_v55, 0.0  ;;  %v4791_v32 = vsel %vm104_vm0, %v1660_v26, 0.0  ;;  %v1631_v33 = vmul.f32 0.03125, %v1598_v48  ;;  %v1630_v25 = vmul.f32 0.03125, %v1596_v45  ;;  %3140 = vmatprep.subr.bf16.mxu0 %v3255_v53 }
 0x449   :  { %v1725_v42 = vmul.f32 %v4787_v15, %v4787_v15  ;;  %v1724_v60 = vmul.f32 %v4791_v32, %v4791_v32  ;;  %3141 = vmatpush3.bf16.msra.mxu0 %v3255_v53 }
 0x44a   :  { %v1663_v59 = vsub.f32 %v4585_v29, %v1631_v33  ;;  %v1662_v55 = vsub.f32 %v4587_v46, %v1630_v25 }
 0x44b   :  { %1785 = vadd.xlane.f32.xlu0 %v1725_v42  ;;  %1783 = vadd.xlane.f32.xlu1 %v1724_v60  ;;  %v1600_v35 = vpop.xlane.xlu1 %1599 }
 0x44c   :  { %v4801_v48 = vsel %vm104_vm0, %v1663_v59, 0.0  ;;  %v4805_v44 = vsel %vm104_vm0, %v1662_v55, 0.0  ;;  %v1632_v26 = vmul.f32 0.03125, %v1600_v35 }
 0x44d   :  { %v1727_v45 = vmul.f32 %v4801_v48, %v4801_v48  ;;  %v1726_v33 = vmul.f32 %v4805_v44, %v4805_v44 }
 0x44e   :  { %v1664_v25 = vsub.f32 %v4591_v51, %v1632_v26 }
 0x44f   :  { %1789 = vadd.xlane.f32.xlu0 %v1727_v45  ;;  %1787 = vadd.xlane.f32.xlu1 %v1726_v33 }
 0x450   :  { %v4814_v42 = vsel %vm104_vm0, %v1664_v25, 0.0 }
 0x451   :  { %v1728_v35 = vmul.f32 %v4814_v42, %v4814_v42 }
 0x453   :  { %1791 = vadd.xlane.f32.xlu1 %v1728_v35 }
 0x49c   :  { %v1730_v52 = vpop.xlane.xlu0 %1729 }
 0x49d   :  { %v1793_v60 = vmul.f32 0.03125, %v1730_v52 }
 0x49f   :  { %v1825_v59 = vadd.f32 1e-06, %v1793_v60 }
 0x4a0   :  { %v1734_v55 = vpop.xlane.xlu0 %1733  ;;  %v1732_v46 = vpop.xlane.xlu1 %1731 }
 0x4a1   :  { %3392 = vrsqrt.f32 %v1825_v59  ;;  %v1795_v29 = vmul.f32 0.03125, %v1734_v55  ;;  %v1794_v20 = vmul.f32 0.03125, %v1732_v46 }
 0x4a3   :  { %v1827_v26 = vadd.f32 1e-06, %v1795_v29  ;;  %v1826_v45 = vadd.f32 1e-06, %v1794_v20 }
 0x4a4   :  { %v1738_v33 = vpop.xlane.xlu0 %1737  ;;  %v1736_v51 = vpop.xlane.xlu1 %1735 }
 0x4a5   :  { %3394 = vrsqrt.f32 %v1827_v26  ;;  %v1797_v6 = vmul.f32 0.03125, %v1738_v33  ;;  %v1796_v25 = vmul.f32 0.03125, %v1736_v51 }
 0x4a6   :  { %3396 = vrsqrt.f32 %v1826_v45 }
 0x4a7   :  { %v1829_v53 = vadd.f32 1e-06, %v1797_v6  ;;  %v1828_v23 = vadd.f32 1e-06, %v1796_v25 }
 0x4a8   :  { %v1742_v31 = vpop.xlane.xlu0 %1741  ;;  %v1740_v35 = vpop.xlane.xlu1 %1739 }
 0x4a9   :  { %3398 = vrsqrt.f32 %v1829_v53  ;;  %v1799_v52 = vmul.f32 0.03125, %v1742_v31  ;;  %v1798_v60 = vmul.f32 0.03125, %v1740_v35  ;;  %v4822_v31 = vld [vmem:[%s5197_s5] ss:$0 sm:$0xff]  ;;  %s3689_s5 = smov [#allocation11]  }
 0x4aa   :  { %3400 = vrsqrt.f32 %v1828_v23 }
 0x4ab   :  { %v1831_v1 = vadd.f32 1e-06, %v1799_v52  ;;  %v1830_v59 = vadd.f32 1e-06, %v1798_v60 }
 0x4ac   :  { %v1746_v55 = vpop.xlane.xlu0 %1745  ;;  %v1744_v46 = vpop.xlane.xlu1 %1743 }
 0x4ad   :  { %3402 = vrsqrt.f32 %v1831_v1  ;;  %v1801_v20 = vmul.f32 0.03125, %v1746_v55  ;;  %v1800_v29 = vmul.f32 0.03125, %v1744_v46  ;;  %v4829_v55 = vld [vmem:[%s5198_s6] ss:$0 sm:$0xff]  ;;  %s2836_s6 = sshll.u32 %s3689_s5, 4  ;;  %s2837_s6 = int_to_ptr.vmem [resolvable:$true] %s2836_s6 }
 0x4ae   :  { %v3393_v40 = vpop.eup %3392  ;;  %3404 = vrsqrt.f32 %v1830_v59  ;;  %s3652_s18 = scalar_lea.vmem %s2837_s6, 4096  ;;  %p3657_p12 = scmp.lt.s32.totalorder %s2837_s6, %s2837_s6 }
 0x4af   :  { %v1833_v26 = vadd.f32 1e-06, %v1801_v20  ;;  %v1832_v51 = vadd.f32 1e-06, %v1800_v29  ;;  %v1889_v45 = vmul.f32 %v3393_v40, %v4597_v50  ;;  %p3653_p11 = scmp.ne.s32.totalorder %s2837_s6, %s3652_s18  ;;  %p3658_p13 = scmp.lt.s32.totalorder %s3652_s18, %s3652_s18 }
 0x4b0   :  { %v1750_v33 = vpop.xlane.xlu0 %1749  ;;  %v1748_v6 = vpop.xlane.xlu1 %1747 }
 0x4b1   :  { %3406 = vrsqrt.f32 %v1833_v26  ;;  %v1803_v23 = vmul.f32 0.03125, %v1750_v33  ;;  %v1802_v25 = vmul.f32 0.03125, %v1748_v6  ;;  %v1927_v60 = vmul.f32 %v4822_v31, %v1889_v45  ;;  %p3659_p0 = por %p3658_p13, %p3657_p12 }
 0x4b2   :  { %v3395_v53 = vpop.eup %3394  ;;  %3408 = vrsqrt.f32 %v1832_v51 }
 0x4b3   :  { %v3397_v1 = vpop.eup %3396  ;;  %v1835_v35 = vadd.f32 1e-06, %v1803_v23  ;;  %v1834_v52 = vadd.f32 1e-06, %v1802_v25  ;;  %v1891_v59 = vmul.f32 %v3395_v53, %v4605_v2  ;;  %v1965_v2 = vadd.f32 %v4829_v55, %v1927_v60  ;;  %p3660_p1 = pnand %p3659_p0, %p3653_p11 }
 0x4b4   :  { %v1754_v40 = vpop.xlane.xlu0 %1753  ;;  %v1752_v50 = vpop.xlane.xlu1 %1751  ;;  %v1890_v46 = vmul.f32 %v3397_v1, %v4609_v27 }
 0x4b5   :  { %3410 = vrsqrt.f32 %v1835_v35  ;;  %v1805_v20 = vmul.f32 0.03125, %v1754_v40  ;;  %v1804_v29 = vmul.f32 0.03125, %v1752_v50  ;;  %v1929_v27 = vmul.f32 %v4822_v31, %v1891_v59 }
 0x4b6   :  { %v3399_v26 = vpop.eup %3398  ;;  %3412 = vrsqrt.f32 %v1834_v52  ;;  %v1928_v51 = vmul.f32 %v4822_v31, %v1890_v46 }
 0x4b7   :  { %v3401_v33 = vpop.eup %3400  ;;  %v1837_v45 = vadd.f32 1e-06, %v1805_v20  ;;  %v1836_v6 = vadd.f32 1e-06, %v1804_v29  ;;  %v1893_v1 = vmul.f32 %v3399_v26, %v4623_v39  ;;  %v1967_v59 = vadd.f32 %v4829_v55, %v1929_v27 }
 0x4b8   :  { %v1892_v23 = vmul.f32 %v3401_v33, %v4619_v61  ;;  %v1758_v25 = vpop.xlane.xlu0 %1757  ;;  %v1756_v53 = vpop.xlane.xlu1 %1755  ;;  %v1966_v43 = vadd.f32 %v4829_v55, %v1928_v51 }
 0x4b9   :  { %3414 = vrsqrt.f32 %v1837_v45  ;;  %v1807_v35 = vmul.f32 0.03125, %v1758_v25  ;;  %v1806_v52 = vmul.f32 0.03125, %v1756_v53  ;;  %v1931_v45 = vmul.f32 %v4822_v31, %v1893_v1 }
 0x4ba   :  { %v3403_v40 = vpop.eup %3402  ;;  %3416 = vrsqrt.f32 %v1836_v6  ;;  %v1997_v50 = vpack.c.bf16 %v1966_v43, %v1965_v2  ;;  %v1930_v46 = vmul.f32 %v4822_v31, %v1892_v23 }
 0x4bb   :  { %v3405_v20 = vpop.eup %3404  ;;  %v1839_v60 = vadd.f32 1e-06, %v1807_v35  ;;  %v1838_v29 = vadd.f32 1e-06, %v1806_v52  ;;  %v1895_v61 = vmul.f32 %v3403_v40, %v4633_v7 }
 0x4bc   :  { %3142 = vmatprep.mubr.bf16.mxu0 %v1997_v50  ;;  %v1762_v33 = vpop.xlane.xlu0 %1761  ;;  %v1760_v51 = vpop.xlane.xlu1 %1759  ;;  %v1968_v39 = vadd.f32 %v4829_v55, %v1930_v46  ;;  %v1894_v26 = vmul.f32 %v3405_v20, %v4637_v19  ;;  %v1969_v19 = vadd.f32 %v4829_v55, %v1931_v45 }
 0x4bd   :  { %3418 = vrsqrt.f32 %v1839_v60  ;;  %v1809_v43 = vmul.f32 0.03125, %v1762_v33  ;;  %v1808_v6 = vmul.f32 0.03125, %v1760_v51  ;;  %v1933_v52 = vmul.f32 %v4822_v31, %v1895_v61 }
 0x4be   :  { %v3407_v2 = vpop.eup %3406  ;;  %3420 = vrsqrt.f32 %v1838_v29  ;;  %v1998_v23 = vpack.c.bf16 %v1968_v39, %v1967_v59  ;;  %v1932_v25 = vmul.f32 %v4822_v31, %v1894_v26 }
 0x4bf   :  { %v3409_v7 = vpop.eup %3408  ;;  %v1841_v53 = vadd.f32 1e-06, %v1809_v43  ;;  %v1840_v35 = vadd.f32 1e-06, %v1808_v6  ;;  %v1897_v46 = vmul.f32 %v3407_v2, %v4651_v14  ;;  %v1971_v26 = vadd.f32 %v4829_v55, %v1933_v52 }
 0x4c0   :  { %3143 = vmatmul.mubr.bf16.vlgmr.msra.gmra.mxu0 %v1998_v23  ;;  %v1766_v27 = vpop.xlane.xlu0 %1765  ;;  %v1764_v40 = vpop.xlane.xlu1 %1763  ;;  %v1970_v1 = vadd.f32 %v4829_v55, %v1932_v25  ;;  %v1896_v50 = vmul.f32 %v3409_v7, %v4647_v56 }
 0x4c1   :  { %3422 = vrsqrt.f32 %v1841_v53  ;;  %v1811_v20 = vmul.f32 0.03125, %v1766_v27  ;;  %v1810_v60 = vmul.f32 0.03125, %v1764_v40  ;;  %v1935_v6 = vmul.f32 %v4822_v31, %v1897_v46 }
 0x4c2   :  { %v3411_v29 = vpop.eup %3410  ;;  %3424 = vrsqrt.f32 %v1840_v35  ;;  %v1999_v33 = vpack.c.bf16 %v1970_v1, %v1969_v19  ;;  %v1934_v51 = vmul.f32 %v4822_v31, %v1896_v50 }
 0x4c3   :  { %v3413_v61 = vpop.eup %3412  ;;  %v1843_v59 = vadd.f32 1e-06, %v1811_v20  ;;  %v1842_v39 = vadd.f32 1e-06, %v1810_v60  ;;  %v1899_v2 = vmul.f32 %v3411_v29, %v4661_v11  ;;  %v1973_v50 = vadd.f32 %v4829_v55, %v1935_v6 }
 0x4c4   :  { %3146 = vmatprep.mubr.bf16.mxu0 %v1999_v33  ;;  %v1770_v45 = vpop.xlane.xlu0 %1769  ;;  %v1768_v43 = vpop.xlane.xlu1 %1767  ;;  %v1972_v56 = vadd.f32 %v4829_v55, %v1934_v51  ;;  %v1898_v14 = vmul.f32 %v3413_v61, %v4665_v0 }
 0x4c5   :  { %3426 = vrsqrt.f32 %v1843_v59  ;;  %v1813_v23 = vmul.f32 0.03125, %v1770_v45  ;;  %v1812_v25 = vmul.f32 0.03125, %v1768_v43  ;;  %v1937_v20 = vmul.f32 %v4822_v31, %v1899_v2 }
 0x4c6   :  { %v3415_v7 = vpop.eup %3414  ;;  %3428 = vrsqrt.f32 %v1842_v39  ;;  %v2000_v53 = vpack.c.bf16 %v1972_v56, %v1971_v26  ;;  %v1936_v35 = vmul.f32 %v4822_v31, %v1898_v14 }
 0x4c7   :  { %v3417_v52 = vpop.eup %3416  ;;  %v1845_v27 = vadd.f32 1e-06, %v1813_v23  ;;  %v1844_v40 = vadd.f32 1e-06, %v1812_v25  ;;  %v1901_v19 = vmul.f32 %v3415_v7, %v4679_v30 }
 0x4c8   :  { %3147 = vmatmul.mubr.bf16.gmra.mxu0 %v2000_v53  ;;  %v1774_v1 = vpop.xlane.xlu0 %1773  ;;  %v1772_v0 = vpop.xlane.xlu1 %1771  ;;  %v1974_v11 = vadd.f32 %v4829_v55, %v1936_v35  ;;  %v1900_v46 = vmul.f32 %v3417_v52, %v4675_v4  ;;  %v1975_v4 = vadd.f32 %v4829_v55, %v1937_v20 }
 0x4c9   :  { %3430 = vrsqrt.f32 %v1845_v27  ;;  %v1815_v60 = vmul.f32 0.03125, %v1774_v1  ;;  %v1814_v29 = vmul.f32 0.03125, %v1772_v0  ;;  %v1939_v26 = vmul.f32 %v4822_v31, %v1901_v19 }
 0x4ca   :  { %v3419_v33 = vpop.eup %3418  ;;  %3432 = vrsqrt.f32 %v1844_v40  ;;  %v2001_v51 = vpack.c.bf16 %v1974_v11, %v1973_v50  ;;  %v1938_v61 = vmul.f32 %v4822_v31, %v1900_v46 }
 0x4cb   :  { %v3421_v30 = vpop.eup %3420  ;;  %v1847_v59 = vadd.f32 1e-06, %v1815_v60  ;;  %v1846_v39 = vadd.f32 1e-06, %v1814_v29  ;;  %v1903_v6 = vmul.f32 %v3419_v33, %v4689_v63  ;;  %v1977_v40 = vadd.f32 %v4829_v55, %v1939_v26 }
 0x4cc   :  { %3150 = vmatprep.mubr.bf16.mxu0 %v2001_v51  ;;  %v1778_v45 = vpop.xlane.xlu0 %1777  ;;  %v1776_v43 = vpop.xlane.xlu1 %1775  ;;  %v1976_v56 = vadd.f32 %v4829_v55, %v1938_v61  ;;  %v1902_v14 = vmul.f32 %v3421_v30, %v4693_v9 }
 0x4cd   :  { %3434 = vrsqrt.f32 %v1847_v59  ;;  %v1817_v2 = vmul.f32 0.03125, %v1778_v45  ;;  %v1816_v23 = vmul.f32 0.03125, %v1776_v43  ;;  %v1941_v0 = vmul.f32 %v4822_v31, %v1903_v6 }
 0x4ce   :  { %v3423_v25 = vpop.eup %3422  ;;  %3436 = vrsqrt.f32 %v1846_v39  ;;  %v2002_v7 = vpack.c.bf16 %v1976_v56, %v1975_v4  ;;  %v1940_v53 = vmul.f32 %v4822_v31, %v1902_v14 }
 0x4cf   :  { %v3425_v35 = vpop.eup %3424  ;;  %v1849_v52 = vadd.f32 1e-06, %v1817_v2  ;;  %v1848_v27 = vadd.f32 1e-06, %v1816_v23  ;;  %v1905_v50 = vmul.f32 %v3423_v25, %v4703_v58  ;;  %v1979_v39 = vadd.f32 %v4829_v55, %v1941_v0 }
 0x4d0   :  { %3151 = vmatmul.mubr.bf16.gmra.mxu0 %v2002_v7  ;;  %v1782_v19 = vpop.xlane.xlu0 %1781  ;;  %v1780_v1 = vpop.xlane.xlu1 %1779  ;;  %v1978_v9 = vadd.f32 %v4829_v55, %v1940_v53  ;;  %v1904_v63 = vmul.f32 %v3425_v35, %v4707_v57 }
 0x4d1   :  { %3438 = vrsqrt.f32 %v1849_v52  ;;  %v1819_v11 = vmul.f32 0.03125, %v1782_v19  ;;  %v1818_v46 = vmul.f32 0.03125, %v1780_v1  ;;  %v1943_v45 = vmul.f32 %v4822_v31, %v1905_v50 }
 0x4d2   :  { %v3427_v20 = vpop.eup %3426  ;;  %3440 = vrsqrt.f32 %v1848_v27  ;;  %v2003_v60 = vpack.c.bf16 %v1978_v9, %v1977_v40  ;;  %v1942_v29 = vmul.f32 %v4822_v31, %v1904_v63 }
 0x4d3   :  { %v3429_v33 = vpop.eup %3428  ;;  %v1851_v51 = vadd.f32 1e-06, %v1819_v11  ;;  %v1850_v61 = vadd.f32 1e-06, %v1818_v46  ;;  %v1907_v30 = vmul.f32 %v3427_v20, %v4717_v17 }
 0x4d4   :  { %3154 = vmatprep.mubr.bf16.mxu0 %v2003_v60  ;;  %v1786_v59 = vpop.xlane.xlu0 %1785  ;;  %v1784_v57 = vpop.xlane.xlu1 %1783  ;;  %v1980_v58 = vadd.f32 %v4829_v55, %v1942_v29  ;;  %v1906_v26 = vmul.f32 %v3429_v33, %v4721_v3  ;;  %v1981_v3 = vadd.f32 %v4829_v55, %v1943_v45 }
 0x4d5   :  { %3442 = vrsqrt.f32 %v1851_v51  ;;  %v1821_v43 = vmul.f32 0.03125, %v1786_v59  ;;  %v1820_v4 = vmul.f32 0.03125, %v1784_v57  ;;  %v1945_v25 = vmul.f32 %v4822_v31, %v1907_v30 }
 0x4d6   :  { %v3431_v56 = vpop.eup %3430  ;;  %3444 = vrsqrt.f32 %v1850_v61  ;;  %v2004_v14 = vpack.c.bf16 %v1980_v58, %v1979_v39  ;;  %v1944_v6 = vmul.f32 %v4822_v31, %v1906_v26 }
 0x4d7   :  { %v3433_v17 = vpop.eup %3432  ;;  %v1853_v2 = vadd.f32 1e-06, %v1821_v43  ;;  %v1852_v23 = vadd.f32 1e-06, %v1820_v4  ;;  %v1909_v27 = vmul.f32 %v3431_v56, %v4731_v5  ;;  %v1983_v46 = vadd.f32 %v4829_v55, %v1945_v25 }
 0x4d8   :  { %3155 = vmatmul.mubr.bf16.gmra.mxu0 %v2004_v14  ;;  %v1790_v7 = vpop.xlane.xlu0 %1789  ;;  %v1788_v53 = vpop.xlane.xlu1 %1787  ;;  %v1982_v35 = vadd.f32 %v4829_v55, %v1944_v6  ;;  %v1908_v52 = vmul.f32 %v3433_v17, %v4735_v62 }
 0x4d9   :  { %3446 = vrsqrt.f32 %v1853_v2  ;;  %v1823_v40 = vmul.f32 0.03125, %v1790_v7  ;;  %v1822_v19 = vmul.f32 0.03125, %v1788_v53  ;;  %v1947_v5 = vmul.f32 %v4822_v31, %v1909_v27 }
 0x4da   :  { %v3435_v1 = vpop.eup %3434  ;;  %3448 = vrsqrt.f32 %v1852_v23  ;;  %v2005_v9 = vpack.c.bf16 %v1982_v35, %v1981_v3  ;;  %v1946_v63 = vmul.f32 %v4822_v31, %v1908_v52 }
 0x4db   :  { %v3437_v0 = vpop.eup %3436  ;;  %v1855_v50 = vadd.f32 1e-06, %v1823_v40  ;;  %v1854_v11 = vadd.f32 1e-06, %v1822_v19  ;;  %v1911_v29 = vmul.f32 %v3435_v1, %v4745_v38  ;;  %v1985_v58 = vadd.f32 %v4829_v55, %v1947_v5 }
 0x4dc   :  { %3158 = vmatprep.mubr.bf16.mxu0 %v2005_v9  ;;  %v1792_v20 = vpop.xlane.xlu1 %1791  ;;  %v1984_v60 = vadd.f32 %v4829_v55, %v1946_v63  ;;  %v1910_v62 = vmul.f32 %v3437_v0, %v4749_v54 }
 0x4dd   :  { %3450 = vrsqrt.f32 %v1855_v50  ;;  %v1824_v33 = vmul.f32 0.03125, %v1792_v20  ;;  %v1949_v38 = vmul.f32 %v4822_v31, %v1911_v29 }
 0x4de   :  { %v3439_v51 = vpop.eup %3438  ;;  %3452 = vrsqrt.f32 %v1854_v11  ;;  %v2006_v61 = vpack.c.bf16 %v1984_v60, %v1983_v46  ;;  %v1948_v30 = vmul.f32 %v4822_v31, %v1910_v62 }
 0x4df   :  { %v3441_v59 = vpop.eup %3440  ;;  %v1856_v57 = vadd.f32 1e-06, %v1824_v33  ;;  %v1913_v39 = vmul.f32 %v3439_v51, %v4759_v49  ;;  %v1987_v49 = vadd.f32 %v4829_v55, %v1949_v38  ;;  %v3256_v51 = vld [vmem:[#allocation10 + $0x38] sm:$0xff]  }
 0x4e0   :  { %3159 = vmatmul.mubr.bf16.gmra.mxu0 %v2006_v61  ;;  %v1986_v54 = vadd.f32 %v4829_v55, %v1948_v30  ;;  %v1912_v26 = vmul.f32 %v3441_v59, %v4763_v18  ;;  %3174 = vmatprep.subr.bf16.mxu1 %v3256_v51  ;;  %v3258_v61 = vld [vmem:[#allocation10 + $0x28] sm:$0xff]   ;;  %v3259_v30 = vld [vmem:[#allocation10 + $0x20] sm:$0xff]   ;;  %v3261_v59 = vld [vmem:[#allocation10 + $0x10] sm:$0xff]  }
 0x4e1   :  { %3454 = vrsqrt.f32 %v1856_v57  ;;  %v1951_v14 = vmul.f32 %v4822_v31, %v1913_v39  ;;  %3175 = vmatpush3.bf16.msra.mxu1 %v3256_v51  ;;  %v3263_v57 = vld [vmem:[#allocation10] sm:$0xff]  }
 0x4e2   :  { %v3443_v45 = vpop.eup %3442  ;;  %v2007_v43 = vpack.c.bf16 %v1986_v54, %v1985_v58  ;;  %v1950_v4 = vmul.f32 %v4822_v31, %v1912_v26 }
 0x4e3   :  { %v3445_v56 = vpop.eup %3444  ;;  %v1915_v2 = vmul.f32 %v3443_v45, %v4773_v16  ;;  %v1989_v53 = vadd.f32 %v4829_v55, %v1951_v14 }
 0x4e4   :  { %3162 = vmatprep.mubr.bf16.mxu0 %v2007_v43  ;;  %v1988_v6 = vadd.f32 %v4829_v55, %v1950_v4  ;;  %v1914_v17 = vmul.f32 %v3445_v56, %v4777_v37 }
 0x4e5   :  { %v1953_v52 = vmul.f32 %v4822_v31, %v1915_v2 }
 0x4e6   :  { %v3447_v18 = vpop.eup %3446  ;;  %v2008_v23 = vpack.c.bf16 %v1988_v6, %v1987_v49  ;;  %v1952_v25 = vmul.f32 %v4822_v31, %v1914_v17 }
 0x4e7   :  { %v3449_v7 = vpop.eup %3448  ;;  %v1917_v27 = vmul.f32 %v3447_v18, %v4787_v15  ;;  %v1991_v9 = vadd.f32 %v4829_v55, %v1953_v52 }
 0x4e8   :  { %3163 = vmatmul.mubr.bf16.gmra.mxu0 %v2008_v23  ;;  %v1990_v3 = vadd.f32 %v4829_v55, %v1952_v25  ;;  %v1916_v35 = vmul.f32 %v3449_v7, %v4791_v32 }
 0x4e9   :  { %v1955_v32 = vmul.f32 %v4822_v31, %v1917_v27 }
 0x4ea   :  { %v3451_v40 = vpop.eup %3450  ;;  %v2009_v37 = vpack.c.bf16 %v1990_v3, %v1989_v53  ;;  %v1954_v16 = vmul.f32 %v4822_v31, %v1916_v35 }
 0x4eb   :  { %v3453_v19 = vpop.eup %3452  ;;  %v1919_v1 = vmul.f32 %v3451_v40, %v4801_v48  ;;  %v1993_v48 = vadd.f32 %v4829_v55, %v1955_v32 }
 0x4ec   :  { %3166 = vmatprep.mubr.bf16.mxu0 %v2009_v37  ;;  %v1992_v63 = vadd.f32 %v4829_v55, %v1954_v16  ;;  %v1918_v0 = vmul.f32 %v3453_v19, %v4805_v44 }
 0x4ed   :  { %v1957_v20 = vmul.f32 %v4822_v31, %v1919_v1 }
 0x4ee   :  { %v3455_v50 = vpop.eup %3454  ;;  %v2010_v11 = vpack.c.bf16 %v1992_v63, %v1991_v9  ;;  %v1956_v15 = vmul.f32 %v4822_v31, %v1918_v0 }
 0x4ef   :  { %v1920_v46 = vmul.f32 %v3455_v50, %v4814_v42  ;;  %v1995_v44 = vadd.f32 %v4829_v55, %v1957_v20  ;;  %v3257_v42 = vld [vmem:[#allocation10 + $0x30] sm:$0xff]  }
 0x4f0   :  { %3167 = vmatmul.mubr.bf16.gmra.mxu0 %v2010_v11  ;;  %v1994_v60 = vadd.f32 %v4829_v55, %v1956_v15  ;;  %3176 = vmatprep.subr.bf16.mxu1 %v3257_v42 }
 0x4f1   :  { %v1958_v62 = vmul.f32 %v4822_v31, %v1920_v46  ;;  %3177 = vmatpush3.bf16.msra.mxu1 %v3257_v42  ;;  %v3260_v31 = vld [vmem:[#allocation10 + $0x18] sm:$0xff]  }
 0x4f2   :  { %v2011_v5 = vpack.c.bf16 %v1994_v60, %v1993_v48  ;;  %3178 = vmatprep.subr.bf16.mxu1 %v3258_v61 }
 0x4f3   :  { %v1996_v29 = vadd.f32 %v4829_v55, %v1958_v62  ;;  %v3262_v55 = vld [vmem:[#allocation10 + $0x8] sm:$0xff]  }
 0x4f4   :  { %3170 = vmatprep.mubr.bf16.mxu0 %v2011_v5 }
 0x4f5   :  { %v2012_v33 = vpack.c.bf16 %v1996_v29, %v1995_v44  ;;  %3179 = vmatpush3.bf16.msra.mxu1 %v3258_v61 }
 0x4f6   :  { %3180 = vmatprep.subr.bf16.mxu1 %v3259_v30 }
 0x4f8   :  { %3171 = vmatmul.mubr.bf16.gmra.mxu0 %v2012_v33 }
 0x4f9   :  { %3181 = vmatpush3.bf16.msra.mxu1 %v3259_v30 }
 0x4fa   :  { %3182 = vmatprep.subr.bf16.mxu1 %v3260_v31 }
 0x4fd   :  { %3183 = vmatpush3.bf16.msra.mxu1 %v3260_v31 }
 0x4fe   :  { %3184 = vmatprep.subr.bf16.mxu1 %v3261_v59 }
 0x501   :  { %3185 = vmatpush3.bf16.msra.mxu1 %v3261_v59 }
 0x502   :  { %3186 = vmatprep.subr.bf16.mxu1 %v3262_v55 }
 0x505   :  { %3187 = vmatpush3.bf16.msra.mxu1 %v3262_v55 }
 0x506   :  { %3188 = vmatprep.subr.bf16.mxu1 %v3263_v57 }
 0x509   :  { %3189 = vmatpush3.bf16.msra.mxu1 %v3263_v57 }
 0x580   :  { %v4924_v39 = vpop.f32.mrf.mxu0 }
 0x581   :  { %v2240_v58 = vmul.f32 %v4924_v39, %v4924_v39 }
 0x582   :  { %v4928_v54 = vpop.f32.mrf.mxu0 }
 0x583   :  { %v2272_v26 = vmul.f32 %v4924_v39, %v2240_v58  ;;  %v2238_v38 = vmul.f32 %v4928_v54, %v4928_v54 }
 0x584   :  { %v4933_v45 = vpop.f32.mrf.mxu0 }
 0x585   :  { %v2304_v43 = vmul.f32 0.044715, %v2272_v26  ;;  %v2270_v4 = vmul.f32 %v2238_v38, %v4928_v54  ;;  %v2241_v56 = vmul.f32 %v4933_v45, %v4933_v45 }
 0x586   :  { %v4938_v14 = vpop.f32.mrf.mxu0 }
 0x587   :  { %v2336_v49 = vadd.f32 %v4924_v39, %v2304_v43  ;;  %v2302_v6 = vmul.f32 0.044715, %v2270_v4  ;;  %v2273_v17 = vmul.f32 %v4933_v45, %v2241_v56  ;;  %v2239_v2 = vmul.f32 %v4938_v14, %v4938_v14 }
 0x588   :  { %v4944_v18 = vpop.f32.mrf.mxu0 }
 0x589   :  { %v2368_v23 = vmul.f32 0.7978846, %v2336_v49  ;;  %v2334_v25 = vadd.f32 %v2302_v6, %v4928_v54  ;;  %v2305_v7 = vmul.f32 0.044715, %v2273_v17  ;;  %v2271_v53 = vmul.f32 %v2239_v2, %v4938_v14 }
 0x58a   :  { %v2244_v3 = vmul.f32 %v4944_v18, %v4944_v18  ;;  %v4950_v35 = vpop.f32.mrf.mxu0 }
 0x58b   :  { %v2366_v52 = vmul.f32 0.7978846, %v2334_v25  ;;  %v2337_v27 = vadd.f32 %v4933_v45, %v2305_v7  ;;  %v2303_v40 = vmul.f32 0.044715, %v2271_v53  ;;  %v2242_v16 = vmul.f32 %v4950_v35, %v4950_v35 }
 0x58c   :  { %v2276_v37 = vmul.f32 %v4944_v18, %v2244_v3  ;;  %v4956_v19 = vpop.f32.mrf.mxu0  ;;  %3456 = vtanh.f32 %v2368_v23 }
 0x58d   :  { %v2369_v1 = vmul.f32 0.7978846, %v2337_v27  ;;  %v2335_v9 = vadd.f32 %v2303_v40, %v4938_v14  ;;  %v2245_v63 = vmul.f32 %v4956_v19, %v4956_v19  ;;  %3458 = vtanh.f32 %v2366_v52 }
 0x58e   :  { %v2308_v0 = vmul.f32 0.044715, %v2276_v37  ;;  %v2274_v32 = vmul.f32 %v2242_v16, %v4950_v35  ;;  %v4962_v50 = vpop.f32.mrf.mxu0 }
 0x58f   :  { %3460 = vtanh.f32 %v2369_v1  ;;  %v2367_v11 = vmul.f32 0.7978846, %v2335_v9  ;;  %v2277_v15 = vmul.f32 %v4956_v19, %v2245_v63  ;;  %v2243_v46 = vmul.f32 %v4962_v50, %v4962_v50 }
 0x590   :  { %v2340_v20 = vadd.f32 %v4944_v18, %v2308_v0  ;;  %v2306_v48 = vmul.f32 0.044715, %v2274_v32  ;;  %v4968_v60 = vpop.f32.mrf.mxu0 }
 0x591   :  { %3462 = vtanh.f32 %v2367_v11  ;;  %v2309_v62 = vmul.f32 0.044715, %v2277_v15  ;;  %v2275_v5 = vmul.f32 %v2243_v46, %v4962_v50  ;;  %v2248_v44 = vmul.f32 %v4968_v60, %v4968_v60 }
 0x592   :  { %v2372_v29 = vmul.f32 0.7978846, %v2340_v20  ;;  %v2338_v33 = vadd.f32 %v2306_v48, %v4950_v35  ;;  %v4974_v51 = vpop.f32.mrf.mxu0 }
 0x593   :  { %v2341_v42 = vadd.f32 %v4956_v19, %v2309_v62  ;;  %v2307_v61 = vmul.f32 0.044715, %v2275_v5  ;;  %v2280_v30 = vmul.f32 %v4968_v60, %v2248_v44  ;;  %v2246_v31 = vmul.f32 %v4974_v51, %v4974_v51 }
 0x594   :  { %3464 = vtanh.f32 %v2372_v29  ;;  %v2370_v59 = vmul.f32 0.7978846, %v2338_v33  ;;  %v4980_v55 = vpop.f32.mrf.mxu0 }
 0x595   :  { %v2373_v57 = vmul.f32 0.7978846, %v2341_v42  ;;  %v2339_v58 = vadd.f32 %v2307_v61, %v4962_v50  ;;  %v2312_v26 = vmul.f32 0.044715, %v2280_v30  ;;  %v2278_v38 = vmul.f32 %v2246_v31, %v4974_v51 }
 0x596   :  { %v2249_v43 = vmul.f32 %v4980_v55, %v4980_v55  ;;  %v4986_v4 = vpop.f32.mrf.mxu0  ;;  %3466 = vtanh.f32 %v2370_v59 }
 0x597   :  { %v2371_v56 = vmul.f32 0.7978846, %v2339_v58  ;;  %v2344_v49 = vadd.f32 %v4968_v60, %v2312_v26  ;;  %v2310_v6 = vmul.f32 0.044715, %v2278_v38  ;;  %v2247_v2 = vmul.f32 %v4986_v4, %v4986_v4 }
 0x598   :  { %v2281_v17 = vmul.f32 %v4980_v55, %v2249_v43  ;;  %v4992_v23 = vpop.f32.mrf.mxu0  ;;  %3468 = vtanh.f32 %v2373_v57 }
 0x599   :  { %v2376_v25 = vmul.f32 0.7978846, %v2344_v49  ;;  %v2342_v7 = vadd.f32 %v2310_v6, %v4974_v51  ;;  %v3457_v53 = vpop.eup %3456  ;;  %3470 = vtanh.f32 %v2371_v56  ;;  %v2279_v52 = vmul.f32 %v2247_v2, %v4986_v4 }
 0x59a   :  { %v2313_v3 = vmul.f32 0.044715, %v2281_v17  ;;  %v2252_v27 = vmul.f32 %v4992_v23, %v4992_v23  ;;  %v4998_v40 = vpop.f32.mrf.mxu0  ;;  %v3459_v37 = vpop.eup %3458  ;;  %v2432_v15 = vadd.f32 1.0, %v3457_v53 }
 0x59b   :  { %3472 = vtanh.f32 %v2376_v25  ;;  %v2374_v16 = vmul.f32 0.7978846, %v2342_v7  ;;  %v2311_v63 = vmul.f32 0.044715, %v2279_v52  ;;  %v2250_v32 = vmul.f32 %v4998_v40, %v4998_v40 }
 0x59c   :  { %v3461_v1 = vpop.eup %3460  ;;  %v2345_v9 = vadd.f32 %v4980_v55, %v2313_v3  ;;  %v2284_v0 = vmul.f32 %v4992_v23, %v2252_v27  ;;  %v5004_v11 = vpop.f32.mrf.mxu0  ;;  %v2430_v29 = vadd.f32 1.0, %v3459_v37  ;;  %v2464_v43 = vmul.f32 0.5, %v2432_v15 }
 0x59d   :  { %3474 = vtanh.f32 %v2374_v16  ;;  %v2343_v48 = vadd.f32 %v2311_v63, %v4986_v4  ;;  %v2282_v5 = vmul.f32 %v2250_v32, %v4998_v40  ;;  %v2433_v33 = vadd.f32 1.0, %v3461_v1 }
 0x59e   :  { %v3463_v46 = vpop.eup %3462  ;;  %v2377_v20 = vmul.f32 0.7978846, %v2345_v9  ;;  %v2316_v62 = vmul.f32 0.044715, %v2284_v0  ;;  %v5008_v44 = vpop.f32.mrf.mxu0  ;;  %v2253_v42 = vmul.f32 %v5004_v11, %v5004_v11  ;;  %v2462_v6 = vmul.f32 0.5, %v2430_v29 }
 0x59f   :  { %v2431_v61 = vadd.f32 1.0, %v3463_v46  ;;  %v2375_v30 = vmul.f32 0.7978846, %v2343_v48  ;;  %v2314_v59 = vmul.f32 0.044715, %v2282_v5  ;;  %v2251_v38 = vmul.f32 %v5008_v44, %v5008_v44 }
 0x5a0   :  { %v2348_v31 = vadd.f32 %v4992_v23, %v2316_v62  ;;  %v5013_v57 = vpop.f32.mrf.mxu0  ;;  %3476 = vtanh.f32 %v2377_v20  ;;  %v2285_v26 = vmul.f32 %v5004_v11, %v2253_v42  ;;  %v2465_v7 = vmul.f32 0.5, %v2433_v33 }
 0x5a1   :  { %v3465_v58 = vpop.eup %3464  ;;  %3478 = vtanh.f32 %v2375_v30  ;;  %v2346_v56 = vadd.f32 %v2314_v59, %v4998_v40  ;;  %v2283_v2 = vmul.f32 %v2251_v38, %v5008_v44  ;;  %v2463_v53 = vmul.f32 0.5, %v2431_v61 }
 0x5a2   :  { %v5019_v49 = vpop.f32.mrf.mxu0  ;;  %v2317_v17 = vmul.f32 0.044715, %v2285_v26  ;;  %v2436_v3 = vadd.f32 1.0, %v3465_v58  ;;  %v2380_v52 = vmul.f32 0.7978846, %v2348_v31  ;;  %v2256_v9 = vmul.f32 %v5013_v57, %v5013_v57 }
 0x5a3   :  { %v3467_v25 = vpop.eup %3466  ;;  %v2378_v37 = vmul.f32 0.7978846, %v2346_v56  ;;  %v2315_v1 = vmul.f32 0.044715, %v2283_v2  ;;  %v2496_v0 = vmul.f32 %v4924_v39, %v2464_v43  ;;  %v2254_v32 = vmul.f32 %v5019_v49, %v5019_v49 }
 0x5a4   :  { %v5022_v27 = vpop.f32.mrf.mxu0  ;;  %v2349_v16 = vadd.f32 %v5004_v11, %v2317_v17  ;;  %v2494_v20 = vmul.f32 %v2462_v6, %v4928_v54  ;;  %v2434_v48 = vadd.f32 1.0, %v3467_v25  ;;  %3480 = vtanh.f32 %v2380_v52 }
 0x5a5   :  { %v3469_v63 = vpop.eup %3468  ;;  %v2347_v5 = vadd.f32 %v2315_v1, %v5008_v44  ;;  %v2288_v33 = vmul.f32 %v5013_v57, %v2256_v9  ;;  %v2286_v42 = vmul.f32 %v2254_v32, %v5019_v49  ;;  %v2257_v39 = vmul.f32 %v5022_v27, %v5022_v27 }
 0x5a6   :  { %v5030_v15 = vpop.f32.mrf.mxu0  ;;  %v3471_v46 = vpop.eup %3470  ;;  %v2381_v62 = vmul.f32 0.7978846, %v2349_v16  ;;  %v2497_v30 = vmul.f32 %v4933_v45, %v2465_v7  ;;  %v2495_v31 = vmul.f32 %v2463_v53, %v4938_v14  ;;  %v2468_v54 = vmul.f32 0.5, %v2436_v3 }
 0x5a7   :  { %3482 = vtanh.f32 %v2378_v37  ;;  %v2435_v58 = vadd.f32 1.0, %v3471_v46  ;;  %v2379_v26 = vmul.f32 0.7978846, %v2347_v5  ;;  %v2318_v38 = vmul.f32 0.044715, %v2286_v42 }
 0x5a8   :  { %v3473_v29 = vpop.eup %3472  ;;  %v5038_v61 = vpop.f32.mrf.mxu0  ;;  %v2289_v43 = vmul.f32 %v5022_v27, %v2257_v39  ;;  %v2466_v6 = vmul.f32 0.5, %v2434_v48  ;;  %v2437_v17 = vadd.f32 1.0, %v3469_v63  ;;  %3484 = vtanh.f32 %v2381_v62 }
 0x5a9   :  { %v2255_v2 = vmul.f32 %v5030_v15, %v5030_v15  ;;  %3486 = vtanh.f32 %v2379_v26  ;;  %v2320_v45 = vmul.f32 0.044715, %v2288_v33  ;;  %v2350_v14 = vadd.f32 %v2318_v38, %v5019_v49 }
 0x5aa   :  { %v3475_v59 = vpop.eup %3474  ;;  %v5043_v56 = vpop.f32.mrf.mxu0  ;;  %v2321_v25 = vmul.f32 0.044715, %v2289_v43  ;;  %v2527_v53 = vpack.c.bf16 %v2497_v30, %v2496_v0  ;;  %v5051_v3 = vmul.f32 %v4944_v18, %v2468_v54  ;;  %v2526_v37 = vpack.c.bf16 %v2495_v31, %v2494_v20 }
 0x5ab   :  { %v2287_v52 = vmul.f32 %v2255_v2, %v5030_v15  ;;  %v2467_v1 = vmul.f32 0.5, %v2435_v58  ;;  %v2440_v9 = vadd.f32 1.0, %v3473_v29  ;;  %v2438_v63 = vadd.f32 1.0, %v3475_v59 }
 0x5ac   :  { %v5048_v7 = vpop.f32.mrf.mxu0  ;;  %v2382_v32 = vmul.f32 0.7978846, %v2350_v14  ;;  %v2353_v62 = vadd.f32 %v5022_v27, %v2321_v25  ;;  %3190 = vmatprep.mubr.bf16.mxu1 %v2526_v37  ;;  %v2260_v0 = vmul.f32 %v5038_v61, %v5038_v61  ;;  %v2258_v18 = vmul.f32 %v5043_v56, %v5043_v56 }
 0x5ad   :  { %v3477_v16 = vpop.eup %3476  ;;  %v2319_v5 = vmul.f32 0.044715, %v2287_v52  ;;  %v2498_v20 = vmul.f32 %v2466_v6, %v4950_v35  ;;  %v2469_v33 = vmul.f32 0.5, %v2437_v17  ;;  %v2352_v29 = vadd.f32 %v5013_v57, %v2320_v45  ;;  %3191 = vmatmul.mubr.bf16.vlgmr.msra.gmra.mxu1 %v2527_v53 }
 0x5ae   :  { %v5054_v46 = vpop.f32.mrf.mxu0  ;;  %v3479_v48 = vpop.eup %3478  ;;  %3488 = vtanh.f32 %v2382_v32  ;;  %v2292_v31 = vmul.f32 %v5038_v61, %v2260_v0  ;;  %v2290_v54 = vmul.f32 %v2258_v18, %v5043_v56  ;;  %v2499_v59 = vmul.f32 %v2467_v1, %v4962_v50 }
 0x5af   :  { %v2439_v42 = vadd.f32 1.0, %v3479_v48  ;;  %v2351_v30 = vadd.f32 %v2319_v5, %v5030_v15  ;;  %v2472_v58 = vmul.f32 0.5, %v2440_v9  ;;  %v2470_v26 = vmul.f32 0.5, %v2438_v63 }
 0x5b0   :  { %v5063_v39 = vpop.f32.mrf.mxu0  ;;  %v2441_v38 = vadd.f32 1.0, %v3477_v16  ;;  %v2385_v43 = vmul.f32 0.7978846, %v2353_v62  ;;  %v2322_v17 = vmul.f32 0.044715, %v2290_v54  ;;  %v2261_v2 = vmul.f32 %v5048_v7, %v5048_v7 }
 0x5b1   :  { %v2383_v6 = vmul.f32 0.7978846, %v2351_v30  ;;  %v2501_v45 = vmul.f32 %v4956_v19, %v2469_v33  ;;  %v2471_v14 = vmul.f32 0.5, %v2439_v42  ;;  %v2384_v25 = vmul.f32 0.7978846, %v2352_v29  ;;  %v3481_v50 = vpop.eup %3480 }
 0x5b2   :  { %v5069_v35 = vpop.f32.mrf.mxu0  ;;  %v2259_v53 = vmul.f32 %v5054_v46, %v5054_v46  ;;  %v2324_v37 = vmul.f32 0.044715, %v2292_v31  ;;  %v2354_v16 = vadd.f32 %v2322_v17, %v5043_v56  ;;  %v2293_v1 = vmul.f32 %v5048_v7, %v2261_v2 }
 0x5b3   :  { %3490 = vtanh.f32 %v2383_v6  ;;  %v5081_v63 = vmul.f32 %v4968_v60, %v2472_v58  ;;  %v2502_v19 = vmul.f32 %v2470_v26, %v4974_v51  ;;  %v2528_v48 = vpack.c.bf16 %v2499_v59, %v2498_v20 }
 0x5b4   :  { %v5076_v52 = vpop.f32.mrf.mxu0  ;;  %v3483_v9 = vpop.eup %3482  ;;  %v2291_v32 = vmul.f32 %v2259_v53, %v5054_v46  ;;  %v2473_v5 = vmul.f32 0.5, %v2441_v38  ;;  %3492 = vtanh.f32 %v2385_v43  ;;  %v2386_v0 = vmul.f32 0.7978846, %v2354_v16 }
 0x5b5   :  { %v2264_v18 = vmul.f32 %v5063_v39, %v5063_v39  ;;  %v3485_v33 = vpop.eup %3484  ;;  %3494 = vtanh.f32 %v2384_v25  ;;  %v2325_v42 = vmul.f32 0.044715, %v2293_v1  ;;  %3194 = vmatprep.mubr.bf16.mxu1 %v2528_v48  ;;  %v2529_v60 = vpack.c.bf16 %v2501_v45, %v5051_v3 }
 0x5b6   :  { %v5085_v62 = vpop.f32.mrf.mxu0  ;;  %v2323_v29 = vmul.f32 0.044715, %v2291_v32  ;;  %v3487_v51 = vpop.eup %3486  ;;  %v2503_v20 = vmul.f32 %v2471_v14, %v4986_v4  ;;  %v2356_v31 = vadd.f32 %v5038_v61, %v2324_v37  ;;  %v2262_v59 = vmul.f32 %v5069_v35, %v5069_v35 }
 0x5b7   :  { %v2296_v54 = vmul.f32 %v5063_v39, %v2264_v18  ;;  %v2443_v58 = vadd.f32 1.0, %v3487_v51  ;;  %3496 = vtanh.f32 %v2386_v0  ;;  %v2357_v26 = vadd.f32 %v5048_v7, %v2325_v42  ;;  %3195 = vmatmul.mubr.bf16.gmra.mxu1 %v2529_v60 }
 0x5b8   :  { %v5090_v30 = vpop.f32.mrf.mxu0  ;;  %v2355_v38 = vadd.f32 %v2323_v29, %v5054_v46  ;;  %v2444_v3 = vadd.f32 1.0, %v3481_v50  ;;  %v2442_v43 = vadd.f32 1.0, %v3483_v9  ;;  %v2294_v6 = vmul.f32 %v2262_v59, %v5069_v35 }
 0x5b9   :  { %v2265_v4 = vmul.f32 %v5076_v52, %v5076_v52  ;;  %v2445_v2 = vadd.f32 1.0, %v3485_v33  ;;  %v2389_v45 = vmul.f32 0.7978846, %v2357_v26  ;;  %v2263_v25 = vmul.f32 %v5085_v62, %v5085_v62 }
 0x5ba   :  { %v5102_v17 = vpop.f32.mrf.mxu0  ;;  %v2387_v14 = vmul.f32 0.7978846, %v2355_v38  ;;  %v2388_v53 = vmul.f32 0.7978846, %v2356_v31  ;;  %v2326_v37 = vmul.f32 0.044715, %v2294_v6  ;;  %v2530_v1 = vpack.c.bf16 %v2503_v20, %v2502_v19 }
 0x5bb   :  { %v2297_v16 = vmul.f32 %v5076_v52, %v2265_v4  ;;  %v3489_v50 = vpop.eup %3488  ;;  %v2505_v9 = vmul.f32 %v4980_v55, %v2473_v5  ;;  %v2475_v32 = vmul.f32 0.5, %v2443_v58  ;;  %v2328_v48 = vmul.f32 0.044715, %v2296_v54 }
 0x5bc   :  { %v2295_v0 = vmul.f32 %v2263_v25, %v5085_v62  ;;  %v2476_v18 = vmul.f32 0.5, %v2444_v3  ;;  %v2474_v42 = vmul.f32 0.5, %v2442_v43  ;;  %3498 = vtanh.f32 %v2387_v14  ;;  %3198 = vmatprep.mubr.bf16.mxu1 %v2530_v1  ;;  %v5110_v29 = vpop.f32.mrf.mxu0 }
 0x5bd   :  { %v2358_v33 = vadd.f32 %v2326_v37, %v5069_v35  ;;  %v2446_v60 = vadd.f32 1.0, %v3489_v50  ;;  %3500 = vtanh.f32 %v2389_v45  ;;  %v2329_v51 = vmul.f32 0.044715, %v2297_v16 }
 0x5be   :  { %v2327_v31 = vmul.f32 0.044715, %v2295_v0  ;;  %v2477_v19 = vmul.f32 0.5, %v2445_v2  ;;  %3502 = vtanh.f32 %v2388_v53  ;;  %v2268_v55 = vmul.f32 %v5090_v30, %v5090_v30  ;;  %v5120_v6 = vpop.f32.mrf.mxu0 }
 0x5bf   :  { %v2390_v20 = vmul.f32 0.7978846, %v2358_v33  ;;  %v2507_v54 = vmul.f32 %v2475_v32, %v5008_v44  ;;  %v2360_v59 = vadd.f32 %v5063_v39, %v2328_v48  ;;  %v2361_v58 = vadd.f32 %v5076_v52, %v2329_v51 }
 0x5c0   :  { %v3491_v5 = vpop.eup %3490  ;;  %v2359_v26 = vadd.f32 %v2327_v31, %v5085_v62  ;;  %v2506_v38 = vmul.f32 %v2474_v42, %v4998_v40  ;;  %v2300_v43 = vmul.f32 %v5090_v30, %v2268_v55  ;;  %v2478_v2 = vmul.f32 0.5, %v2446_v60 }
 0x5c1   :  { %v2447_v3 = vadd.f32 1.0, %v3491_v5  ;;  %3504 = vtanh.f32 %v2390_v20  ;;  %v3493_v4 = vpop.eup %3492  ;;  %v2393_v45 = vmul.f32 0.7978846, %v2361_v58  ;;  %v2531_v44 = vpack.c.bf16 %v2505_v9, %v5081_v63 }
 0x5c2   :  { %v2391_v14 = vmul.f32 0.7978846, %v2359_v26  ;;  %v3495_v25 = vpop.eup %3494  ;;  %v2332_v37 = vmul.f32 0.044715, %v2300_v43  ;;  %v2266_v16 = vmul.f32 %v5102_v17, %v5102_v17  ;;  %v2269_v40 = vmul.f32 %v5110_v29, %v5110_v29 }
 0x5c3   :  { %v2479_v53 = vmul.f32 0.5, %v2447_v3  ;;  %v2509_v1 = vmul.f32 %v5004_v11, %v2477_v19  ;;  %v2392_v50 = vmul.f32 0.7978846, %v2360_v59  ;;  %3199 = vmatmul.mubr.bf16.gmra.mxu1 %v2531_v44  ;;  %v2267_v32 = vmul.f32 %v5120_v6, %v5120_v6 }
 0x5c4   :  { %v2532_v48 = vpack.c.bf16 %v2507_v54, %v2506_v38  ;;  %v3497_v0 = vpop.eup %3496  ;;  %v2449_v42 = vadd.f32 1.0, %v3493_v4  ;;  %3506 = vtanh.f32 %v2391_v14  ;;  %v2364_v9 = vadd.f32 %v5090_v30, %v2332_v37 }
 0x5c5   :  { %v2511_v63 = vmul.f32 %v2479_v53, %v5030_v15  ;;  %3508 = vtanh.f32 %v2393_v45  ;;  %v2298_v33 = vmul.f32 %v2266_v16, %v5102_v17  ;;  %v2301_v60 = vmul.f32 %v5110_v29, %v2269_v40 }
 0x5c6   :  { %v2299_v11 = vmul.f32 %v2267_v32, %v5120_v6  ;;  %3202 = vmatprep.mubr.bf16.mxu1 %v2532_v48  ;;  %v2508_v51 = vmul.f32 %v4992_v23, %v2476_v18  ;;  %v2510_v31 = vmul.f32 %v2478_v2, %v5019_v49  ;;  %v2450_v19 = vadd.f32 1.0, %v3497_v0 }
 0x5c7   :  { %v2448_v20 = vadd.f32 1.0, %v3495_v25  ;;  %3510 = vtanh.f32 %v2392_v50  ;;  %v2330_v55 = vmul.f32 0.044715, %v2298_v33  ;;  %v2333_v15 = vmul.f32 0.044715, %v2301_v60 }
 0x5c8   :  { %v2396_v5 = vmul.f32 0.7978846, %v2364_v9  ;;  %v2331_v54 = vmul.f32 0.044715, %v2299_v11  ;;  %v2534_v59 = vpack.c.bf16 %v2511_v63, %v2510_v31  ;;  %v2481_v26 = vmul.f32 0.5, %v2449_v42 }
 0x5c9   :  { %v3499_v58 = vpop.eup %3498  ;;  %v2362_v38 = vadd.f32 %v2330_v55, %v5102_v17  ;;  %v2365_v3 = vadd.f32 %v5110_v29, %v2333_v15  ;;  %v2533_v43 = vpack.c.bf16 %v2509_v1, %v2508_v51  ;;  %v2482_v45 = vmul.f32 0.5, %v2450_v19 }
 0x5ca   :  { %v3501_v4 = vpop.eup %3500  ;;  %v2451_v23 = vadd.f32 1.0, %v3499_v58  ;;  %v2363_v49 = vadd.f32 %v2331_v54, %v5120_v6  ;;  %v2480_v2 = vmul.f32 0.5, %v2448_v20  ;;  %3512 = vtanh.f32 %v2396_v5 }
 0x5cb   :  { %v3503_v18 = vpop.eup %3502  ;;  %v2394_v14 = vmul.f32 0.7978846, %v2362_v38  ;;  %v2397_v44 = vmul.f32 0.7978846, %v2365_v3  ;;  %3203 = vmatmul.mubr.bf16.gmra.mxu1 %v2533_v43  ;;  %v2513_v16 = vmul.f32 %v5022_v27, %v2481_v26  ;;  %v2453_v40 = vadd.f32 1.0, %v3501_v4 }
 0x5cc   :  { %v2483_v25 = vmul.f32 0.5, %v2451_v23  ;;  %v2395_v53 = vmul.f32 0.7978846, %v2363_v49  ;;  %3206 = vmatprep.mubr.bf16.mxu1 %v2534_v59  ;;  %v2514_v1 = vmul.f32 %v2482_v45, %v5043_v56  ;;  %v2512_v48 = vmul.f32 %v5013_v57, %v2480_v2 }
 0x5cd   :  { %3514 = vtanh.f32 %v2394_v14  ;;  %v2452_v0 = vadd.f32 1.0, %v3503_v18  ;;  %v2485_v9 = vmul.f32 0.5, %v2453_v40 }
 0x5ce   :  { %v3505_v37 = vpop.eup %3504  ;;  %v2515_v50 = vmul.f32 %v2483_v25, %v5054_v46  ;;  %3516 = vtanh.f32 %v2397_v44  ;;  %v2535_v33 = vpack.c.bf16 %v2513_v16, %v2512_v48 }
 0x5cf   :  { %v2454_v32 = vadd.f32 1.0, %v3505_v37  ;;  %3518 = vtanh.f32 %v2395_v53  ;;  %v2484_v27 = vmul.f32 0.5, %v2452_v0  ;;  %v2517_v56 = vmul.f32 %v5048_v7, %v2485_v9 }
 0x5d0   :  { %v2536_v42 = vpack.c.bf16 %v2515_v50, %v2514_v1 }
 0x5d1   :  { %v3507_v63 = vpop.eup %3506  ;;  %v2486_v11 = vmul.f32 0.5, %v2454_v32  ;;  %v2516_v55 = vmul.f32 %v5038_v61, %v2484_v27  ;;  %v5267_v27 = vld [vmem:[#allocation18_spill] sm:$0xff] }
 0x5d2   :  { %v3509_v60 = vpop.eup %3508  ;;  %v2455_v51 = vadd.f32 1.0, %v3507_v63 }
 0x5d3   :  { %3207 = vmatmul.mubr.bf16.gmra.mxu1 %v2535_v33  ;;  %v2457_v46 = vadd.f32 1.0, %v3509_v60  ;;  %v2518_v20 = vmul.f32 %v2486_v11, %v5069_v35  ;;  %v2537_v58 = vpack.c.bf16 %v2517_v56, %v2516_v55 }
 0x5d4   :  { %v3511_v31 = vpop.eup %3510  ;;  %v2487_v19 = vmul.f32 0.5, %v2455_v51  ;;  %3210 = vmatprep.mubr.bf16.mxu1 %v2536_v42 }
 0x5d5   :  { %v2456_v15 = vadd.f32 1.0, %v3511_v31  ;;  %v2489_v59 = vmul.f32 0.5, %v2457_v46  ;;  %v5269_v46 = vld [vmem:[#allocation20_spill] sm:$0xff] }
 0x5d6   :  { %v2519_v57 = vmul.f32 %v2487_v19, %v5085_v62  ;;  %v5268_v19 = vld [vmem:[#allocation23_spill] sm:$0xff] }
 0x5d7   :  { %v3513_v54 = vpop.eup %3512  ;;  %v2488_v3 = vmul.f32 0.5, %v2456_v15  ;;  %v2521_v7 = vmul.f32 %v5076_v52, %v2489_v59  ;;  %v5271_v15 = vld [vmem:[#allocation22_spill] sm:$0xff] }
 0x5d8   :  { %v2538_v5 = vpack.c.bf16 %v2519_v57, %v2518_v20  ;;  %v2460_v61 = vadd.f32 1.0, %v3513_v54  ;;  %v5270_v57 = vld [vmem:[#allocation21_spill] sm:$0xff]  ;;  %v5272_v54 = vld [vmem:[#allocation19_spill] sm:$0xff] }
 0x5d9   :  { %v2520_v62 = vmul.f32 %v5063_v39, %v2488_v3 }
 0x5da   :  { %v3515_v26 = vpop.eup %3514  ;;  %v2492_v25 = vmul.f32 0.5, %v2460_v61 }
 0x5db   :  { %v3517_v38 = vpop.eup %3516  ;;  %v2458_v43 = vadd.f32 1.0, %v3515_v26  ;;  %3211 = vmatmul.mubr.bf16.gmra.mxu1 %v2537_v58  ;;  %v2539_v44 = vpack.c.bf16 %v2521_v7, %v2520_v62  ;;  %v5273_v26 = vld [vmem:[#allocation24_spill] sm:$0xff]  ;;  %v5276_v62 = vld [vmem:[#allocation25_spill] sm:$0xff] }
 0x5dc   :  { %v3519_v4 = vpop.eup %3518  ;;  %3214 = vmatprep.mubr.bf16.mxu1 %v2538_v5  ;;  %v2461_v35 = vadd.f32 1.0, %v3517_v38  ;;  %v2524_v52 = vmul.f32 %v5090_v30, %v2492_v25 }
 0x5dd   :  { %v2490_v45 = vmul.f32 0.5, %v2458_v43  ;;  %v2459_v23 = vadd.f32 1.0, %v3519_v4  ;;  %v5274_v43 = vld [vmem:[#allocation17_spill] sm:$0xff] }
 0x5de   :  { %v2493_v2 = vmul.f32 0.5, %v2461_v35 }
 0x5df   :  { %v2491_v49 = vmul.f32 0.5, %v2459_v23  ;;  %v2522_v18 = vmul.f32 %v2490_v45, %v5102_v17  ;;  %v5275_v45 = vld [vmem:[#allocation26_spill] sm:$0xff] }
 0x5e0   :  { %v2525_v37 = vmul.f32 %v5110_v29, %v2493_v2 }
 0x5e1   :  { %v2523_v14 = vmul.f32 %v2491_v49, %v5120_v6 }
 0x5e2   :  { %v2541_v16 = vpack.c.bf16 %v2525_v37, %v2524_v52  ;;  %v5279_v37 = vld [vmem:[#allocation30_spill] sm:$0xff] }
 0x5e3   :  { %3215 = vmatmul.mubr.bf16.gmra.mxu1 %v2539_v44  ;;  %v2540_v53 = vpack.c.bf16 %v2523_v14, %v2522_v18  ;;  %v5277_v18 = vld [vmem:[#allocation28_spill] sm:$0xff]  ;;  %v5278_v44 = vld [vmem:[#allocation27_spill] sm:$0xff] }
 0x5e5   :  { %3218 = vmatprep.mubr.bf16.mxu1 %v2540_v53 }
 0x5eb   :  { %3219 = vmatmul.mubr.bf16.gmra.mxu1 %v2541_v16 }
 0x66d   :  { %v3192_v40 = vpop.f32.mrf.mxu1 }
 0x66e   :  { %v2769_v39 = vadd.f32 %v3192_v40, %v4501_v10  ;;  %v5280_v40 = vld [vmem:[#allocation29_spill] sm:$0xff] }
 0x66f   :  { %v2640_v1 = vpop.f32.mrf.mxu1 }
 0x670   :  { %2801 = vst [vmem:[#allocation11 + $0x10] sm:$0xff] %v2769_v39  ;;  %v2767_v17 = vadd.f32 %v2640_v1, %v4498_v28 }
 0x671   :  { %v3193_v50 = vpop.f32.mrf.mxu1 }
 0x672   :  { %2799 = vst [vmem:[#allocation11] sm:$0xff] %v2767_v17  ;;  %v2770_v6 = vadd.f32 %v3193_v50, %v4507_v34  ;;  %v5281_v17 = vld [vmem:[#allocation32_spill] sm:$0xff] }
 0x673   :  { %v2643_v32 = vpop.f32.mrf.mxu1 }
 0x674   :  { %2802 = vst [vmem:[#allocation11 + $0x18] sm:$0xff] %v2770_v6  ;;  %v2768_v29 = vadd.f32 %v2643_v32, %v4503_v41  ;;  %v5282_v32 = vld [vmem:[#allocation31_spill] sm:$0xff] }
 0x676   :  { %2800 = vst [vmem:[#allocation11 + $0x8] sm:$0xff] %v2768_v29 }
 0x677   :  { %v3196_v48 = vpop.f32.mrf.mxu1 }
 0x678   :  { %v2773_v30 = vadd.f32 %v3196_v48, %v4513_v8 }
 0x679   :  { %v2656_v0 = vpop.f32.mrf.mxu1 }
 0x67a   :  { %2805 = vst [vmem:[#allocation11 + $0x30] sm:$0xff] %v2773_v30  ;;  %v2771_v10 = vadd.f32 %v2656_v0, %v4509_v13  ;;  %v5283_v30 = vld [vmem:[#allocation34_spill] sm:$0xff] }
 0x67b   :  { %v3197_v42 = vpop.f32.mrf.mxu1 }
 0x67c   :  { %2803 = vst [vmem:[#allocation11 + $0x20] sm:$0xff] %v2771_v10  ;;  %v2774_v28 = vadd.f32 %v3197_v42, %v4519_v21  ;;  %v5284_v42 = vld [vmem:[#allocation33_spill] sm:$0xff] }
 0x67d   :  { %v2659_v63 = vpop.f32.mrf.mxu1 }
 0x67e   :  { %2806 = vst [vmem:[#allocation11 + $0x38] sm:$0xff] %v2774_v28  ;;  %v2772_v34 = vadd.f32 %v2659_v63, %v4515_v24 }
 0x680   :  { %2804 = vst [vmem:[#allocation11 + $0x28] sm:$0xff] %v2772_v34  ;;  %v5285_v34 = vld [vmem:[#allocation36_spill] sm:$0xff] }
 0x683   :  { %v3200_v9 = vpop.f32.mrf.mxu1 }
 0x684   :  { %v2777_v41 = vadd.f32 %v3200_v9, %v4525_v36 }
 0x685   :  { %v2672_v33 = vpop.f32.mrf.mxu1 }
 0x686   :  { %2809 = vst [vmem:[#allocation11 + $0x50] sm:$0xff] %v2777_v41  ;;  %v2775_v8 = vadd.f32 %v2672_v33, %v4521_v12  ;;  %v5286_v33 = vld [vmem:[#allocation35_spill] sm:$0xff] }
 0x687   :  { %v3201_v60 = vpop.f32.mrf.mxu1 }
 0x688   :  { %2807 = vst [vmem:[#allocation11 + $0x40] sm:$0xff] %v2775_v8  ;;  %v2778_v13 = vadd.f32 %v3201_v60, %v4531_v47 }
 0x689   :  { %v2675_v11 = vpop.f32.mrf.mxu1 }
 0x68a   :  { %2810 = vst [vmem:[#allocation11 + $0x58] sm:$0xff] %v2778_v13  ;;  %v2776_v21 = vadd.f32 %v2675_v11, %v4527_v22 }
 0x68b   :  { %v3204_v51 = vpop.f32.mrf.mxu1 }
 0x68c   :  { %2808 = vst [vmem:[#allocation11 + $0x48] sm:$0xff] %v2776_v21  ;;  %v2781_v24 = vadd.f32 %v3204_v51, %v5267_v27 }
 0x68d   :  { %v2688_v31 = vpop.f32.mrf.mxu1 }
 0x68e   :  { %2813 = vst [vmem:[#allocation11 + $0x70] sm:$0xff] %v2781_v24  ;;  %v2779_v36 = vadd.f32 %v2688_v31, %v5268_v19 }
 0x68f   :  { %v3205_v56 = vpop.f32.mrf.mxu1 }
 0x690   :  { %2811 = vst [vmem:[#allocation11 + $0x60] sm:$0xff] %v2779_v36  ;;  %v2782_v12 = vadd.f32 %v3205_v56, %v5269_v46 }
 0x691   :  { %v2691_v20 = vpop.f32.mrf.mxu1 }
 0x692   :  { %2814 = vst [vmem:[#allocation11 + $0x78] sm:$0xff] %v2782_v12  ;;  %v2780_v47 = vadd.f32 %v2691_v20, %v5270_v57 }
 0x693   :  { %v3208_v55 = vpop.f32.mrf.mxu1 }
 0x694   :  { %2812 = vst [vmem:[#allocation11 + $0x68] sm:$0xff] %v2780_v47  ;;  %v2785_v22 = vadd.f32 %v3208_v55, %v5271_v15 }
 0x695   :  { %v2704_v5 = vpop.f32.mrf.mxu1 }
 0x696   :  { %2817 = vst [vmem:[#allocation11 + $0x90] sm:$0xff] %v2785_v22  ;;  %v2783_v59 = vadd.f32 %v2704_v5, %v5272_v54 }
 0x697   :  { %v3209_v58 = vpop.f32.mrf.mxu1 }
 0x698   :  { %2815 = vst [vmem:[#allocation11 + $0x80] sm:$0xff] %v2783_v59  ;;  %v2786_v38 = vadd.f32 %v3209_v58, %v5273_v26 }
 0x699   :  { %v2707_v3 = vpop.f32.mrf.mxu1 }
 0x69a   :  { %2818 = vst [vmem:[#allocation11 + $0x98] sm:$0xff] %v2786_v38  ;;  %v2784_v4 = vadd.f32 %v2707_v3, %v5274_v43 }
 0x69b   :  { %v3212_v7 = vpop.f32.mrf.mxu1 }
 0x69c   :  { %2816 = vst [vmem:[#allocation11 + $0x88] sm:$0xff] %v2784_v4  ;;  %v2789_v35 = vadd.f32 %v3212_v7, %v5275_v45 }
 0x69d   :  { %v2720_v23 = vpop.f32.mrf.mxu1 }
 0x69e   :  { %2821 = vst [vmem:[#allocation11 + $0xb0] sm:$0xff] %v2789_v35  ;;  %v2787_v61 = vadd.f32 %v2720_v23, %v5276_v62 }
 0x69f   :  { %v3213_v49 = vpop.f32.mrf.mxu1 }
 0x6a0   :  { %2819 = vst [vmem:[#allocation11 + $0xa0] sm:$0xff] %v2787_v61  ;;  %v2790_v2 = vadd.f32 %v3213_v49, %v5277_v18 }
 0x6a1   :  { %v2723_v14 = vpop.f32.mrf.mxu1 }
 0x6a2   :  { %2822 = vst [vmem:[#allocation11 + $0xb8] sm:$0xff] %v2790_v2  ;;  %v2788_v25 = vadd.f32 %v2723_v14, %v5278_v44 }
 0x6a3   :  { %v3216_v53 = vpop.f32.mrf.mxu1 }
 0x6a4   :  { %2820 = vst [vmem:[#allocation11 + $0xa8] sm:$0xff] %v2788_v25  ;;  %v2793_v52 = vadd.f32 %v3216_v53, %v5279_v37 }
 0x6a5   :  { %v2736_v16 = vpop.f32.mrf.mxu1 }
 0x6a6   :  { %2825 = vst [vmem:[#allocation11 + $0xd0] sm:$0xff] %v2793_v52  ;;  %v2791_v39 = vadd.f32 %v2736_v16, %v5280_v40 }
 0x6a7   :  { %v3217_v1 = vpop.f32.mrf.mxu1 }
 0x6a8   :  { %2823 = vst [vmem:[#allocation11 + $0xc0] sm:$0xff] %v2791_v39  ;;  %v2794_v50 = vadd.f32 %v3217_v1, %v5281_v17 }
 0x6a9   :  { %v2739_v6 = vpop.f32.mrf.mxu1 }
 0x6aa   :  { %2826 = vst [vmem:[#allocation11 + $0xd8] sm:$0xff] %v2794_v50  ;;  %v2792_v29 = vadd.f32 %v2739_v6, %v5282_v32 }
 0x6ab   :  { %v3220_v48 = vpop.f32.mrf.mxu1 }
 0x6ac   :  { %2824 = vst [vmem:[#allocation11 + $0xc8] sm:$0xff] %v2792_v29  ;;  %v2797_v0 = vadd.f32 %v3220_v48, %v5283_v30 }
 0x6ad   :  { %v2752_v10 = vpop.f32.mrf.mxu1 }
 0x6ae   :  { %2829 = vst [vmem:[#allocation11 + $0xf0] sm:$0xff] %v2797_v0  ;;  %v2795_v28 = vadd.f32 %v2752_v10, %v5284_v42 }
 0x6af   :  { %v3221_v63 = vpop.f32.mrf.mxu1 }
 0x6b0   :  { %2827 = vst [vmem:[#allocation11 + $0xe0] sm:$0xff] %v2795_v28  ;;  %v2798_v9 = vadd.f32 %v3221_v63, %v5285_v34 }
 0x6b1   :  { %v2755_v41 = vpop.f32.mrf.mxu1 }
 0x6b2   :  { %2830 = vst [vmem:[#allocation11 + $0xf8] sm:$0xff] %v2798_v9  ;;  %v2796_v8 = vadd.f32 %v2755_v41, %v5286_v33 }
 0x6b4   :  { %2828 = vst [vmem:[#allocation11 + $0xe8] sm:$0xff] %v2796_v8 }
 0x6b5   :  { %3663 = shalt.err (!%p3660_p1)
}
 0x6b6   :  { %2842 = dma.vmem_to_hbm [thread:$0]  %s2837_s6, 4096, %s5201_s9, [#allocation4], %s3685_s23, %s3685_s23, %s3686_s24  }
 0x6b7   :  { %3678 = dma.done.wait [#allocation4], 4096  }
 0x6b8   :  { %3679 = vsyncadd [#allocation4], 4294963200 }
 0x6b9   :  { %2846 = vsyncpa [#allocation3], 1 }
 0x6ba   :  { %2847 = vsyncpa [#allocation6], 1 }
 0x6bb   :  { %2848 = vsyncpa [#allocation9], 1 }
 0x6bc   :  { %2849 = vsyncpa [#allocation4], 1 }

</bundles_post_ra>
